<compile_context>
chip_gen: v7x
topology: tpu7x:2x2x1
jax: 0.10.0
libtpu: 0.0.40
codegen_flags: <defaults>
</compile_context>

<pallas_src>
import jax
import jax.numpy as jnp
from jax import lax
from jax.experimental import pallas as pl
from jax.experimental.pallas import tpu as pltpu

# ----------------------------------------------------------------------------
# Small test configuration (shapes consistent with the module's forward)
# ----------------------------------------------------------------------------
DIM = 2
C_LOCAL = 32            # c_dim_local
C_GLOBAL = 16           # c_dim_global
Z_RES = 16              # z_resolution
HIDDEN = 128            # hidden_size (chosen lane-dense)
B = 2                   # batch
T = 64                  # query points per example
PLANE = 8               # local feature plane resolution (H = W)

GEO_IN = C_LOCAL + DIM              # mixer input dim (no positional encoding) = 34
GEO_H1 = min(GEO_IN, HIDDEN)        # ResnetBlockFC hidden size of fc_geo1 = 34
C_DIM = C_GLOBAL + 3                # input3 == 'cam_ori' -> +3 = 19
N_BLOCKS = 5
NUM_CBN = 4 * N_BLOCKS + 2          # gamma/beta slots: (bn_0, bn_1) per block + final bn
BN_EPS = 1e-5

N_ROWS = B * T                      # flattened batch*points = 128 (batch-major)
PAD_IN = 128                        # mixer input padded to lane width
PAD_OUT = 128                       # fc_out padded to lane width
C_PAD = 32                          # conditioning channels padded
B_PAD = 8                           # conditioning rows padded to a sublane tile
GB_W = NUM_CBN * HIDDEN             # fused gamma/beta width = 2816

# Matmul operand dtype for the 18 weight matmuls (activations are cast to the
# weight dtype inside `lin`; accumulation stays f32).  jnp.bfloat16 -> ~2-4x
# less MXU time; jnp.float32 -> bit-accuracy vs the PyTorch reference.
MATMUL_DTYPE = jnp.float32


# ----------------------------------------------------------------------------
# Pallas kernel: full decoder hot path (mixer blocks, 5 CResnetBlockConv1d,
# final CBatchNorm + ReLU + 1x1 conv) fused into one VMEM-resident kernel.
# Layout: every activation is (N, C) with N = B*T (channels-last); PyTorch's
# NCT Conv1d with kernel-size 1 is therefore a plain matmul over channels.
# ----------------------------------------------------------------------------
def decoder_kernel(
    x_ref, c_ref,
    g1w0_ref, g1b0_ref, g1w1_ref, g1b1_ref, g1ws_ref,
    g2w0_ref, g2b0_ref, g2w1_ref, g2b1_ref,
    g3w0_ref, g3b0_ref, g3w1_ref, g3b1_ref,
    cbnw_ref, cbnb_ref,
    fc0w_ref, fc0b_ref, fc1w_ref, fc1b_ref,
    outw_ref, outb_ref,
    o_ref,
    gb_ref,
):
    f32 = jnp.float32
    H = HIDDEN

    def lin(x, w, bias=None):
        # 1x1 Conv1d / nn.Linear over channels; w is (in, out), bias is (1, out).
        y = jnp.dot(x.astype(w.dtype), w, preferred_element_type=f32)
        return y if bias is None else y + bias

    def relu(v):
        return jnp.maximum(v, 0.0)

    # Hoisted constants (JAX does not CSE broadcasts inside loop bodies).
    ones_row = jnp.ones((1, N_ROWS), f32)          # MXU batch-reduction vector
    inv_n = jnp.float32(1.0 / N_ROWS)

    # ---- conditioning: ONE matmul for all 22 gamma/beta projections, kept at
    # per-batch granularity in a (NUM_CBN, B_PAD, H) scratch (one vreg/slot).
    gb = lin(c_ref[...], cbnw_ref[...], cbnb_ref[...])            # (B_PAD, 22*H), f32
    for s in range(NUM_CBN):                                      # static scatter
        gb_ref[s] = gb[:, s * H:(s + 1) * H]

    def cbn(xv, gamma, beta):
        # Conditional BatchNorm1d, training-mode statistics over all N rows.
        # Single ones-row matmul against concat([x, x*x], lanes) -> (1, 2H):
        # one MXU reduction (fills the 256-wide MXU N dim on v6e/v7x).
        s12 = jnp.dot(ones_row, jnp.concatenate([xv, xv * xv], axis=-1),
                      preferred_element_type=f32)                 # (1, 2H)
        mean = s12[:, :H] * inv_n
        var = jnp.maximum(s12[:, H:] * inv_n - mean * mean, 0.0)
        # y = a*x + b, with a/b at (B_PAD, H) granularity before touching (N, H).
        a = gamma * lax.rsqrt(var + BN_EPS)                       # rsqrt on EUP
        b = beta - a * mean
        # Batch-major rows: rows [bi*T, (bi+1)*T) belong to batch bi.
        parts = [a[bi:bi + 1, :] * xv[bi * T:(bi + 1) * T, :] + b[bi:bi + 1, :]
                 for bi in range(B)]
        return jnp.concatenate(parts, axis=0)

    x = x_ref[...]                                   # (N, PAD_IN), padded lanes are zero

    # ---- mixer: fc_geo1 / fc_geo2 / fc_geo3 (ResnetBlockFC, pre-activation) ----
    h = lin(relu(x), g1w0_ref[...], g1b0_ref[...])
    dx = lin(relu(h), g1w1_ref[...], g1b1_ref[...])
    net = lin(x, g1ws_ref[...]) + dx                 # learned shortcut (no bias)

    h = lin(relu(net), g2w0_ref[...], g2b0_ref[...])
    net = net + lin(relu(h), g2w1_ref[...], g2b1_ref[...])

    h = lin(relu(net), g3w0_ref[...], g3b0_ref[...])
    net = net + lin(relu(h), g3w1_ref[...], g3b1_ref[...])

    # ---- 5 x CResnetBlockConv1d (identity shortcut).  fori_loop bounds live
    # ranges; weights / gamma / beta are indexed dynamically along the leading
    # (untiled) axis of their stacked refs.
    def block_body(i, net):
        slot = 4 * i
        h = lin(relu(cbn(net, gb_ref[slot], gb_ref[slot + 1])),
                fc0w_ref[i], fc0b_ref[i])
        net = net + lin(relu(cbn(h, gb_ref[slot + 2], gb_ref[slot + 3])),
                        fc1w_ref[i], fc1b_ref[i])
        return net

    net = lax.fori_loop(0, N_BLOCKS, block_body, net)

    # ---- final CBN -> ReLU -> fc_out (lane-dense 128-wide padded output) ----
    net = relu(cbn(net, gb_ref[4 * N_BLOCKS], gb_ref[4 * N_BLOCKS + 1]))
    o_ref[...] = lin(net, outw_ref[...], outb_ref[...]).astype(o_ref.dtype)


# ----------------------------------------------------------------------------
# Glue: bilinear plane-feature sampling (F.grid_sample, align_corners=True,
# border padding), equivalent to ConvONet's sample_plane_feature.
# TODO(synk): this data-dependent gather stays in JAX glue, not in the kernel.
# ----------------------------------------------------------------------------
def normalize_coordinate(p, padding=0.1):
    xy = p / (1.0 + padding + 1e-3) + 0.5          # [-0.5, 0.5] -> [0, 1)
    return jnp.clip(xy, 0.0, 1.0 - 1e-6)


def sample_plane_feature(points_xy, c_local):
    Bn, Cc, Hh, Ww = c_local.shape
    xy = normalize_coordinate(points_xy)            # (B, T, 2)
    vgrid = 2.0 * xy - 1.0                          # grid_sample coords in [-1, 1]
    gx = (vgrid[..., 0] + 1.0) * 0.5 * (Ww - 1)     # x indexes width
    gy = (vgrid[..., 1] + 1.0) * 0.5 * (Hh - 1)     # y indexes height
    x0 = jnp.floor(gx)
    y0 = jnp.floor(gy)
    wx1 = (gx - x0)[..., None]
    wy1 = (gy - y0)[..., None]
    x0i = jnp.clip(x0, 0, Ww - 1).astype(jnp.int32)
    x1i = jnp.clip(x0 + 1, 0, Ww - 1).astype(jnp.int32)
    y0i = jnp.clip(y0, 0, Hh - 1).astype(jnp.int32)
    y1i = jnp.clip(y0 + 1, 0, Hh - 1).astype(jnp.int32)
    feat = jnp.transpose(c_local, (0, 2, 3, 1)).reshape(Bn, Hh * Ww, Cc)

    def gather(yi, xi):
        idx = yi * Ww + xi                                          # (B, T)
        return jnp.take_along_axis(feat, idx[..., None], axis=1)    # (B, T, C)

    v00 = gather(y0i, x0i)
    v01 = gather(y0i, x1i)
    v10 = gather(y1i, x0i)
    v11 = gather(y1i, x1i)
    return ((1 - wy1) * (1 - wx1) * v00 + (1 - wy1) * wx1 * v01
            + wy1 * (1 - wx1) * v10 + wy1 * wx1 * v11)              # (B, T, C)


# ----------------------------------------------------------------------------
# Parameter packing: pad narrow dims to lane-dense widths and fuse all 22
# conditional-BN gamma/beta projections into one (C_PAD, 22*HIDDEN) matrix.
# Weight matmul operands may be cast to MATMUL_DTYPE (bf16 option); biases,
# conditioning projection and all BN math stay f32.
# ----------------------------------------------------------------------------
def pack_params(p, matmul_dtype=MATMUL_DTYPE):
    f32 = jnp.float32

    def pad2(a, rows, cols):
        a = jnp.asarray(a, f32)
        return jnp.pad(a, ((0, rows - a.shape[0]), (0, cols - a.shape[1])))

    def w_(a):                                   # matmul weight (possibly bf16)
        return jnp.asarray(a, f32).astype(matmul_dtype)

    def b_(a):                                   # bias, always f32
        return jnp.asarray(a, f32)

    packed = [
        pad2(p["g1w0"], PAD_IN, HIDDEN).astype(matmul_dtype), b_(pad2(p["g1b0"], 1, HIDDEN)),
        pad2(p["g1w1"], HIDDEN, HIDDEN).astype(matmul_dtype), b_(pad2(p["g1b1"], 1, HIDDEN)),
        pad2(p["g1ws"], PAD_IN, HIDDEN).astype(matmul_dtype),
        w_(p["g2w0"]), b_(p["g2b0"]), w_(p["g2w1"]), b_(p["g2b1"]),
        w_(p["g3w0"]), b_(p["g3b0"]), w_(p["g3w1"]), b_(p["g3b1"]),
    ]

    # Slot order per block i: [bn_0.gamma, bn_0.beta, bn_1.gamma, bn_1.beta],
    # then the final bn (gamma, beta).  Matches slot indexing in the kernel.
    w_slots, b_slots = [], []
    for i in range(N_BLOCKS):
        w_slots += [p["bn0gw"][i], p["bn0bw"][i], p["bn1gw"][i], p["bn1bw"][i]]
        b_slots += [p["bn0gb"][i], p["bn0bb"][i], p["bn1gb"][i], p["bn1bb"][i]]
    w_slots += [p["bngw"], p["bnbw"]]
    b_slots += [p["bngb"], p["bnbb"]]
    cbn_w = jnp.concatenate([pad2(wi, C_PAD, HIDDEN) for wi in w_slots], axis=-1)
    cbn_b = jnp.concatenate([b_(bi) for bi in b_slots], axis=-1)
    packed += [cbn_w, cbn_b]          # conditioning projection stays f32 (tiny)

    packed += [
        w_(p["fc0w"]), b_(p["fc0b"]), w_(p["fc1w"]), b_(p["fc1b"]),
        pad2(p["outw"], HIDDEN, PAD_OUT).astype(matmul_dtype), b_(pad2(p["outb"], 1, PAD_OUT)),
    ]
    return packed


# ----------------------------------------------------------------------------
# Wrapper
# ----------------------------------------------------------------------------
def decoder_forward(scale_factor, points_xy, c_global, c_local, params):
    Bn, Tn, _ = points_xy.shape
    assert Bn == B and Tn == T, "test kernel is specialised to the module constants"

    c_samp = sample_plane_feature(points_xy, c_local)                 # (B, T, C_LOCAL)
    net_in = jnp.concatenate([points_xy, c_samp], axis=-1)            # (B, T, GEO_IN)
    cond = jnp.concatenate([c_global, scale_factor], axis=-1)         # (B, C_DIM)

    # Batch-major row flattening (row n -> batch n // T): CBN relies on this.
    x_flat = net_in.reshape(N_ROWS, GEO_IN).astype(jnp.float32)
    x_pad = jnp.pad(x_flat, ((0, 0), (0, PAD_IN - GEO_IN)))           # lane-dense input
    c_pad = jnp.zeros((B_PAD, C_PAD), jnp.float32).at[:Bn, :C_DIM].set(
        cond.astype(jnp.float32))                                     # (B_PAD, C_PAD)

    packed = pack_params(params)
    args = [x_pad, c_pad] + packed

    # Scheduler hint so XLA overlaps the grid-sample gather with the kernel.
    mm = lambda n, k, m: 2 * n * k * m
    flops = int(
        3 * mm(N_ROWS, PAD_IN, HIDDEN)              # fc_geo1 (fc_0, fc_1, shortcut)
        + 4 * mm(N_ROWS, HIDDEN, HIDDEN)            # fc_geo2 / fc_geo3
        + mm(B_PAD, C_PAD, GB_W)                    # fused gamma/beta conditioning
        + NUM_CBN * mm(1, N_ROWS, 2 * HIDDEN)       # fused BN batch reductions (MXU)
        + 2 * N_BLOCKS * mm(N_ROWS, HIDDEN, HIDDEN) # block fc_0 / fc_1
        + mm(N_ROWS, HIDDEN, PAD_OUT)               # fc_out
        + NUM_CBN * 6 * N_ROWS * HIDDEN             # CBN elementwise (x*x, a*x+b)
    )
    bytes_accessed = int(
        4 * (x_pad.size + c_pad.size + N_ROWS * PAD_OUT)
        + sum(int(a.size) * a.dtype.itemsize for a in packed))
    cost = pl.CostEstimate(flops=flops, transcendentals=int(NUM_CBN * HIDDEN),
                           bytes_accessed=bytes_accessed)

    out_pad = pl.pallas_call(
        decoder_kernel,
        out_shape=jax.ShapeDtypeStruct((N_ROWS, PAD_OUT), jnp.float32),
        in_specs=[pl.BlockSpec(memory_space=pltpu.MemorySpace.VMEM)] * len(args),
        out_specs=pl.BlockSpec(memory_space=pltpu.MemorySpace.VMEM),
        scratch_shapes=[pltpu.VMEM((NUM_CBN, B_PAD, HIDDEN), jnp.float32)],
        compiler_params=pltpu.CompilerParams(
            vmem_limit_bytes=32 * 1024 * 1024),       # explicit, not default scoped
        cost_estimate=cost,
    )(*args)
    return out_pad[:, :Z_RES].reshape(Bn, Tn, Z_RES)


# ----------------------------------------------------------------------------
# Deterministic synthetic parameter init (shapes follow the module __init__;
# weights stored pre-transposed as (in, out); biases as (1, out)).
# ----------------------------------------------------------------------------
def init_params(key):
    keys = iter(jax.random.split(key, 64))

    def rnd(shape, scale):
        return jax.random.normal(next(keys), shape, jnp.float32) * scale

    def w(shape):
        fan_in = shape[-2]
        return rnd(shape, 1.0 / (fan_in ** 0.5))

    def b(shape):
        return rnd(shape, 0.01)

    return {
        # fc_geo1: ResnetBlockFC(GEO_IN -> HIDDEN), size_h = min(GEO_IN, HIDDEN)
        "g1w0": w((GEO_IN, GEO_H1)), "g1b0": b((1, GEO_H1)),
        "g1w1": w((GEO_H1, HIDDEN)), "g1b1": b((1, HIDDEN)),
        "g1ws": w((GEO_IN, HIDDEN)),                     # shortcut, no bias
        # fc_geo2 / fc_geo3: ResnetBlockFC(HIDDEN -> HIDDEN)
        "g2w0": w((HIDDEN, HIDDEN)), "g2b0": b((1, HIDDEN)),
        "g2w1": w((HIDDEN, HIDDEN)), "g2b1": b((1, HIDDEN)),
        "g3w0": w((HIDDEN, HIDDEN)), "g3b0": b((1, HIDDEN)),
        "g3w1": w((HIDDEN, HIDDEN)), "g3b1": b((1, HIDDEN)),
        # 5 stacked CResnetBlockConv1d blocks
        "bn0gw": w((N_BLOCKS, C_DIM, HIDDEN)), "bn0gb": b((N_BLOCKS, 1, HIDDEN)),
        "bn0bw": w((N_BLOCKS, C_DIM, HIDDEN)), "bn0bb": b((N_BLOCKS, 1, HIDDEN)),
        "bn1gw": w((N_BLOCKS, C_DIM, HIDDEN)), "bn1gb": b((N_BLOCKS, 1, HIDDEN)),
        "bn1bw": w((N_BLOCKS, C_DIM, HIDDEN)), "bn1bb": b((N_BLOCKS, 1, HIDDEN)),
        "fc0w": w((N_BLOCKS, HIDDEN, HIDDEN)), "fc0b": b((N_BLOCKS, 1, HIDDEN)),
        "fc1w": w((N_BLOCKS, HIDDEN, HIDDEN)), "fc1b": b((N_BLOCKS, 1, HIDDEN)),
        # final CBatchNorm1d(C_DIM, HIDDEN)
        "bngw": w((C_DIM, HIDDEN)), "bngb": b((1, HIDDEN)),
        "bnbw": w((C_DIM, HIDDEN)), "bnbb": b((1, HIDDEN)),
        # fc_out: Conv1d(HIDDEN, Z_RES, 1)
        "outw": w((HIDDEN, Z_RES)), "outb": b((1, Z_RES)),
    }


if __name__ == "__main__":
    key = jax.random.PRNGKey(0)
    k_p, k_pts, k_g, k_l, k_s = jax.random.split(key, 5)

    params = init_params(k_p)
    points_xy = jax.random.uniform(k_pts, (B, T, DIM), jnp.float32, -0.5, 0.5)
    c_global = jax.random.normal(k_g, (B, C_GLOBAL), jnp.float32)
    c_local = jax.random.normal(k_l, (B, C_LOCAL, PLANE, PLANE), jnp.float32)
    scale_factor = jax.random.normal(k_s, (B, 3), jnp.float32)   # 'cam_ori' -> 3 dims

    out = jax.jit(decoder_forward)(scale_factor, points_xy, c_global, c_local, params)
    out = jax.block_until_ready(out)

    assert out.shape == (B, T, Z_RES), out.shape
    assert bool(jnp.isfinite(out).all())
    print("KERNEL_OK")
</pallas_src>

<mosaic_0001>
module attributes {stable_mosaic.version = 11 : i64} {
  func.func @decoder_kernel(%arg0: memref<128x128xf32, #tpu.memory_space<vmem>>, %arg1: memref<8x32xf32, #tpu.memory_space<vmem>>, %arg2: memref<128x128xf32, #tpu.memory_space<vmem>>, %arg3: memref<1x128xf32, #tpu.memory_space<vmem>>, %arg4: memref<128x128xf32, #tpu.memory_space<vmem>>, %arg5: memref<1x128xf32, #tpu.memory_space<vmem>>, %arg6: memref<128x128xf32, #tpu.memory_space<vmem>>, %arg7: memref<128x128xf32, #tpu.memory_space<vmem>>, %arg8: memref<1x128xf32, #tpu.memory_space<vmem>>, %arg9: memref<128x128xf32, #tpu.memory_space<vmem>>, %arg10: memref<1x128xf32, #tpu.memory_space<vmem>>, %arg11: memref<128x128xf32, #tpu.memory_space<vmem>>, %arg12: memref<1x128xf32, #tpu.memory_space<vmem>>, %arg13: memref<128x128xf32, #tpu.memory_space<vmem>>, %arg14: memref<1x128xf32, #tpu.memory_space<vmem>>, %arg15: memref<32x2816xf32, #tpu.memory_space<vmem>>, %arg16: memref<1x2816xf32, #tpu.memory_space<vmem>>, %arg17: memref<5x128x128xf32, #tpu.memory_space<vmem>>, %arg18: memref<5x1x128xf32, #tpu.memory_space<vmem>>, %arg19: memref<5x128x128xf32, #tpu.memory_space<vmem>>, %arg20: memref<5x1x128xf32, #tpu.memory_space<vmem>>, %arg21: memref<128x128xf32, #tpu.memory_space<vmem>>, %arg22: memref<1x128xf32, #tpu.memory_space<vmem>>, %arg23: memref<128x128xf32, #tpu.memory_space<vmem>>, %arg24: memref<22x8x128xf32, #tpu.memory_space<vmem>>) attributes {dimension_semantics = [], scalar_prefetch = 0 : i64, scratch_operands = 1 : i64, tpu.core_type = #tpu.core_type<tc>} {
    %cst = arith.constant 1.000000e+00 : f32
    %0 = vector.broadcast %cst : f32 to vector<1x128xf32>
    %c0 = arith.constant 0 : index
    %c0_0 = arith.constant 0 : index
    %1 = vector.load %arg1[%c0, %c0_0] : memref<8x32xf32, #tpu.memory_space<vmem>>, vector<8x32xf32>
    %c0_1 = arith.constant 0 : index
    %c0_2 = arith.constant 0 : index
    %2 = vector.load %arg15[%c0_1, %c0_2] : memref<32x2816xf32, #tpu.memory_space<vmem>>, vector<32x2816xf32>
    %c0_3 = arith.constant 0 : index
    %c0_4 = arith.constant 0 : index
    %3 = vector.load %arg16[%c0_3, %c0_4] : memref<1x2816xf32, #tpu.memory_space<vmem>>, vector<1x2816xf32>
    %cst_5 = arith.constant dense<0.000000e+00> : vector<8x2816xf32>
    %4 = tpu.matmul %1, %2, %cst_5 {dimension_numbers = #tpu.dot_dimension_numbers<[1], [0], [0], [1], [0, 0, 1, 1], [], []>} : vector<8x32xf32>, vector<32x2816xf32>, vector<8x2816xf32> -> vector<8x2816xf32>
    %5 = vector.broadcast %3 : vector<1x2816xf32> to vector<8x2816xf32>
    %6 = arith.addf %4, %5 : vector<8x2816xf32>
    %7 = vector.extract_strided_slice %6 {offsets = [0, 0], sizes = [8, 128], strides = [1, 1]} : vector<8x2816xf32> to vector<8x128xf32>
    %c0_6 = arith.constant 0 : index
    %c0_7 = arith.constant 0 : index
    %c0_8 = arith.constant 0 : index
    %8 = vector.load %arg24[%c0_6, %c0_7, %c0_8] : memref<22x8x128xf32, #tpu.memory_space<vmem>>, vector<1x8x128xf32>
    %9 = vector.shape_cast %8 : vector<1x8x128xf32> to vector<8x128xf32>
    %10 = vector.shape_cast %7 : vector<8x128xf32> to vector<1x8x128xf32>
    tpu.vector_store %arg24[%c0_6, %c0_7, %c0_8], %10 {strides = array<i32>} : memref<22x8x128xf32, #tpu.memory_space<vmem>>, vector<1x8x128xf32>,
    %11 = vector.extract_strided_slice %6 {offsets = [0, 128], sizes = [8, 128], strides = [1, 1]} : vector<8x2816xf32> to vector<8x128xf32>
    %c1 = arith.constant 1 : index
    %c0_9 = arith.constant 0 : index
    %c0_10 = arith.constant 0 : index
    %12 = vector.load %arg24[%c1, %c0_9, %c0_10] : memref<22x8x128xf32, #tpu.memory_space<vmem>>, vector<1x8x128xf32>
    %13 = vector.shape_cast %12 : vector<1x8x128xf32> to vector<8x128xf32>
    %14 = vector.shape_cast %11 : vector<8x128xf32> to vector<1x8x128xf32>
    tpu.vector_store %arg24[%c1, %c0_9, %c0_10], %14 {strides = array<i32>} : memref<22x8x128xf32, #tpu.memory_space<vmem>>, vector<1x8x128xf32>,
    %15 = vector.extract_strided_slice %6 {offsets = [0, 256], sizes = [8, 128], strides = [1, 1]} : vector<8x2816xf32> to vector<8x128xf32>
    %c2 = arith.constant 2 : index
    %c0_11 = arith.constant 0 : index
    %c0_12 = arith.constant 0 : index
    %16 = vector.load %arg24[%c2, %c0_11, %c0_12] : memref<22x8x128xf32, #tpu.memory_space<vmem>>, vector<1x8x128xf32>
    %17 = vector.shape_cast %16 : vector<1x8x128xf32> to vector<8x128xf32>
    %18 = vector.shape_cast %15 : vector<8x128xf32> to vector<1x8x128xf32>
    tpu.vector_store %arg24[%c2, %c0_11, %c0_12], %18 {strides = array<i32>} : memref<22x8x128xf32, #tpu.memory_space<vmem>>, vector<1x8x128xf32>,
    %19 = vector.extract_strided_slice %6 {offsets = [0, 384], sizes = [8, 128], strides = [1, 1]} : vector<8x2816xf32> to vector<8x128xf32>
    %c3 = arith.constant 3 : index
    %c0_13 = arith.constant 0 : index
    %c0_14 = arith.constant 0 : index
    %20 = vector.load %arg24[%c3, %c0_13, %c0_14] : memref<22x8x128xf32, #tpu.memory_space<vmem>>, vector<1x8x128xf32>
    %21 = vector.shape_cast %20 : vector<1x8x128xf32> to vector<8x128xf32>
    %22 = vector.shape_cast %19 : vector<8x128xf32> to vector<1x8x128xf32>
    tpu.vector_store %arg24[%c3, %c0_13, %c0_14], %22 {strides = array<i32>} : memref<22x8x128xf32, #tpu.memory_space<vmem>>, vector<1x8x128xf32>,
    %23 = vector.extract_strided_slice %6 {offsets = [0, 512], sizes = [8, 128], strides = [1, 1]} : vector<8x2816xf32> to vector<8x128xf32>
    %c4 = arith.constant 4 : index
    %c0_15 = arith.constant 0 : index
    %c0_16 = arith.constant 0 : index
    %24 = vector.load %arg24[%c4, %c0_15, %c0_16] : memref<22x8x128xf32, #tpu.memory_space<vmem>>, vector<1x8x128xf32>
    %25 = vector.shape_cast %24 : vector<1x8x128xf32> to vector<8x128xf32>
    %26 = vector.shape_cast %23 : vector<8x128xf32> to vector<1x8x128xf32>
    tpu.vector_store %arg24[%c4, %c0_15, %c0_16], %26 {strides = array<i32>} : memref<22x8x128xf32, #tpu.memory_space<vmem>>, vector<1x8x128xf32>,
    %27 = vector.extract_strided_slice %6 {offsets = [0, 640], sizes = [8, 128], strides = [1, 1]} : vector<8x2816xf32> to vector<8x128xf32>
    %c5 = arith.constant 5 : index
    %c0_17 = arith.constant 0 : index
    %c0_18 = arith.constant 0 : index
    %28 = vector.load %arg24[%c5, %c0_17, %c0_18] : memref<22x8x128xf32, #tpu.memory_space<vmem>>, vector<1x8x128xf32>
    %29 = vector.shape_cast %28 : vector<1x8x128xf32> to vector<8x128xf32>
    %30 = vector.shape_cast %27 : vector<8x128xf32> to vector<1x8x128xf32>
    tpu.vector_store %arg24[%c5, %c0_17, %c0_18], %30 {strides = array<i32>} : memref<22x8x128xf32, #tpu.memory_space<vmem>>, vector<1x8x128xf32>,
    %31 = vector.extract_strided_slice %6 {offsets = [0, 768], sizes = [8, 128], strides = [1, 1]} : vector<8x2816xf32> to vector<8x128xf32>
    %c6 = arith.constant 6 : index
    %c0_19 = arith.constant 0 : index
    %c0_20 = arith.constant 0 : index
    %32 = vector.load %arg24[%c6, %c0_19, %c0_20] : memref<22x8x128xf32, #tpu.memory_space<vmem>>, vector<1x8x128xf32>
    %33 = vector.shape_cast %32 : vector<1x8x128xf32> to vector<8x128xf32>
    %34 = vector.shape_cast %31 : vector<8x128xf32> to vector<1x8x128xf32>
    tpu.vector_store %arg24[%c6, %c0_19, %c0_20], %34 {strides = array<i32>} : memref<22x8x128xf32, #tpu.memory_space<vmem>>, vector<1x8x128xf32>,
    %35 = vector.extract_strided_slice %6 {offsets = [0, 896], sizes = [8, 128], strides = [1, 1]} : vector<8x2816xf32> to vector<8x128xf32>
    %c7 = arith.constant 7 : index
    %c0_21 = arith.constant 0 : index
    %c0_22 = arith.constant 0 : index
    %36 = vector.load %arg24[%c7, %c0_21, %c0_22] : memref<22x8x128xf32, #tpu.memory_space<vmem>>, vector<1x8x128xf32>
    %37 = vector.shape_cast %36 : vector<1x8x128xf32> to vector<8x128xf32>
    %38 = vector.shape_cast %35 : vector<8x128xf32> to vector<1x8x128xf32>
    tpu.vector_store %arg24[%c7, %c0_21, %c0_22], %38 {strides = array<i32>} : memref<22x8x128xf32, #tpu.memory_space<vmem>>, vector<1x8x128xf32>,
    %39 = vector.extract_strided_slice %6 {offsets = [0, 1024], sizes = [8, 128], strides = [1, 1]} : vector<8x2816xf32> to vector<8x128xf32>
    %c8 = arith.constant 8 : index
    %c0_23 = arith.constant 0 : index
    %c0_24 = arith.constant 0 : index
    %40 = vector.load %arg24[%c8, %c0_23, %c0_24] : memref<22x8x128xf32, #tpu.memory_space<vmem>>, vector<1x8x128xf32>
    %41 = vector.shape_cast %40 : vector<1x8x128xf32> to vector<8x128xf32>
    %42 = vector.shape_cast %39 : vector<8x128xf32> to vector<1x8x128xf32>
    tpu.vector_store %arg24[%c8, %c0_23, %c0_24], %42 {strides = array<i32>} : memref<22x8x128xf32, #tpu.memory_space<vmem>>, vector<1x8x128xf32>,
    %43 = vector.extract_strided_slice %6 {offsets = [0, 1152], sizes = [8, 128], strides = [1, 1]} : vector<8x2816xf32> to vector<8x128xf32>
    %c9 = arith.constant 9 : index
    %c0_25 = arith.constant 0 : index
    %c0_26 = arith.constant 0 : index
    %44 = vector.load %arg24[%c9, %c0_25, %c0_26] : memref<22x8x128xf32, #tpu.memory_space<vmem>>, vector<1x8x128xf32>
    %45 = vector.shape_cast %44 : vector<1x8x128xf32> to vector<8x128xf32>
    %46 = vector.shape_cast %43 : vector<8x128xf32> to vector<1x8x128xf32>
    tpu.vector_store %arg24[%c9, %c0_25, %c0_26], %46 {strides = array<i32>} : memref<22x8x128xf32, #tpu.memory_space<vmem>>, vector<1x8x128xf32>,
    %47 = vector.extract_strided_slice %6 {offsets = [0, 1280], sizes = [8, 128], strides = [1, 1]} : vector<8x2816xf32> to vector<8x128xf32>
    %c10 = arith.constant 10 : index
    %c0_27 = arith.constant 0 : index
    %c0_28 = arith.constant 0 : index
    %48 = vector.load %arg24[%c10, %c0_27, %c0_28] : memref<22x8x128xf32, #tpu.memory_space<vmem>>, vector<1x8x128xf32>
    %49 = vector.shape_cast %48 : vector<1x8x128xf32> to vector<8x128xf32>
    %50 = vector.shape_cast %47 : vector<8x128xf32> to vector<1x8x128xf32>
    tpu.vector_store %arg24[%c10, %c0_27, %c0_28], %50 {strides = array<i32>} : memref<22x8x128xf32, #tpu.memory_space<vmem>>, vector<1x8x128xf32>,
    %51 = vector.extract_strided_slice %6 {offsets = [0, 1408], sizes = [8, 128], strides = [1, 1]} : vector<8x2816xf32> to vector<8x128xf32>
    %c11 = arith.constant 11 : index
    %c0_29 = arith.constant 0 : index
    %c0_30 = arith.constant 0 : index
    %52 = vector.load %arg24[%c11, %c0_29, %c0_30] : memref<22x8x128xf32, #tpu.memory_space<vmem>>, vector<1x8x128xf32>
    %53 = vector.shape_cast %52 : vector<1x8x128xf32> to vector<8x128xf32>
    %54 = vector.shape_cast %51 : vector<8x128xf32> to vector<1x8x128xf32>
    tpu.vector_store %arg24[%c11, %c0_29, %c0_30], %54 {strides = array<i32>} : memref<22x8x128xf32, #tpu.memory_space<vmem>>, vector<1x8x128xf32>,
    %55 = vector.extract_strided_slice %6 {offsets = [0, 1536], sizes = [8, 128], strides = [1, 1]} : vector<8x2816xf32> to vector<8x128xf32>
    %c12 = arith.constant 12 : index
    %c0_31 = arith.constant 0 : index
    %c0_32 = arith.constant 0 : index
    %56 = vector.load %arg24[%c12, %c0_31, %c0_32] : memref<22x8x128xf32, #tpu.memory_space<vmem>>, vector<1x8x128xf32>
    %57 = vector.shape_cast %56 : vector<1x8x128xf32> to vector<8x128xf32>
    %58 = vector.shape_cast %55 : vector<8x128xf32> to vector<1x8x128xf32>
    tpu.vector_store %arg24[%c12, %c0_31, %c0_32], %58 {strides = array<i32>} : memref<22x8x128xf32, #tpu.memory_space<vmem>>, vector<1x8x128xf32>,
    %59 = vector.extract_strided_slice %6 {offsets = [0, 1664], sizes = [8, 128], strides = [1, 1]} : vector<8x2816xf32> to vector<8x128xf32>
    %c13 = arith.constant 13 : index
    %c0_33 = arith.constant 0 : index
    %c0_34 = arith.constant 0 : index
    %60 = vector.load %arg24[%c13, %c0_33, %c0_34] : memref<22x8x128xf32, #tpu.memory_space<vmem>>, vector<1x8x128xf32>
    %61 = vector.shape_cast %60 : vector<1x8x128xf32> to vector<8x128xf32>
    %62 = vector.shape_cast %59 : vector<8x128xf32> to vector<1x8x128xf32>
    tpu.vector_store %arg24[%c13, %c0_33, %c0_34], %62 {strides = array<i32>} : memref<22x8x128xf32, #tpu.memory_space<vmem>>, vector<1x8x128xf32>,
    %63 = vector.extract_strided_slice %6 {offsets = [0, 1792], sizes = [8, 128], strides = [1, 1]} : vector<8x2816xf32> to vector<8x128xf32>
    %c14 = arith.constant 14 : index
    %c0_35 = arith.constant 0 : index
    %c0_36 = arith.constant 0 : index
    %64 = vector.load %arg24[%c14, %c0_35, %c0_36] : memref<22x8x128xf32, #tpu.memory_space<vmem>>, vector<1x8x128xf32>
    %65 = vector.shape_cast %64 : vector<1x8x128xf32> to vector<8x128xf32>
    %66 = vector.shape_cast %63 : vector<8x128xf32> to vector<1x8x128xf32>
    tpu.vector_store %arg24[%c14, %c0_35, %c0_36], %66 {strides = array<i32>} : memref<22x8x128xf32, #tpu.memory_space<vmem>>, vector<1x8x128xf32>,
    %67 = vector.extract_strided_slice %6 {offsets = [0, 1920], sizes = [8, 128], strides = [1, 1]} : vector<8x2816xf32> to vector<8x128xf32>
    %c15 = arith.constant 15 : index
    %c0_37 = arith.constant 0 : index
    %c0_38 = arith.constant 0 : index
    %68 = vector.load %arg24[%c15, %c0_37, %c0_38] : memref<22x8x128xf32, #tpu.memory_space<vmem>>, vector<1x8x128xf32>
    %69 = vector.shape_cast %68 : vector<1x8x128xf32> to vector<8x128xf32>
    %70 = vector.shape_cast %67 : vector<8x128xf32> to vector<1x8x128xf32>
    tpu.vector_store %arg24[%c15, %c0_37, %c0_38], %70 {strides = array<i32>} : memref<22x8x128xf32, #tpu.memory_space<vmem>>, vector<1x8x128xf32>,
    %71 = vector.extract_strided_slice %6 {offsets = [0, 2048], sizes = [8, 128], strides = [1, 1]} : vector<8x2816xf32> to vector<8x128xf32>
    %c16 = arith.constant 16 : index
    %c0_39 = arith.constant 0 : index
    %c0_40 = arith.constant 0 : index
    %72 = vector.load %arg24[%c16, %c0_39, %c0_40] : memref<22x8x128xf32, #tpu.memory_space<vmem>>, vector<1x8x128xf32>
    %73 = vector.shape_cast %72 : vector<1x8x128xf32> to vector<8x128xf32>
    %74 = vector.shape_cast %71 : vector<8x128xf32> to vector<1x8x128xf32>
    tpu.vector_store %arg24[%c16, %c0_39, %c0_40], %74 {strides = array<i32>} : memref<22x8x128xf32, #tpu.memory_space<vmem>>, vector<1x8x128xf32>,
    %75 = vector.extract_strided_slice %6 {offsets = [0, 2176], sizes = [8, 128], strides = [1, 1]} : vector<8x2816xf32> to vector<8x128xf32>
    %c17 = arith.constant 17 : index
    %c0_41 = arith.constant 0 : index
    %c0_42 = arith.constant 0 : index
    %76 = vector.load %arg24[%c17, %c0_41, %c0_42] : memref<22x8x128xf32, #tpu.memory_space<vmem>>, vector<1x8x128xf32>
    %77 = vector.shape_cast %76 : vector<1x8x128xf32> to vector<8x128xf32>
    %78 = vector.shape_cast %75 : vector<8x128xf32> to vector<1x8x128xf32>
    tpu.vector_store %arg24[%c17, %c0_41, %c0_42], %78 {strides = array<i32>} : memref<22x8x128xf32, #tpu.memory_space<vmem>>, vector<1x8x128xf32>,
    %79 = vector.extract_strided_slice %6 {offsets = [0, 2304], sizes = [8, 128], strides = [1, 1]} : vector<8x2816xf32> to vector<8x128xf32>
    %c18 = arith.constant 18 : index
    %c0_43 = arith.constant 0 : index
    %c0_44 = arith.constant 0 : index
    %80 = vector.load %arg24[%c18, %c0_43, %c0_44] : memref<22x8x128xf32, #tpu.memory_space<vmem>>, vector<1x8x128xf32>
    %81 = vector.shape_cast %80 : vector<1x8x128xf32> to vector<8x128xf32>
    %82 = vector.shape_cast %79 : vector<8x128xf32> to vector<1x8x128xf32>
    tpu.vector_store %arg24[%c18, %c0_43, %c0_44], %82 {strides = array<i32>} : memref<22x8x128xf32, #tpu.memory_space<vmem>>, vector<1x8x128xf32>,
    %83 = vector.extract_strided_slice %6 {offsets = [0, 2432], sizes = [8, 128], strides = [1, 1]} : vector<8x2816xf32> to vector<8x128xf32>
    %c19 = arith.constant 19 : index
    %c0_45 = arith.constant 0 : index
    %c0_46 = arith.constant 0 : index
    %84 = vector.load %arg24[%c19, %c0_45, %c0_46] : memref<22x8x128xf32, #tpu.memory_space<vmem>>, vector<1x8x128xf32>
    %85 = vector.shape_cast %84 : vector<1x8x128xf32> to vector<8x128xf32>
    %86 = vector.shape_cast %83 : vector<8x128xf32> to vector<1x8x128xf32>
    tpu.vector_store %arg24[%c19, %c0_45, %c0_46], %86 {strides = array<i32>} : memref<22x8x128xf32, #tpu.memory_space<vmem>>, vector<1x8x128xf32>,
    %87 = vector.extract_strided_slice %6 {offsets = [0, 2560], sizes = [8, 128], strides = [1, 1]} : vector<8x2816xf32> to vector<8x128xf32>
    %c20 = arith.constant 20 : index
    %c0_47 = arith.constant 0 : index
    %c0_48 = arith.constant 0 : index
    %88 = vector.load %arg24[%c20, %c0_47, %c0_48] : memref<22x8x128xf32, #tpu.memory_space<vmem>>, vector<1x8x128xf32>
    %89 = vector.shape_cast %88 : vector<1x8x128xf32> to vector<8x128xf32>
    %90 = vector.shape_cast %87 : vector<8x128xf32> to vector<1x8x128xf32>
    tpu.vector_store %arg24[%c20, %c0_47, %c0_48], %90 {strides = array<i32>} : memref<22x8x128xf32, #tpu.memory_space<vmem>>, vector<1x8x128xf32>,
    %91 = vector.extract_strided_slice %6 {offsets = [0, 2688], sizes = [8, 128], strides = [1, 1]} : vector<8x2816xf32> to vector<8x128xf32>
    %c21 = arith.constant 21 : index
    %c0_49 = arith.constant 0 : index
    %c0_50 = arith.constant 0 : index
    %92 = vector.load %arg24[%c21, %c0_49, %c0_50] : memref<22x8x128xf32, #tpu.memory_space<vmem>>, vector<1x8x128xf32>
    %93 = vector.shape_cast %92 : vector<1x8x128xf32> to vector<8x128xf32>
    %94 = vector.shape_cast %91 : vector<8x128xf32> to vector<1x8x128xf32>
    tpu.vector_store %arg24[%c21, %c0_49, %c0_50], %94 {strides = array<i32>} : memref<22x8x128xf32, #tpu.memory_space<vmem>>, vector<1x8x128xf32>,
    %c0_51 = arith.constant 0 : index
    %c0_52 = arith.constant 0 : index
    %95 = vector.load %arg0[%c0_51, %c0_52] : memref<128x128xf32, #tpu.memory_space<vmem>>, vector<128x128xf32>
    %cst_53 = arith.constant 0.000000e+00 : f32
    %96 = vector.broadcast %cst_53 : f32 to vector<128x128xf32>
    %97 = arith.maximumf %95, %96 : vector<128x128xf32>
    %c0_54 = arith.constant 0 : index
    %c0_55 = arith.constant 0 : index
    %98 = vector.load %arg2[%c0_54, %c0_55] : memref<128x128xf32, #tpu.memory_space<vmem>>, vector<128x128xf32>
    %c0_56 = arith.constant 0 : index
    %c0_57 = arith.constant 0 : index
    %99 = vector.load %arg3[%c0_56, %c0_57] : memref<1x128xf32, #tpu.memory_space<vmem>>, vector<1x128xf32>
    %cst_58 = arith.constant dense<0.000000e+00> : vector<128x128xf32>
    %100 = tpu.matmul %97, %98, %cst_58 {dimension_numbers = #tpu.dot_dimension_numbers<[1], [0], [0], [1], [0, 0, 1, 1], [], []>} : vector<128x128xf32>, vector<128x128xf32>, vector<128x128xf32> -> vector<128x128xf32>
    %101 = vector.broadcast %99 : vector<1x128xf32> to vector<128x128xf32>
    %102 = arith.addf %100, %101 : vector<128x128xf32>
    %cst_59 = arith.constant 0.000000e+00 : f32
    %103 = vector.broadcast %cst_59 : f32 to vector<128x128xf32>
    %104 = arith.maximumf %102, %103 : vector<128x128xf32>
    %c0_60 = arith.constant 0 : index
    %c0_61 = arith.constant 0 : index
    %105 = vector.load %arg4[%c0_60, %c0_61] : memref<128x128xf32, #tpu.memory_space<vmem>>, vector<128x128xf32>
    %c0_62 = arith.constant 0 : index
    %c0_63 = arith.constant 0 : index
    %106 = vector.load %arg5[%c0_62, %c0_63] : memref<1x128xf32, #tpu.memory_space<vmem>>, vector<1x128xf32>
    %cst_64 = arith.constant dense<0.000000e+00> : vector<128x128xf32>
    %107 = tpu.matmul %104, %105, %cst_64 {dimension_numbers = #tpu.dot_dimension_numbers<[1], [0], [0], [1], [0, 0, 1, 1], [], []>} : vector<128x128xf32>, vector<128x128xf32>, vector<128x128xf32> -> vector<128x128xf32>
    %108 = vector.broadcast %106 : vector<1x128xf32> to vector<128x128xf32>
    %109 = arith.addf %107, %108 : vector<128x128xf32>
    %c0_65 = arith.constant 0 : index
    %c0_66 = arith.constant 0 : index
    %110 = vector.load %arg6[%c0_65, %c0_66] : memref<128x128xf32, #tpu.memory_space<vmem>>, vector<128x128xf32>
    %cst_67 = arith.constant dense<0.000000e+00> : vector<128x128xf32>
    %111 = tpu.matmul %95, %110, %cst_67 {dimension_numbers = #tpu.dot_dimension_numbers<[1], [0], [0], [1], [0, 0, 1, 1], [], []>} : vector<128x128xf32>, vector<128x128xf32>, vector<128x128xf32> -> vector<128x128xf32>
    %112 = arith.addf %111, %109 : vector<128x128xf32>
    %cst_68 = arith.constant 0.000000e+00 : f32
    %113 = vector.broadcast %cst_68 : f32 to vector<128x128xf32>
    %114 = arith.maximumf %112, %113 : vector<128x128xf32>
    %c0_69 = arith.constant 0 : index
    %c0_70 = arith.constant 0 : index
    %115 = vector.load %arg7[%c0_69, %c0_70] : memref<128x128xf32, #tpu.memory_space<vmem>>, vector<128x128xf32>
    %c0_71 = arith.constant 0 : index
    %c0_72 = arith.constant 0 : index
    %116 = vector.load %arg8[%c0_71, %c0_72] : memref<1x128xf32, #tpu.memory_space<vmem>>, vector<1x128xf32>
    %cst_73 = arith.constant dense<0.000000e+00> : vector<128x128xf32>
    %117 = tpu.matmul %114, %115, %cst_73 {dimension_numbers = #tpu.dot_dimension_numbers<[1], [0], [0], [1], [0, 0, 1, 1], [], []>} : vector<128x128xf32>, vector<128x128xf32>, vector<128x128xf32> -> vector<128x128xf32>
    %118 = vector.broadcast %116 : vector<1x128xf32> to vector<128x128xf32>
    %119 = arith.addf %117, %118 : vector<128x128xf32>
    %cst_74 = arith.constant 0.000000e+00 : f32
    %120 = vector.broadcast %cst_74 : f32 to vector<128x128xf32>
    %121 = arith.maximumf %119, %120 : vector<128x128xf32>
    %c0_75 = arith.constant 0 : index
    %c0_76 = arith.constant 0 : index
    %122 = vector.load %arg9[%c0_75, %c0_76] : memref<128x128xf32, #tpu.memory_space<vmem>>, vector<128x128xf32>
    %c0_77 = arith.constant 0 : index
    %c0_78 = arith.constant 0 : index
    %123 = vector.load %arg10[%c0_77, %c0_78] : memref<1x128xf32, #tpu.memory_space<vmem>>, vector<1x128xf32>
    %cst_79 = arith.constant dense<0.000000e+00> : vector<128x128xf32>
    %124 = tpu.matmul %121, %122, %cst_79 {dimension_numbers = #tpu.dot_dimension_numbers<[1], [0], [0], [1], [0, 0, 1, 1], [], []>} : vector<128x128xf32>, vector<128x128xf32>, vector<128x128xf32> -> vector<128x128xf32>
    %125 = vector.broadcast %123 : vector<1x128xf32> to vector<128x128xf32>
    %126 = arith.addf %124, %125 : vector<128x128xf32>
    %127 = arith.addf %112, %126 : vector<128x128xf32>
    %cst_80 = arith.constant 0.000000e+00 : f32
    %128 = vector.broadcast %cst_80 : f32 to vector<128x128xf32>
    %129 = arith.maximumf %127, %128 : vector<128x128xf32>
    %c0_81 = arith.constant 0 : index
    %c0_82 = arith.constant 0 : index
    %130 = vector.load %arg11[%c0_81, %c0_82] : memref<128x128xf32, #tpu.memory_space<vmem>>, vector<128x128xf32>
    %c0_83 = arith.constant 0 : index
    %c0_84 = arith.constant 0 : index
    %131 = vector.load %arg12[%c0_83, %c0_84] : memref<1x128xf32, #tpu.memory_space<vmem>>, vector<1x128xf32>
    %cst_85 = arith.constant dense<0.000000e+00> : vector<128x128xf32>
    %132 = tpu.matmul %129, %130, %cst_85 {dimension_numbers = #tpu.dot_dimension_numbers<[1], [0], [0], [1], [0, 0, 1, 1], [], []>} : vector<128x128xf32>, vector<128x128xf32>, vector<128x128xf32> -> vector<128x128xf32>
    %133 = vector.broadcast %131 : vector<1x128xf32> to vector<128x128xf32>
    %134 = arith.addf %132, %133 : vector<128x128xf32>
    %cst_86 = arith.constant 0.000000e+00 : f32
    %135 = vector.broadcast %cst_86 : f32 to vector<128x128xf32>
    %136 = arith.maximumf %134, %135 : vector<128x128xf32>
    %c0_87 = arith.constant 0 : index
    %c0_88 = arith.constant 0 : index
    %137 = vector.load %arg13[%c0_87, %c0_88] : memref<128x128xf32, #tpu.memory_space<vmem>>, vector<128x128xf32>
    %c0_89 = arith.constant 0 : index
    %c0_90 = arith.constant 0 : index
    %138 = vector.load %arg14[%c0_89, %c0_90] : memref<1x128xf32, #tpu.memory_space<vmem>>, vector<1x128xf32>
    %cst_91 = arith.constant dense<0.000000e+00> : vector<128x128xf32>
    %139 = tpu.matmul %136, %137, %cst_91 {dimension_numbers = #tpu.dot_dimension_numbers<[1], [0], [0], [1], [0, 0, 1, 1], [], []>} : vector<128x128xf32>, vector<128x128xf32>, vector<128x128xf32> -> vector<128x128xf32>
    %140 = vector.broadcast %138 : vector<1x128xf32> to vector<128x128xf32>
    %141 = arith.addf %139, %140 : vector<128x128xf32>
    %142 = arith.addf %127, %141 : vector<128x128xf32>
    %cst_92 = arith.constant 7.812500e-03 : f32
    %c0_i32 = arith.constant 0 : i32
    %c5_i32 = arith.constant 5 : i32
    %143 = arith.addi %c0_i32, %c5_i32 : i32
    %c1_i32 = arith.constant 1 : i32
    %144 = scf.for %arg25 = %c0_i32 to %143 step %c1_i32 iter_args(%arg26 = %142) -> (vector<128x128xf32>)  : i32 {
      %c4_i32 = arith.constant 4 : i32
      %193 = arith.muli %c4_i32, %arg25 : i32
      %194 = arith.index_cast %193 : i32 to index
      %c0_113 = arith.constant 0 : index
      %c0_114 = arith.constant 0 : index
      %195 = vector.load %arg24[%194, %c0_113, %c0_114] : memref<22x8x128xf32, #tpu.memory_space<vmem>>, vector<1x8x128xf32>
      %196 = vector.shape_cast %195 : vector<1x8x128xf32> to vector<8x128xf32>
      %c1_i32_115 = arith.constant 1 : i32
      %197 = arith.addi %193, %c1_i32_115 : i32
      %198 = arith.index_cast %197 : i32 to index
      %c0_116 = arith.constant 0 : index
      %c0_117 = arith.constant 0 : index
      %199 = vector.load %arg24[%198, %c0_116, %c0_117] : memref<22x8x128xf32, #tpu.memory_space<vmem>>, vector<1x8x128xf32>
      %200 = vector.shape_cast %199 : vector<1x8x128xf32> to vector<8x128xf32>
      %201 = arith.mulf %arg26, %arg26 : vector<128x128xf32>
      %202 = tpu.concatenate %arg26, %201 in 1 : vector<128x128xf32>, vector<128x128xf32> -> vector<128x256xf32>
      %cst_118 = arith.constant dense<0.000000e+00> : vector<1x256xf32>
      %203 = tpu.matmul %0, %202, %cst_118 {dimension_numbers = #tpu.dot_dimension_numbers<[1], [0], [0], [1], [0, 0, 1, 1], [], []>} : vector<1x128xf32>, vector<128x256xf32>, vector<1x256xf32> -> vector<1x256xf32>
      %204 = vector.extract_strided_slice %203 {offsets = [0, 0], sizes = [1, 128], strides = [1, 1]} : vector<1x256xf32> to vector<1x128xf32>
      %205 = vector.broadcast %cst_92 : f32 to vector<1x128xf32>
      %206 = arith.mulf %204, %205 : vector<1x128xf32>
      %207 = vector.extract_strided_slice %203 {offsets = [0, 128], sizes = [1, 128], strides = [1, 1]} : vector<1x256xf32> to vector<1x128xf32>
      %208 = vector.broadcast %cst_92 : f32 to vector<1x128xf32>
      %209 = arith.mulf %207, %208 : vector<1x128xf32>
      %210 = arith.mulf %206, %206 : vector<1x128xf32>
      %211 = arith.subf %209, %210 : vector<1x128xf32>
      %cst_119 = arith.constant 0.000000e+00 : f32
      %212 = vector.broadcast %cst_119 : f32 to vector<1x128xf32>
      %213 = arith.maximumf %211, %212 : vector<1x128xf32>
      %cst_120 = arith.constant 9.99999974E-6 : f32
      %214 = vector.broadcast %cst_120 : f32 to vector<1x128xf32>
      %215 = arith.addf %213, %214 : vector<1x128xf32>
      %216 = math.rsqrt %215 : vector<1x128xf32>
      %217 = vector.broadcast %216 : vector<1x128xf32> to vector<8x128xf32>
      %218 = arith.mulf %196, %217 : vector<8x128xf32>
      %219 = vector.broadcast %206 : vector<1x128xf32> to vector<8x128xf32>
      %220 = arith.mulf %218, %219 : vector<8x128xf32>
      %221 = arith.subf %200, %220 : vector<8x128xf32>
      %222 = vector.extract_strided_slice %218 {offsets = [0, 0], sizes = [1, 128], strides = [1, 1]} : vector<8x128xf32> to vector<1x128xf32>
      %223 = vector.extract_strided_slice %arg26 {offsets = [0, 0], sizes = [64, 128], strides = [1, 1]} : vector<128x128xf32> to vector<64x128xf32>
      %224 = vector.broadcast %222 : vector<1x128xf32> to vector<64x128xf32>
      %225 = arith.mulf %224, %223 : vector<64x128xf32>
      %226 = vector.extract_strided_slice %221 {offsets = [0, 0], sizes = [1, 128], strides = [1, 1]} : vector<8x128xf32> to vector<1x128xf32>
      %227 = vector.broadcast %226 : vector<1x128xf32> to vector<64x128xf32>
      %228 = arith.addf %225, %227 : vector<64x128xf32>
      %229 = vector.extract_strided_slice %218 {offsets = [1, 0], sizes = [1, 128], strides = [1, 1]} : vector<8x128xf32> to vector<1x128xf32>
      %230 = vector.extract_strided_slice %arg26 {offsets = [64, 0], sizes = [64, 128], strides = [1, 1]} : vector<128x128xf32> to vector<64x128xf32>
      %231 = vector.broadcast %229 : vector<1x128xf32> to vector<64x128xf32>
      %232 = arith.mulf %231, %230 : vector<64x128xf32>
      %233 = vector.extract_strided_slice %221 {offsets = [1, 0], sizes = [1, 128], strides = [1, 1]} : vector<8x128xf32> to vector<1x128xf32>
      %234 = vector.broadcast %233 : vector<1x128xf32> to vector<64x128xf32>
      %235 = arith.addf %232, %234 : vector<64x128xf32>
      %236 = tpu.concatenate %228, %235 in 0 : vector<64x128xf32>, vector<64x128xf32> -> vector<128x128xf32>
      %cst_121 = arith.constant 0.000000e+00 : f32
      %237 = vector.broadcast %cst_121 : f32 to vector<128x128xf32>
      %238 = arith.maximumf %236, %237 : vector<128x128xf32>
      %239 = arith.index_cast %arg25 : i32 to index
      %c0_122 = arith.constant 0 : index
      %c0_123 = arith.constant 0 : index
      %240 = vector.load %arg17[%239, %c0_122, %c0_123] : memref<5x128x128xf32, #tpu.memory_space<vmem>>, vector<1x128x128xf32>
      %241 = vector.shape_cast %240 : vector<1x128x128xf32> to vector<128x128xf32>
      %242 = arith.index_cast %arg25 : i32 to index
      %c0_124 = arith.constant 0 : index
      %c0_125 = arith.constant 0 : index
      %243 = vector.load %arg18[%242, %c0_124, %c0_125] : memref<5x1x128xf32, #tpu.memory_space<vmem>>, vector<1x1x128xf32>
      %244 = vector.shape_cast %243 : vector<1x1x128xf32> to vector<1x128xf32>
      %cst_126 = arith.constant dense<0.000000e+00> : vector<128x128xf32>
      %245 = tpu.matmul %238, %241, %cst_126 {dimension_numbers = #tpu.dot_dimension_numbers<[1], [0], [0], [1], [0, 0, 1, 1], [], []>} : vector<128x128xf32>, vector<128x128xf32>, vector<128x128xf32> -> vector<128x128xf32>
      %246 = vector.broadcast %244 : vector<1x128xf32> to vector<128x128xf32>
      %247 = arith.addf %245, %246 : vector<128x128xf32>
      %c2_i32 = arith.constant 2 : i32
      %248 = arith.addi %193, %c2_i32 : i32
      %249 = arith.index_cast %248 : i32 to index
      %c0_127 = arith.constant 0 : index
      %c0_128 = arith.constant 0 : index
      %250 = vector.load %arg24[%249, %c0_127, %c0_128] : memref<22x8x128xf32, #tpu.memory_space<vmem>>, vector<1x8x128xf32>
      %251 = vector.shape_cast %250 : vector<1x8x128xf32> to vector<8x128xf32>
      %c3_i32 = arith.constant 3 : i32
      %252 = arith.addi %193, %c3_i32 : i32
      %253 = arith.index_cast %252 : i32 to index
      %c0_129 = arith.constant 0 : index
      %c0_130 = arith.constant 0 : index
      %254 = vector.load %arg24[%253, %c0_129, %c0_130] : memref<22x8x128xf32, #tpu.memory_space<vmem>>, vector<1x8x128xf32>
      %255 = vector.shape_cast %254 : vector<1x8x128xf32> to vector<8x128xf32>
      %256 = arith.mulf %247, %247 : vector<128x128xf32>
      %257 = tpu.concatenate %247, %256 in 1 : vector<128x128xf32>, vector<128x128xf32> -> vector<128x256xf32>
      %cst_131 = arith.constant dense<0.000000e+00> : vector<1x256xf32>
      %258 = tpu.matmul %0, %257, %cst_131 {dimension_numbers = #tpu.dot_dimension_numbers<[1], [0], [0], [1], [0, 0, 1, 1], [], []>} : vector<1x128xf32>, vector<128x256xf32>, vector<1x256xf32> -> vector<1x256xf32>
      %259 = vector.extract_strided_slice %258 {offsets = [0, 0], sizes = [1, 128], strides = [1, 1]} : vector<1x256xf32> to vector<1x128xf32>
      %260 = vector.broadcast %cst_92 : f32 to vector<1x128xf32>
      %261 = arith.mulf %259, %260 : vector<1x128xf32>
      %262 = vector.extract_strided_slice %258 {offsets = [0, 128], sizes = [1, 128], strides = [1, 1]} : vector<1x256xf32> to vector<1x128xf32>
      %263 = vector.broadcast %cst_92 : f32 to vector<1x128xf32>
      %264 = arith.mulf %262, %263 : vector<1x128xf32>
      %265 = arith.mulf %261, %261 : vector<1x128xf32>
      %266 = arith.subf %264, %265 : vector<1x128xf32>
      %cst_132 = arith.constant 0.000000e+00 : f32
      %267 = vector.broadcast %cst_132 : f32 to vector<1x128xf32>
      %268 = arith.maximumf %266, %267 : vector<1x128xf32>
      %cst_133 = arith.constant 9.99999974E-6 : f32
      %269 = vector.broadcast %cst_133 : f32 to vector<1x128xf32>
      %270 = arith.addf %268, %269 : vector<1x128xf32>
      %271 = math.rsqrt %270 : vector<1x128xf32>
      %272 = vector.broadcast %271 : vector<1x128xf32> to vector<8x128xf32>
      %273 = arith.mulf %251, %272 : vector<8x128xf32>
      %274 = vector.broadcast %261 : vector<1x128xf32> to vector<8x128xf32>
      %275 = arith.mulf %273, %274 : vector<8x128xf32>
      %276 = arith.subf %255, %275 : vector<8x128xf32>
      %277 = vector.extract_strided_slice %273 {offsets = [0, 0], sizes = [1, 128], strides = [1, 1]} : vector<8x128xf32> to vector<1x128xf32>
      %278 = vector.extract_strided_slice %247 {offsets = [0, 0], sizes = [64, 128], strides = [1, 1]} : vector<128x128xf32> to vector<64x128xf32>
      %279 = vector.broadcast %277 : vector<1x128xf32> to vector<64x128xf32>
      %280 = arith.mulf %279, %278 : vector<64x128xf32>
      %281 = vector.extract_strided_slice %276 {offsets = [0, 0], sizes = [1, 128], strides = [1, 1]} : vector<8x128xf32> to vector<1x128xf32>
      %282 = vector.broadcast %281 : vector<1x128xf32> to vector<64x128xf32>
      %283 = arith.addf %280, %282 : vector<64x128xf32>
      %284 = vector.extract_strided_slice %273 {offsets = [1, 0], sizes = [1, 128], strides = [1, 1]} : vector<8x128xf32> to vector<1x128xf32>
      %285 = vector.extract_strided_slice %247 {offsets = [64, 0], sizes = [64, 128], strides = [1, 1]} : vector<128x128xf32> to vector<64x128xf32>
      %286 = vector.broadcast %284 : vector<1x128xf32> to vector<64x128xf32>
      %287 = arith.mulf %286, %285 : vector<64x128xf32>
      %288 = vector.extract_strided_slice %276 {offsets = [1, 0], sizes = [1, 128], strides = [1, 1]} : vector<8x128xf32> to vector<1x128xf32>
      %289 = vector.broadcast %288 : vector<1x128xf32> to vector<64x128xf32>
      %290 = arith.addf %287, %289 : vector<64x128xf32>
      %291 = tpu.concatenate %283, %290 in 0 : vector<64x128xf32>, vector<64x128xf32> -> vector<128x128xf32>
      %cst_134 = arith.constant 0.000000e+00 : f32
      %292 = vector.broadcast %cst_134 : f32 to vector<128x128xf32>
      %293 = arith.maximumf %291, %292 : vector<128x128xf32>
      %294 = arith.index_cast %arg25 : i32 to index
      %c0_135 = arith.constant 0 : index
      %c0_136 = arith.constant 0 : index
      %295 = vector.load %arg19[%294, %c0_135, %c0_136] : memref<5x128x128xf32, #tpu.memory_space<vmem>>, vector<1x128x128xf32>
      %296 = vector.shape_cast %295 : vector<1x128x128xf32> to vector<128x128xf32>
      %297 = arith.index_cast %arg25 : i32 to index
      %c0_137 = arith.constant 0 : index
      %c0_138 = arith.constant 0 : index
      %298 = vector.load %arg20[%297, %c0_137, %c0_138] : memref<5x1x128xf32, #tpu.memory_space<vmem>>, vector<1x1x128xf32>
      %299 = vector.shape_cast %298 : vector<1x1x128xf32> to vector<1x128xf32>
      %cst_139 = arith.constant dense<0.000000e+00> : vector<128x128xf32>
      %300 = tpu.matmul %293, %296, %cst_139 {dimension_numbers = #tpu.dot_dimension_numbers<[1], [0], [0], [1], [0, 0, 1, 1], [], []>} : vector<128x128xf32>, vector<128x128xf32>, vector<128x128xf32> -> vector<128x128xf32>
      %301 = vector.broadcast %299 : vector<1x128xf32> to vector<128x128xf32>
      %302 = arith.addf %300, %301 : vector<128x128xf32>
      %303 = arith.addf %arg26, %302 : vector<128x128xf32>
      scf.yield %303 : vector<128x128xf32>
    }
    %c5_i32_93 = arith.constant 5 : i32
    %c20_94 = arith.constant 20 : index
    %c0_95 = arith.constant 0 : index
    %c0_96 = arith.constant 0 : index
    %145 = vector.load %arg24[%c20_94, %c0_95, %c0_96] : memref<22x8x128xf32, #tpu.memory_space<vmem>>, vector<1x8x128xf32>
    %146 = vector.shape_cast %145 : vector<1x8x128xf32> to vector<8x128xf32>
    %c21_97 = arith.constant 21 : index
    %c0_98 = arith.constant 0 : index
    %c0_99 = arith.constant 0 : index
    %147 = vector.load %arg24[%c21_97, %c0_98, %c0_99] : memref<22x8x128xf32, #tpu.memory_space<vmem>>, vector<1x8x128xf32>
    %148 = vector.shape_cast %147 : vector<1x8x128xf32> to vector<8x128xf32>
    %149 = arith.mulf %144, %144 : vector<128x128xf32>
    %150 = tpu.concatenate %144, %149 in 1 : vector<128x128xf32>, vector<128x128xf32> -> vector<128x256xf32>
    %cst_100 = arith.constant dense<0.000000e+00> : vector<1x256xf32>
    %151 = tpu.matmul %0, %150, %cst_100 {dimension_numbers = #tpu.dot_dimension_numbers<[1], [0], [0], [1], [0, 0, 1, 1], [], []>} : vector<1x128xf32>, vector<128x256xf32>, vector<1x256xf32> -> vector<1x256xf32>
    %152 = vector.extract_strided_slice %151 {offsets = [0, 0], sizes = [1, 128], strides = [1, 1]} : vector<1x256xf32> to vector<1x128xf32>
    %cst_101 = arith.constant 7.812500e-03 : f32
    %153 = vector.broadcast %cst_101 : f32 to vector<1x128xf32>
    %154 = arith.mulf %152, %153 : vector<1x128xf32>
    %155 = vector.extract_strided_slice %151 {offsets = [0, 128], sizes = [1, 128], strides = [1, 1]} : vector<1x256xf32> to vector<1x128xf32>
    %cst_102 = arith.constant 7.812500e-03 : f32
    %156 = vector.broadcast %cst_102 : f32 to vector<1x128xf32>
    %157 = arith.mulf %155, %156 : vector<1x128xf32>
    %158 = arith.mulf %154, %154 : vector<1x128xf32>
    %159 = arith.subf %157, %158 : vector<1x128xf32>
    %cst_103 = arith.constant 0.000000e+00 : f32
    %160 = vector.broadcast %cst_103 : f32 to vector<1x128xf32>
    %161 = arith.maximumf %159, %160 : vector<1x128xf32>
    %cst_104 = arith.constant 9.99999974E-6 : f32
    %162 = vector.broadcast %cst_104 : f32 to vector<1x128xf32>
    %163 = arith.addf %161, %162 : vector<1x128xf32>
    %164 = math.rsqrt %163 : vector<1x128xf32>
    %165 = vector.broadcast %164 : vector<1x128xf32> to vector<8x128xf32>
    %166 = arith.mulf %146, %165 : vector<8x128xf32>
    %167 = vector.broadcast %154 : vector<1x128xf32> to vector<8x128xf32>
    %168 = arith.mulf %166, %167 : vector<8x128xf32>
    %169 = arith.subf %148, %168 : vector<8x128xf32>
    %170 = vector.extract_strided_slice %166 {offsets = [0, 0], sizes = [1, 128], strides = [1, 1]} : vector<8x128xf32> to vector<1x128xf32>
    %171 = vector.extract_strided_slice %144 {offsets = [0, 0], sizes = [64, 128], strides = [1, 1]} : vector<128x128xf32> to vector<64x128xf32>
    %172 = vector.broadcast %170 : vector<1x128xf32> to vector<64x128xf32>
    %173 = arith.mulf %172, %171 : vector<64x128xf32>
    %174 = vector.extract_strided_slice %169 {offsets = [0, 0], sizes = [1, 128], strides = [1, 1]} : vector<8x128xf32> to vector<1x128xf32>
    %175 = vector.broadcast %174 : vector<1x128xf32> to vector<64x128xf32>
    %176 = arith.addf %173, %175 : vector<64x128xf32>
    %177 = vector.extract_strided_slice %166 {offsets = [1, 0], sizes = [1, 128], strides = [1, 1]} : vector<8x128xf32> to vector<1x128xf32>
    %178 = vector.extract_strided_slice %144 {offsets = [64, 0], sizes = [64, 128], strides = [1, 1]} : vector<128x128xf32> to vector<64x128xf32>
    %179 = vector.broadcast %177 : vector<1x128xf32> to vector<64x128xf32>
    %180 = arith.mulf %179, %178 : vector<64x128xf32>
    %181 = vector.extract_strided_slice %169 {offsets = [1, 0], sizes = [1, 128], strides = [1, 1]} : vector<8x128xf32> to vector<1x128xf32>
    %182 = vector.broadcast %181 : vector<1x128xf32> to vector<64x128xf32>
    %183 = arith.addf %180, %182 : vector<64x128xf32>
    %184 = tpu.concatenate %176, %183 in 0 : vector<64x128xf32>, vector<64x128xf32> -> vector<128x128xf32>
    %cst_105 = arith.constant 0.000000e+00 : f32
    %185 = vector.broadcast %cst_105 : f32 to vector<128x128xf32>
    %186 = arith.maximumf %184, %185 : vector<128x128xf32>
    %c0_106 = arith.constant 0 : index
    %c0_107 = arith.constant 0 : index
    %187 = vector.load %arg21[%c0_106, %c0_107] : memref<128x128xf32, #tpu.memory_space<vmem>>, vector<128x128xf32>
    %c0_108 = arith.constant 0 : index
    %c0_109 = arith.constant 0 : index
    %188 = vector.load %arg22[%c0_108, %c0_109] : memref<1x128xf32, #tpu.memory_space<vmem>>, vector<1x128xf32>
    %cst_110 = arith.constant dense<0.000000e+00> : vector<128x128xf32>
    %189 = tpu.matmul %186, %187, %cst_110 {dimension_numbers = #tpu.dot_dimension_numbers<[1], [0], [0], [1], [0, 0, 1, 1], [], []>} : vector<128x128xf32>, vector<128x128xf32>, vector<128x128xf32> -> vector<128x128xf32>
    %190 = vector.broadcast %188 : vector<1x128xf32> to vector<128x128xf32>
    %191 = arith.addf %189, %190 : vector<128x128xf32>
    %c0_111 = arith.constant 0 : index
    %c0_112 = arith.constant 0 : index
    %192 = vector.load %arg23[%c0_111, %c0_112] : memref<128x128xf32, #tpu.memory_space<vmem>>, vector<128x128xf32>
    tpu.vector_store %arg23[%c0_111, %c0_112], %191 {strides = array<i32>} : memref<128x128xf32, #tpu.memory_space<vmem>>, vector<128x128xf32>,
    return
  }
}

</mosaic_0001>

<bundles_post_ra>
// kernel: decoder_forward.1
= control target key start
LH: loop header
LB: loop body
LE: loop exit
PB: predicated region body
PF: predicated region fallthrough
CT: control target
= control target key end

     0   :  { %v5335_v3 = vmov 0.0   ;;  %vm279_vm0 = vcmask 261120   ;;  %s7140_s15 = inlined_call_operand.vmem [shape: f32[32,2816], index: 15, kind: input, shape index: {}]   ;;  %s7141_s17 = inlined_call_operand.vmem [shape: f32[5,128,128], index: 17, kind: input, shape index: {}]   ;;  %s7142_s18 = inlined_call_operand.vmem [shape: f32[5,1,128], index: 18, kind: input, shape index: {}]   ;;  %s7143_s19 = inlined_call_operand.vmem [shape: f32[5,128,128], index: 19, kind: input, shape index: {}]   ;;  %s7144_s20 = inlined_call_operand.vmem [shape: f32[5,1,128], index: 20, kind: input, shape index: {}]   ;;  %s7145_s21 = inlined_call_operand.vmem [shape: f32[128,128], index: 21, kind: input, shape index: {}]   ;;  %s7146_s22 = inlined_call_operand.vmem [shape: f32[1,128], index: 22, kind: input, shape index: {}]   ;;  %s7147_s23 = inlined_call_operand.vmem [shape: f32[128,128], index: 23, kind: output, shape index: {}]   ;;  %s7148_s1 = inlined_call_operand.vmem [shape: f32[8,32], index: 1, kind: input, shape index: {}]   ;;  %s7149_s2 = inlined_call_operand.vmem [shape: f32[128,128], index: 2, kind: input, shape index: {}]   ;;  %s7150_s0 = inlined_call_operand.vmem [shape: f32[128,128], index: 0, kind: input, shape index: {}]   ;;  %s7151_s4 = inlined_call_operand.vmem [shape: f32[128,128], index: 4, kind: input, shape index: {}]   ;;  %s7152_s6 = inlined_call_operand.vmem [shape: f32[128,128], index: 6, kind: input, shape index: {}]   ;;  %s7153_s16 = inlined_call_operand.vmem [shape: f32[1,2816], index: 16, kind: input, shape index: {}]   ;;  %s7154_s7 = inlined_call_operand.vmem [shape: f32[128,128], index: 7, kind: input, shape index: {}]   ;;  %s7155_s3 = inlined_call_operand.vmem [shape: f32[1,128], index: 3, kind: input, shape index: {}]   ;;  %s7156_s9 = inlined_call_operand.vmem [shape: f32[128,128], index: 9, kind: input, shape index: {}]   ;;  %s7157_s5 = inlined_call_operand.vmem [shape: f32[1,128], index: 5, kind: input, shape index: {}]   ;;  %s7158_s11 = inlined_call_operand.vmem [shape: f32[128,128], index: 11, kind: input, shape index: {}]   ;;  %s7159_s8 = inlined_call_operand.vmem [shape: f32[1,128], index: 8, kind: input, shape index: {}]   ;;  %s7160_s13 = inlined_call_operand.vmem [shape: f32[128,128], index: 13, kind: input, shape index: {}]   ;;  %s7161_s10 = inlined_call_operand.vmem [shape: f32[1,128], index: 10, kind: input, shape index: {}]   ;;  %s7162_s12 = inlined_call_operand.vmem [shape: f32[1,128], index: 12, kind: input, shape index: {}]   ;;  %s7163_s14 = inlined_call_operand.vmem [shape: f32[1,128], index: 14, kind: input, shape index: {}]  }
   0x1   :  { %7167 = sst [smem:[#allocation3_spill]] %s7140_s15  ;;  %418 = vmatprep.mubr.f32.mxu1 %v5335_v3  ;;  %347 = vmatprep.mubr.f32.mxu0 %v5335_v3  ;;  %v5506_v20 = vld [vmem:[%s7148_s1] sm:$0xff] }
   0x2   :  { %7168 = sst [smem:[#allocation4_spill]] %s7141_s17  ;;  %s7175_s24 = sld [smem:[#allocation3_spill]] }
   0x3   :  { %7169 = sst [smem:[#allocation5_spill]] %s7142_s18 }
   0x4   :  { %7170 = sst [smem:[#allocation6_spill]] %s7143_s19 }
   0x5   :  { %7171 = sst [smem:[#allocation7_spill]] %s7144_s20 }
   0x6   :  { %7172 = sst [smem:[#allocation8_spill]] %s7145_s21 }
   0x7   :  { %7173 = sst [smem:[#allocation9_spill]] %s7146_s22 }
   0x8   :  { %7174 = sst [smem:[#allocation10_spill]] %s7147_s23  ;;  %v78_v0 = vld [vmem:[%s7175_s24 + $0x18] sm:$0xff]  ;;  %v100_v1 = vld [vmem:[%s7175_s24 + $0xc8] sm:$0xff]  ;;  %v77_v2 = vld [vmem:[%s7175_s24 + $0x10] sm:$0xff] }
   0x9   :  { %v4509_v4 = vpack.c.bf16 %v100_v1, %v78_v0  ;;  %v99_v5 = vld [vmem:[%s7175_s24 + $0xc0] sm:$0xff]  ;;  %v122_v6 = vld [vmem:[%s7175_s24 + $0x178] sm:$0xff]  ;;  %v144_v7 = vld [vmem:[%s7175_s24 + $0x228] sm:$0xff] }
   0xa   :  { %v4511_v8 = vpack.c.bf16 %v99_v5, %v77_v2  ;;  %v4513_v9 = vpack.c.bf16 %v144_v7, %v122_v6  ;;  %v121_v10 = vld [vmem:[%s7175_s24 + $0x170] sm:$0xff]  ;;  %v143_v11 = vld [vmem:[%s7175_s24 + $0x220] sm:$0xff]  ;;  %v82_v12 = vld [vmem:[%s7175_s24 + $0x38] sm:$0xff] }
   0xb   :  { %4510 = vmatprep.subr.bf16.mxu1 %v4509_v4  ;;  %v104_v13 = vld [vmem:[%s7175_s24 + $0xe8] sm:$0xff]  ;;  %v4515_v14 = vpack.c.bf16 %v143_v11, %v121_v10  ;;  %v81_v16 = vld [vmem:[%s7175_s24 + $0x30] sm:$0xff]  ;;  %v103_v17 = vld [vmem:[%s7175_s24 + $0xe0] sm:$0xff] }
   0xc   :  { %4512 = vmatpush1.bf16.msra.mxu1 %v4511_v8  ;;  %v4525_v15 = vpack.c.bf16 %v104_v13, %v82_v12  ;;  %v126_v18 = vld [vmem:[%s7175_s24 + $0x198] sm:$0xff]  ;;  %v148_v19 = vld [vmem:[%s7175_s24 + $0x248] sm:$0xff]  ;;  %v4527_v21 = vpack.c.bf16 %v103_v17, %v81_v16  ;;  %v125_v23 = vld [vmem:[%s7175_s24 + $0x190] sm:$0xff] }
   0xd   :  { %4514 = vmatprep.subr.bf16.mxu1 %v4513_v9  ;;  %v4529_v22 = vpack.c.bf16 %v148_v19, %v126_v18  ;;  %v147_v24 = vld [vmem:[%s7175_s24 + $0x240] sm:$0xff]  ;;  %v86_v25 = vld [vmem:[%s7175_s24 + $0x58] sm:$0xff]  ;;  %v108_v26 = vld [vmem:[%s7175_s24 + $0x108] sm:$0xff] }
   0xe   :  { %v4531_v27 = vpack.c.bf16 %v147_v24, %v125_v23  ;;  %v4541_v28 = vpack.c.bf16 %v108_v26, %v86_v25  ;;  %v85_v29 = vld [vmem:[%s7175_s24 + $0x50] sm:$0xff]  ;;  %v107_v30 = vld [vmem:[%s7175_s24 + $0x100] sm:$0xff]  ;;  %v130_v31 = vld [vmem:[%s7175_s24 + $0x1b8] sm:$0xff] }
   0xf   :  { %v152_v32 = vld [vmem:[%s7175_s24 + $0x268] sm:$0xff]  ;;  %v4543_v33 = vpack.c.bf16 %v107_v30, %v85_v29  ;;  %v129_v35 = vld [vmem:[%s7175_s24 + $0x1b0] sm:$0xff]  ;;  %v151_v36 = vld [vmem:[%s7175_s24 + $0x260] sm:$0xff] }
  0x10   :  { %4516 = vmatpush1.bf16.msra.mxu1 %v4515_v14  ;;  %v4545_v34 = vpack.c.bf16 %v152_v32, %v130_v31  ;;  %v90_v37 = vld [vmem:[%s7175_s24 + $0x78] sm:$0xff]  ;;  %v112_v38 = vld [vmem:[%s7175_s24 + $0x128] sm:$0xff]  ;;  %v4547_v39 = vpack.c.bf16 %v151_v36, %v129_v35  ;;  %v89_v41 = vld [vmem:[%s7175_s24 + $0x70] sm:$0xff] }
  0x11   :  { %4526 = vmatprep.subr.bf16.mxu1 %v4525_v15  ;;  %v4557_v40 = vpack.c.bf16 %v112_v38, %v90_v37  ;;  %v111_v42 = vld [vmem:[%s7175_s24 + $0x120] sm:$0xff]  ;;  %v134_v43 = vld [vmem:[%s7175_s24 + $0x1d8] sm:$0xff]  ;;  %v156_v44 = vld [vmem:[%s7175_s24 + $0x288] sm:$0xff] }
  0x12   :  { %v133_v45 = vld [vmem:[%s7175_s24 + $0x1d0] sm:$0xff]  ;;  %v155_v46 = vld [vmem:[%s7175_s24 + $0x280] sm:$0xff]  ;;  %v4559_v47 = vpack.c.bf16 %v111_v42, %v89_v41  ;;  %v94_v48 = vld [vmem:[%s7175_s24 + $0x98] sm:$0xff]  ;;  %v4561_v52 = vpack.c.bf16 %v156_v44, %v134_v43 }
  0x13   :  { %3586 = vmatmul.mubr.msk.f32.vlgmr.msra.gmra.mrb[0].mxu1 %vm279_vm0, %v5506_v20  ;;  %v116_v49 = vld [vmem:[%s7175_s24 + $0x148] sm:$0xff]  ;;  %v98_v51 = vld [vmem:[%s7175_s24 + $0xb8] sm:$0xff]  ;;  %v75_v54 = vld [vmem:[%s7175_s24] sm:$0xff]  ;;  %v4563_v0 = vpack.c.bf16 %v155_v46, %v133_v45 }
  0x14   :  { %4528 = vmatpush1.bf16.msra.mxu1 %v4527_v21  ;;  %560 = vmatprep.mubr.f32.mxu1 %v5335_v3  ;;  %v76_v50 = vld [vmem:[%s7175_s24 + $0x8] sm:$0xff]  ;;  %v97_v55 = vld [vmem:[%s7175_s24 + $0xb0] sm:$0xff]  ;;  %v142_v58 = vld [vmem:[%s7175_s24 + $0x218] sm:$0xff]  ;;  %v4573_v1 = vpack.c.bf16 %v116_v49, %v94_v48 }
  0x15   :  { %4530 = vmatprep.subr.bf16.mxu1 %v4529_v22  ;;  %v4501_v53 = vpack.c.bf16 %v98_v51, %v76_v50  ;;  %v120_v56 = vld [vmem:[%s7175_s24 + $0x168] sm:$0xff]  ;;  %v4503_v57 = vpack.c.bf16 %v97_v55, %v75_v54  ;;  %v119_v59 = vld [vmem:[%s7175_s24 + $0x160] sm:$0xff]  ;;  %v141_v60 = vld [vmem:[%s7175_s24 + $0x210] sm:$0xff] }
  0x16   :  { %v4505_v61 = vpack.c.bf16 %v142_v58, %v120_v56  ;;  %v80_v62 = vld [vmem:[%s7175_s24 + $0x28] sm:$0xff]  ;;  %v102_v63 = vld [vmem:[%s7175_s24 + $0xd8] sm:$0xff]  ;;  %v93_v2 = vld [vmem:[%s7175_s24 + $0x90] sm:$0xff]  ;;  %v4507_v5 = vpack.c.bf16 %v141_v60, %v119_v59 }
  0x17   :  { %4502 = vmatprep.subr.bf16.mxu0 %v4501_v53  ;;  %v115_v4 = vld [vmem:[%s7175_s24 + $0x140] sm:$0xff]  ;;  %v138_v6 = vld [vmem:[%s7175_s24 + $0x1f8] sm:$0xff]  ;;  %v160_v7 = vld [vmem:[%s7175_s24 + $0x2a8] sm:$0xff]  ;;  %v4517_v8 = vpack.c.bf16 %v102_v63, %v80_v62 }
  0x18   :  { %4532 = vmatpush1.bf16.msra.mxu1 %v4531_v27  ;;  %4504 = vmatpush1.bf16.msra.mxu0 %v4503_v57  ;;  %v79_v9 = vld [vmem:[%s7175_s24 + $0x20] sm:$0xff]  ;;  %v101_v10 = vld [vmem:[%s7175_s24 + $0xd0] sm:$0xff]  ;;  %v4575_v11 = vpack.c.bf16 %v115_v4, %v93_v2  ;;  %v4577_v12 = vpack.c.bf16 %v160_v7, %v138_v6  ;;  %v1140_v16 = vld [vmem:[%s7149_s2 + $0x8] sm:$0xff] }
  0x19   :  { %4542 = vmatprep.subr.bf16.mxu1 %v4541_v28  ;;  %4506 = vmatprep.subr.bf16.mxu0 %v4505_v61  ;;  %v137_v13 = vld [vmem:[%s7175_s24 + $0x1f0] sm:$0xff]  ;;  %v159_v14 = vld [vmem:[%s7175_s24 + $0x2a0] sm:$0xff]  ;;  %v4519_v17 = vpack.c.bf16 %v101_v10, %v79_v9  ;;  %v1142_v23 = vld [vmem:[%s7149_s2 + $0x18] sm:$0xff] }
  0x1a   :  { %v1139_v15 = vld [vmem:[%s7149_s2] sm:$0xff]  ;;  %v4579_v18 = vpack.c.bf16 %v159_v14, %v137_v13  ;;  %v1141_v22 = vld [vmem:[%s7149_s2 + $0x10] sm:$0xff]  ;;  %v1144_v27 = vld [vmem:[%s7149_s2 + $0x28] sm:$0xff] }
  0x1b   :  { %3588 = vmatmul.mubr.msk.f32.vlgmr.msra.gmra.mrb[2].mxu1 %vm279_vm0, %v5506_v20  ;;  %v4589_v19 = vpack.c.bf16 %v1140_v16, %v1139_v15  ;;  %v5643_v21 = vld [vmem:[%s7150_s0] sm:$0xff]  ;;  %v4593_v25 = vpack.c.bf16 %v1142_v23, %v1141_v22  ;;  %v1145_v29 = vld [vmem:[%s7149_s2 + $0x30] sm:$0xff]  ;;  %v1146_v30 = vld [vmem:[%s7149_s2 + $0x38] sm:$0xff] }
  0x1c   :  { %4544 = vmatpush1.bf16.msra.mxu1 %v4543_v33  ;;  %702 = vmatprep.mubr.f32.mxu1 %v5335_v3  ;;  %v1123_v24 = vmax.f32 %v5643_v21, 0.0  ;;  %v1143_v26 = vld [vmem:[%s7149_s2 + $0x20] sm:$0xff]  ;;  %v4601_v31 = vpack.c.bf16 %v1146_v30, %v1145_v29  ;;  %v1148_v33 = vld [vmem:[%s7149_s2 + $0x48] sm:$0xff]  ;;  %v1149_v35 = vld [vmem:[%s7149_s2 + $0x50] sm:$0xff] }
  0x1d   :  { %4546 = vmatprep.subr.bf16.mxu1 %v4545_v34  ;;  %4508 = vmatpush1.bf16.msra.mxu0 %v4507_v5  ;;  %v4597_v28 = vpack.c.bf16 %v1144_v27, %v1143_v26  ;;  %v1147_v32 = vld [vmem:[%s7149_s2 + $0x40] sm:$0xff]  ;;  %v1150_v36 = vld [vmem:[%s7149_s2 + $0x58] sm:$0xff]  ;;  %v1153_v41 = vld [vmem:[%s7149_s2 + $0x70] sm:$0xff] }
  0x1e   :  { %4518 = vmatprep.subr.bf16.mxu0 %v4517_v8  ;;  %v4605_v34 = vpack.c.bf16 %v1148_v33, %v1147_v32  ;;  %v4609_v37 = vpack.c.bf16 %v1150_v36, %v1149_v35  ;;  %v1151_v38 = vld [vmem:[%s7149_s2 + $0x60] sm:$0xff]  ;;  %v1154_v42 = vld [vmem:[%s7149_s2 + $0x78] sm:$0xff]  ;;  %v5696_v44 = vld [vmem:[%s7150_s0 + $0x8] sm:$0xff] }
  0x1f   :  { %v4617_v43 = vpack.c.bf16 %v1154_v42, %v1153_v41  ;;  %v5701_v45 = vld [vmem:[%s7150_s0 + $0x10] sm:$0xff]  ;;  %v1124_v46 = vmax.f32 %v5696_v44, 0.0  ;;  %v5708_v48 = vld [vmem:[%s7150_s0 + $0x18] sm:$0xff]  ;;  %v5713_v49 = vld [vmem:[%s7150_s0 + $0x20] sm:$0xff] }
  0x20   :  { %4548 = vmatpush1.bf16.msra.mxu1 %v4547_v39  ;;  %3585 = vmatmul.mubr.msk.f32.vlgmr.msra.gmra.mrb[0].mxu0 %vm279_vm0, %v5506_v20  ;;  %v1152_v39 = vld [vmem:[%s7149_s2 + $0x68] sm:$0xff]  ;;  %v1126_v50 = vmax.f32 %v5708_v48, 0.0  ;;  %v1127_v51 = vmax.f32 %v5713_v49, 0.0  ;;  %v5725_v53 = vld [vmem:[%s7150_s0 + $0x30] sm:$0xff]  ;;  %v5732_v56 = vld [vmem:[%s7150_s0 + $0x38] sm:$0xff] }
  0x21   :  { %4558 = vmatprep.subr.bf16.mxu1 %v4557_v40  ;;  %4520 = vmatpush1.bf16.msra.mxu0 %v4519_v17  ;;  %v4613_v40 = vpack.c.bf16 %v1152_v39, %v1151_v38  ;;  %v1129_v55 = vmax.f32 %v5725_v53, 0.0  ;;  %v5737_v57 = vld [vmem:[%s7150_s0 + $0x40] sm:$0xff]  ;;  %v1130_v58 = vmax.f32 %v5732_v56, 0.0  ;;  %v5744_v60 = vld [vmem:[%s7150_s0 + $0x48] sm:$0xff]  ;;  %v5749_v61 = vld [vmem:[%s7150_s0 + $0x50] sm:$0xff] }
  0x22   :  { %489 = vmatprep.mubr.f32.mxu0 %v5335_v3  ;;  %v1131_v59 = vmax.f32 %v5737_v57, 0.0  ;;  %v1132_v62 = vmax.f32 %v5744_v60, 0.0  ;;  %v1133_v63 = vmax.f32 %v5749_v61, 0.0  ;;  %v5768_v5 = vld [vmem:[%s7150_s0 + $0x68] sm:$0xff]  ;;  %v5773_v6 = vld [vmem:[%s7150_s0 + $0x70] sm:$0xff]  ;;  %v146_v8 = vld [vmem:[%s7175_s24 + $0x238] sm:$0xff] }
  0x23   :  { %3590 = vmatmul.mubr.msk.f32.vlgmr.msra.gmra.mrb[4].mxu1 %vm279_vm0, %v5506_v20  ;;  %v124_v7 = vld [vmem:[%s7175_s24 + $0x188] sm:$0xff]  ;;  %v1136_v9 = vmax.f32 %v5768_v5, 0.0  ;;  %v1137_v13 = vmax.f32 %v5773_v6, 0.0  ;;  %v5792_v14 = vld [vmem:[%s7150_s0 + $0x78] sm:$0xff]  ;;  %v105_v23 = vld [vmem:[%s7175_s24 + $0xf0] sm:$0xff] }
  0x24   :  { %4560 = vmatpush1.bf16.msra.mxu1 %v4559_v47  ;;  %844 = vmatprep.mubr.f32.mxu1 %v5335_v3  ;;  %v1125_v47 = vmax.f32 %v5701_v45, 0.0  ;;  %v4521_v10 = vpack.c.bf16 %v146_v8, %v124_v7  ;;  %v84_v16 = vld [vmem:[%s7175_s24 + $0x48] sm:$0xff]  ;;  %v106_v17 = vld [vmem:[%s7175_s24 + $0xf8] sm:$0xff]  ;;  %v149_v29 = vld [vmem:[%s7175_s24 + $0x250] sm:$0xff] }
  0x25   :  { %4562 = vmatprep.subr.bf16.mxu1 %v4561_v52  ;;  %v5720_v52 = vld [vmem:[%s7150_s0 + $0x28] sm:$0xff]  ;;  %v4533_v22 = vpack.c.bf16 %v106_v17, %v84_v16  ;;  %v150_v26 = vld [vmem:[%s7175_s24 + $0x258] sm:$0xff]  ;;  %v87_v33 = vld [vmem:[%s7175_s24 + $0x60] sm:$0xff] }
  0x26   :  { %v1128_v54 = vmax.f32 %v5720_v52, 0.0  ;;  %4522 = vmatprep.subr.bf16.mxu0 %v4521_v10  ;;  %v110_v32 = vld [vmem:[%s7175_s24 + $0x118] sm:$0xff]  ;;  %v109_v35 = vld [vmem:[%s7175_s24 + $0x110] sm:$0xff]  ;;  %v95_v8 = vld [vmem:[%s7175_s24 + $0xa0] sm:$0xff] }
  0x27   :  { %v4551_v36 = vpack.c.bf16 %v109_v35, %v87_v33  ;;  %v154_v38 = vld [vmem:[%s7175_s24 + $0x278] sm:$0xff]  ;;  %v153_v41 = vld [vmem:[%s7175_s24 + $0x270] sm:$0xff]  ;;  %v139_v16 = vld [vmem:[%s7175_s24 + $0x200] sm:$0xff] }
  0x28   :  { %4564 = vmatpush1.bf16.msra.mxu1 %v4563_v0  ;;  %v5756_v0 = vld [vmem:[%s7150_s0 + $0x58] sm:$0xff]  ;;  %v117_v10 = vld [vmem:[%s7175_s24 + $0x150] sm:$0xff]  ;;  %v1331_v33 = vld [vmem:[%s7151_s4 + $0x40] sm:$0xff] }
  0x29   :  { %4574 = vmatprep.subr.bf16.mxu1 %v4573_v1  ;;  %v5761_v1 = vld [vmem:[%s7150_s0 + $0x60] sm:$0xff]  ;;  %v1134_v2 = vmax.f32 %v5756_v0, 0.0  ;;  %v118_v7 = vld [vmem:[%s7175_s24 + $0x158] sm:$0xff]  ;;  %v161_v17 = vld [vmem:[%s7175_s24 + $0x2b0] sm:$0xff] }
  0x2a   :  { %v1135_v4 = vmax.f32 %v5761_v1, 0.0  ;;  %v1333_v35 = vld [vmem:[%s7151_s4 + $0x50] sm:$0xff] }
  0x2b   :  { %3592 = vmatmul.mubr.msk.f32.vlgmr.msra.gmra.mrb[6].mxu1 %vm279_vm0, %v5506_v20 }
  0x2c   :  { %4576 = vmatpush1.bf16.msra.mxu1 %v4575_v11  ;;  %986 = vmatprep.mubr.f32.mxu1 %v5335_v3  ;;  %v123_v11 = vld [vmem:[%s7175_s24 + $0x180] sm:$0xff] }
  0x2d   :  { %4578 = vmatprep.subr.bf16.mxu1 %v4577_v12  ;;  %v145_v12 = vld [vmem:[%s7175_s24 + $0x230] sm:$0xff] }
  0x2e   :  { %v4523_v15 = vpack.c.bf16 %v145_v12, %v123_v11  ;;  %v4583_v11 = vpack.c.bf16 %v117_v10, %v95_v8  ;;  %v140_v12 = vld [vmem:[%s7175_s24 + $0x208] sm:$0xff] }
  0x30   :  { %4580 = vmatpush1.bf16.msra.mxu1 %v4579_v18  ;;  %4524 = vmatpush1.bf16.msra.mxu0 %v4523_v15  ;;  %v83_v18 = vld [vmem:[%s7175_s24 + $0x40] sm:$0xff] }
  0x31   :  { %4590 = vmatprep.subr.bf16.mxu1 %v4589_v19  ;;  %4534 = vmatprep.subr.bf16.mxu0 %v4533_v22  ;;  %v1324_v22 = vld [vmem:[%s7151_s4 + $0x8] sm:$0xff] }
  0x33   :  { %3594 = vmatmul.mubr.msk.f32.vlgmr.msra.gmra.mrb[8].mxu1 %vm279_vm0, %v5506_v20  ;;  %3587 = vmatmul.mubr.msk.f32.vlgmr.msra.gmra.mrb[2].mxu0 %vm279_vm0, %v5506_v20 }
  0x34   :  { %4592 = vmatpush3.bf16.msra.mxu1 %v4589_v19  ;;  %3973 = vmatprep.mubr.f32.mxu1 %v1123_v24  ;;  %v1138_v19 = vmax.f32 %v5792_v14, 0.0  ;;  %v4535_v24 = vpack.c.bf16 %v105_v23, %v83_v18  ;;  %v4587_v18 = vpack.c.bf16 %v161_v17, %v139_v16  ;;  %v1325_v23 = vld [vmem:[%s7151_s4 + $0x10] sm:$0xff]  ;;  %v1671_v16 = vld [vmem:[%s7154_s7 + $0x18] sm:$0xff] }
  0x35   :  { %4594 = vmatprep.subr.bf16.mxu1 %v4593_v25  ;;  %631 = vmatprep.mubr.f32.mxu0 %v5335_v3 }
  0x36   :  { %4536 = vmatpush1.bf16.msra.mxu0 %v4535_v24 }
  0x38   :  { %4596 = vmatpush3.bf16.msra.mxu1 %v4593_v25  ;;  %v128_v25 = vld [vmem:[%s7175_s24 + $0x1a8] sm:$0xff] }
  0x39   :  { %4598 = vmatprep.subr.bf16.mxu1 %v4597_v28  ;;  %v4537_v27 = vpack.c.bf16 %v150_v26, %v128_v25  ;;  %v1326_v25 = vld [vmem:[%s7151_s4 + $0x18] sm:$0xff] }
  0x3a   :  { %v4625_v26 = vpack.c.bf16 %v1326_v25, %v1325_v23  ;;  %v1672_v25 = vld [vmem:[%s7154_s7 + $0x20] sm:$0xff] }
  0x3b   :  { %4538 = vmatprep.subr.bf16.mxu0 %v4537_v27  ;;  %v1327_v27 = vld [vmem:[%s7151_s4 + $0x20] sm:$0xff] }
  0x3c   :  { %4600 = vmatpush3.bf16.msra.mxu1 %v4597_v28  ;;  %v127_v28 = vld [vmem:[%s7175_s24 + $0x1a0] sm:$0xff] }
  0x3d   :  { %4602 = vmatprep.subr.bf16.mxu1 %v4601_v31  ;;  %v4539_v30 = vpack.c.bf16 %v149_v29, %v127_v28  ;;  %v1328_v28 = vld [vmem:[%s7151_s4 + $0x28] sm:$0xff] }
  0x3e   :  { %v4629_v29 = vpack.c.bf16 %v1328_v28, %v1327_v27  ;;  %v6004_v28 = vld [vmem:[%s7153_s16 + $0x8] sm:$0xff] }
  0x3f   :  { %4540 = vmatpush1.bf16.msra.mxu0 %v4539_v30  ;;  %v1329_v30 = vld [vmem:[%s7151_s4 + $0x30] sm:$0xff] }
  0x40   :  { %4604 = vmatpush3.bf16.msra.mxu1 %v4601_v31  ;;  %v88_v31 = vld [vmem:[%s7175_s24 + $0x68] sm:$0xff] }
  0x41   :  { %4606 = vmatprep.subr.bf16.mxu1 %v4605_v34 }
  0x42   :  { %3589 = vmatmul.mubr.msk.f32.vlgmr.msra.gmra.mrb[4].mxu0 %vm279_vm0, %v5506_v20 }
  0x43   :  { %773 = vmatprep.mubr.f32.mxu0 %v5335_v3 }
  0x44   :  { %4608 = vmatpush3.bf16.msra.mxu1 %v4605_v34  ;;  %v4549_v34 = vpack.c.bf16 %v110_v32, %v88_v31  ;;  %v1330_v31 = vld [vmem:[%s7151_s4 + $0x38] sm:$0xff] }
  0x45   :  { %4610 = vmatprep.subr.bf16.mxu1 %v4609_v37  ;;  %v4633_v32 = vpack.c.bf16 %v1330_v31, %v1329_v30  ;;  %v1674_v31 = vld [vmem:[%s7154_s7 + $0x30] sm:$0xff] }
  0x46   :  { %4550 = vmatprep.subr.bf16.mxu0 %v4549_v34 }
  0x47   :  { %4552 = vmatpush1.bf16.msra.mxu0 %v4551_v36  ;;  %v1334_v36 = vld [vmem:[%s7151_s4 + $0x58] sm:$0xff] }
  0x48   :  { %4612 = vmatpush3.bf16.msra.mxu1 %v4609_v37  ;;  %v132_v37 = vld [vmem:[%s7175_s24 + $0x1c8] sm:$0xff] }
  0x49   :  { %4614 = vmatprep.subr.bf16.mxu1 %v4613_v40  ;;  %v4553_v39 = vpack.c.bf16 %v154_v38, %v132_v37  ;;  %v4641_v37 = vpack.c.bf16 %v1334_v36, %v1333_v35  ;;  %v1335_v38 = vld [vmem:[%s7151_s4 + $0x60] sm:$0xff] }
  0x4b   :  { %4554 = vmatprep.subr.bf16.mxu0 %v4553_v39  ;;  %v1336_v39 = vld [vmem:[%s7151_s4 + $0x68] sm:$0xff] }
  0x4c   :  { %4616 = vmatpush3.bf16.msra.mxu1 %v4613_v40  ;;  %v131_v40 = vld [vmem:[%s7175_s24 + $0x1c0] sm:$0xff] }
  0x4d   :  { %4618 = vmatprep.subr.bf16.mxu1 %v4617_v43  ;;  %v4555_v42 = vpack.c.bf16 %v153_v41, %v131_v40  ;;  %v4645_v40 = vpack.c.bf16 %v1336_v39, %v1335_v38  ;;  %v1337_v41 = vld [vmem:[%s7151_s4 + $0x70] sm:$0xff]  ;;  %v1677_v38 = vld [vmem:[%s7154_s7 + $0x48] sm:$0xff] }
  0x4f   :  { %4556 = vmatpush1.bf16.msra.mxu0 %v4555_v42  ;;  %v1338_v42 = vld [vmem:[%s7151_s4 + $0x78] sm:$0xff] }
  0x50   :  { %4620 = vmatpush3.bf16.msra.mxu1 %v4617_v43  ;;  %v92_v43 = vld [vmem:[%s7175_s24 + $0x88] sm:$0xff] }
  0x52   :  { %3591 = vmatmul.mubr.msk.f32.vlgmr.msra.gmra.mrb[6].mxu0 %vm279_vm0, %v5506_v20 }
  0x53   :  { %3974 = vmatmul.mubr.f32.vlgmr.msra.gmra.mrb[10].mxu1 %v1124_v46  ;;  %v114_v46 = vld [vmem:[%s7175_s24 + $0x138] sm:$0xff]  ;;  %915 = vmatprep.mubr.f32.mxu0 %v5335_v3 }
  0x54   :  { %3976 = vmatprep.mubr.f32.mxu1 %v1125_v47  ;;  %v91_v47 = vld [vmem:[%s7175_s24 + $0x80] sm:$0xff] }
  0x57   :  { %3977 = vmatmul.mubr.f32.gmra.mrb[12].mxu1 %v1126_v50  ;;  %v4565_v50 = vpack.c.bf16 %v114_v46, %v92_v43  ;;  %v4649_v43 = vpack.c.bf16 %v1338_v42, %v1337_v41  ;;  %v1491_v46 = vld [vmem:[%s7152_s6] sm:$0xff] }
  0x58   :  { %3979 = vmatprep.mubr.f32.mxu1 %v1127_v51  ;;  %v113_v51 = vld [vmem:[%s7175_s24 + $0x130] sm:$0xff] }
  0x59   :  { %4566 = vmatprep.subr.bf16.mxu0 %v4565_v50 }
  0x5b   :  { %3980 = vmatmul.mubr.f32.gmra.mrb[14].mxu1 %v1128_v54  ;;  %v4567_v54 = vpack.c.bf16 %v113_v51, %v91_v47  ;;  %v1492_v47 = vld [vmem:[%s7152_s6 + $0x8] sm:$0xff]  ;;  %v169_v51 = vlaneseq }
  0x5c   :  { %3982 = vmatprep.mubr.f32.mxu1 %v1129_v55  ;;  %v136_v55 = vld [vmem:[%s7175_s24 + $0x1e8] sm:$0xff]  ;;  %v5959_v50 = vpack.c.bf16 %v1492_v47, %v1491_v46  ;;  %v1678_v46 = vld [vmem:[%s7154_s7 + $0x50] sm:$0xff]  ;;  %v1679_v47 = vld [vmem:[%s7154_s7 + $0x58] sm:$0xff] }
  0x5d   :  { %4568 = vmatpush1.bf16.msra.mxu0 %v4567_v54  ;;  %v5962_v54 = vshrl.u32 %v169_v51, 7 }
  0x5f   :  { %3983 = vmatmul.mubr.f32.gmra.mrb[16].mxu1 %v1130_v58  ;;  %v158_v58 = vld [vmem:[%s7175_s24 + $0x298] sm:$0xff]  ;;  %v195_v8 = vsub.s32 6, %v5962_v54  ;;  %v199_v10 = vsub.s32 7, %v5962_v54  ;;  %v6026_v41 = vsub.s32 1, %v5962_v54 }
  0x60   :  { %3985 = vmatprep.mubr.f32.mxu1 %v1131_v59  ;;  %v4569_v59 = vpack.c.bf16 %v158_v58, %v136_v55  ;;  %v5965_v55 = vsub.s32 2, %v5962_v54  ;;  %v5970_v58 = vld [vmem:[%s7153_s16] sm:$0xff] }
  0x61   :  { %v200_v17 = vrot.slane %v5970_v58, %v199_v10  ;;  %v232_v51 = vrot.slane %v6004_v28, %v199_v10  ;;  %v1681_v10 = vld [vmem:[%s7154_s7 + $0x68] sm:$0xff] }
  0x62   :  { %4570 = vmatprep.subr.bf16.mxu0 %v4569_v59  ;;  %v5973_v59 = vsub.s32 3, %v5962_v54  ;;  %v212_v30 = vrot.slane %v6004_v28, %v5965_v55 }
  0x63   :  { %3986 = vmatmul.mubr.f32.gmra.mrb[18].mxu1 %v1132_v62  ;;  %v135_v62 = vld [vmem:[%s7175_s24 + $0x1e0] sm:$0xff] }
  0x64   :  { %3988 = vmatprep.mubr.f32.mxu1 %v1133_v63  ;;  %v157_v63 = vld [vmem:[%s7175_s24 + $0x290] sm:$0xff] }
  0x67   :  { %3989 = vmatmul.mubr.f32.gmra.mrb[20].mxu1 %v1134_v2  ;;  %v4571_v2 = vpack.c.bf16 %v157_v63, %v135_v62  ;;  %v180_v62 = vrot.slane %v5970_v58, %v5965_v55  ;;  %v184_v63 = vrot.slane %v5970_v58, %v5973_v59 }
  0x68   :  { %3991 = vmatprep.mubr.f32.mxu1 %v1135_v4  ;;  %v96_v4 = vld [vmem:[%s7175_s24 + $0xa8] sm:$0xff] }
  0x69   :  { %4572 = vmatpush1.bf16.msra.mxu0 %v4571_v2 }
  0x6b   :  { %3992 = vmatmul.mubr.f32.gmra.mrb[22].mxu1 %v1136_v9  ;;  %v4581_v9 = vpack.c.bf16 %v118_v7, %v96_v4 }
  0x6c   :  { %3994 = vmatprep.mubr.f32.mxu1 %v1137_v13  ;;  %3593 = vmatmul.mubr.msk.f32.vlgmr.msra.gmra.mrb[8].mxu0 %vm279_vm0, %v5506_v20  ;;  %v162_v13 = vld [vmem:[%s7175_s24 + $0x2b8] sm:$0xff] }
  0x6d   :  { %4582 = vmatprep.subr.bf16.mxu0 %v4581_v9  ;;  %1057 = vmatprep.mubr.f32.mxu0 %v5335_v3  ;;  %v4585_v15 = vpack.c.bf16 %v162_v13, %v140_v12  ;;  %v196_v12 = vrot.slane %v5970_v58, %v195_v8  ;;  %v1669_v13 = vld [vmem:[%s7154_s7 + $0x8] sm:$0xff] }
  0x6e   :  { %4584 = vmatpush1.bf16.msra.mxu0 %v4583_v11  ;;  %v1668_v11 = vld [vmem:[%s7154_s7] sm:$0xff] }
  0x6f   :  { %3995 = vmatmul.mubr.f32.gmra.mrb[24].mxu1 %v1138_v19  ;;  %4586 = vmatprep.subr.bf16.mxu0 %v4585_v15  ;;  %v1323_v19 = vld [vmem:[%s7151_s4] sm:$0xff]  ;;  %v1670_v15 = vld [vmem:[%s7154_s7 + $0x10] sm:$0xff] }
  0x70   :  { %v4621_v24 = vpack.c.bf16 %v1324_v22, %v1323_v19  ;;  %v4685_v19 = vpack.c.bf16 %v1669_v13, %v1668_v11  ;;  %v4689_v22 = vpack.c.bf16 %v1671_v16, %v1670_v15 }
  0x72   :  { %4588 = vmatpush1.bf16.msra.mxu0 %v4587_v18  ;;  %4686 = vmatprep.subr.bf16.mxu1 %v4685_v19 }
  0x73   :  { %4622 = vmatprep.subr.bf16.mxu0 %v4621_v24  ;;  %4688 = vmatpush3.bf16.msra.mxu1 %v4685_v19 }
  0x74   :  { %4690 = vmatprep.subr.bf16.mxu1 %v4689_v22 }
  0x75   :  { %3595 = vmatmul.mubr.msk.f32.vlgmr.msra.gmra.mrb[10].mxu0 %vm279_vm0, %v5506_v20  ;;  %v1332_v20 = vld [vmem:[%s7151_s4 + $0x48] sm:$0xff] }
  0x76   :  { %4624 = vmatpush3.bf16.msra.mxu0 %v4621_v24  ;;  %v4637_v34 = vpack.c.bf16 %v1332_v20, %v1331_v33  ;;  %v216_v33 = vrot.slane %v6004_v28, %v5973_v59 }
  0x77   :  { %4626 = vmatprep.subr.bf16.mxu0 %v4625_v26  ;;  %4692 = vmatpush3.bf16.msra.mxu1 %v4689_v22 }
  0x7a   :  { %4628 = vmatpush3.bf16.msra.mxu0 %v4625_v26  ;;  %v1673_v26 = vld [vmem:[%s7154_s7 + $0x28] sm:$0xff] }
  0x7b   :  { %4630 = vmatprep.subr.bf16.mxu0 %v4629_v29 }
  0x7e   :  { %4632 = vmatpush3.bf16.msra.mxu0 %v4629_v29  ;;  %v4693_v29 = vpack.c.bf16 %v1673_v26, %v1672_v25 }
  0x7f   :  { %4634 = vmatprep.subr.bf16.mxu0 %v4633_v32 }
  0x80   :  { %4694 = vmatprep.subr.bf16.mxu1 %v4693_v29 }
  0x81   :  { %4696 = vmatpush3.bf16.msra.mxu1 %v4693_v29 }
  0x82   :  { %4636 = vmatpush3.bf16.msra.mxu0 %v4633_v32  ;;  %v1675_v32 = vld [vmem:[%s7154_s7 + $0x38] sm:$0xff] }
  0x83   :  { %4638 = vmatprep.subr.bf16.mxu0 %v4637_v34 }
  0x86   :  { %4640 = vmatpush3.bf16.msra.mxu0 %v4637_v34  ;;  %v4697_v34 = vpack.c.bf16 %v1675_v32, %v1674_v31  ;;  %v1493_v31 = vld [vmem:[%s7152_s6 + $0x10] sm:$0xff]  ;;  %v1494_v32 = vld [vmem:[%s7152_s6 + $0x18] sm:$0xff] }
  0x87   :  { %4642 = vmatprep.subr.bf16.mxu0 %v4641_v37 }
  0x88   :  { %4698 = vmatprep.subr.bf16.mxu1 %v4697_v34 }
  0x89   :  { %4700 = vmatpush3.bf16.msra.mxu1 %v4697_v34 }
  0x8a   :  { %4644 = vmatpush3.bf16.msra.mxu0 %v4641_v37  ;;  %v1676_v37 = vld [vmem:[%s7154_s7 + $0x40] sm:$0xff] }
  0x8b   :  { %4646 = vmatprep.subr.bf16.mxu0 %v4645_v40  ;;  %v4701_v42 = vpack.c.bf16 %v1677_v38, %v1676_v37  ;;  %v4657_v37 = vpack.c.bf16 %v1494_v32, %v1493_v31  ;;  %v6105_v32 = vsub.s32 5, %v5962_v54 }
  0x8d   :  { %4702 = vmatprep.subr.bf16.mxu1 %v4701_v42 }
  0x8e   :  { %4648 = vmatpush3.bf16.msra.mxu0 %v4645_v40  ;;  %v6023_v40 = vsub.s32 0, %v5962_v54  ;;  %4704 = vmatpush3.bf16.msra.mxu1 %v4701_v42  ;;  %v1496_v42 = vld [vmem:[%s7152_s6 + $0x28] sm:$0xff] }
  0x8f   :  { %4650 = vmatprep.subr.bf16.mxu0 %v4649_v43 }
  0x92   :  { %4652 = vmatpush3.bf16.msra.mxu0 %v4649_v43  ;;  %v228_v43 = vrot.slane %v6004_v28, %v195_v8 }
  0x93   :  { %4654 = vmatprep.subr.bf16.mxu0 %v5959_v50 }
  0xe6   :  { %v420_v2 = vpop.f32.mrb[0].mxu1 }
  0xe7   :  { %v421_v4 = vadd.f32 %v420_v2, %v180_v62  ;;  %v422_v7 = vpop.f32.mrb[1].mxu1  ;;  %v172_v62 = vrot.slane %v5970_v58, %v6023_v40  ;;  %v176_v2 = vrot.slane %v5970_v58, %v6026_v41 }
  0xe8   :  { %v423_v9 = vadd.f32 %v422_v7, %v184_v63 }
  0xe9   :  { %1068 = vst [vmem:[#allocation2 + $0x10] sm:$0xff] %v421_v4  ;;  %v4705_v4 = vpack.c.bf16 %v1679_v47, %v1678_v46 }
  0xea   :  { %1070 = vst [vmem:[#allocation2 + $0x18] sm:$0xff] %v423_v9  ;;  %v1680_v9 = vld [vmem:[%s7154_s7 + $0x60] sm:$0xff] }
  0xeb   :  { %4706 = vmatprep.subr.bf16.mxu1 %v4705_v4 }
  0xec   :  { %4708 = vmatpush3.bf16.msra.mxu1 %v4705_v4  ;;  %v1497_v4 = vld [vmem:[%s7152_s6 + $0x30] sm:$0xff] }
  0xee   :  { %v562_v18 = vpop.f32.mrb[2].mxu1 }
  0xef   :  { %v563_v23 = vadd.f32 %v562_v18, %v196_v12  ;;  %v564_v24 = vpop.f32.mrb[3].mxu1  ;;  %v6049_v12 = vld [vmem:[%s7153_s16 + $0x10] sm:$0x3f]  ;;  %v4709_v18 = vpack.c.bf16 %v1681_v10, %v1680_v9 }
  0xf0   :  { %v565_v27 = vadd.f32 %v564_v24, %v200_v17  ;;  %v244_v19 = vrot.slane %v6049_v12, %v5965_v55  ;;  %v248_v22 = vrot.slane %v6049_v12, %v5973_v59 }
  0xf1   :  { %1076 = vst [vmem:[#allocation2 + $0x30] sm:$0xff] %v563_v23  ;;  %4710 = vmatprep.subr.bf16.mxu1 %v4709_v18 }
  0xf2   :  { %1078 = vst [vmem:[#allocation2 + $0x38] sm:$0xff] %v565_v27  ;;  %4712 = vmatpush3.bf16.msra.mxu1 %v4709_v18  ;;  %v6058_v27 = vld [vmem:[%s7155_s3] ss:$0 sm:$0xff] }
  0xf3   :  { %v349_v13 = vpop.f32.mrb[0].mxu0 }
  0xf4   :  { %v350_v15 = vadd.f32 %v349_v13, %v172_v62  ;;  %v351_v16 = vpop.f32.mrb[1].mxu0 }
  0xf5   :  { %v352_v17 = vadd.f32 %v351_v16, %v176_v2  ;;  %v1499_v16 = vld [vmem:[%s7152_s6 + $0x40] sm:$0xff] }
  0xf6   :  { %v704_v20 = vpop.f32.mrb[4].mxu1  ;;  %1064 = vst [vmem:[#allocation2] sm:$0xff] %v350_v15 }
  0xf7   :  { %v705_v35 = vadd.f32 %v704_v20, %v212_v30  ;;  %v706_v36 = vpop.f32.mrb[5].mxu1  ;;  %1066 = vst [vmem:[#allocation2 + $0x8] sm:$0xff] %v352_v17  ;;  %v1500_v17 = vld [vmem:[%s7152_s6 + $0x48] sm:$0xff] }
  0xf8   :  { %v707_v39 = vadd.f32 %v706_v36, %v216_v33 }
  0xf9   :  { %1084 = vst [vmem:[#allocation2 + $0x50] sm:$0xff] %v705_v35 }
  0xfa   :  { %1086 = vst [vmem:[#allocation2 + $0x58] sm:$0xff] %v707_v39  ;;  %v1495_v39 = vld [vmem:[%s7152_s6 + $0x20] sm:$0xff] }
  0xfe   :  { %v846_v63 = vpop.f32.mrb[6].mxu1 }
  0xff   :  { %v847_v7 = vadd.f32 %v846_v63, %v228_v43  ;;  %v848_v8 = vpop.f32.mrb[7].mxu1  ;;  %v4661_v63 = vpack.c.bf16 %v1496_v42, %v1495_v39 }
 0x100   :  { %v849_v11 = vadd.f32 %v848_v8, %v232_v51 }
 0x101   :  { %1092 = vst [vmem:[#allocation2 + $0x70] sm:$0xff] %v847_v7  ;;  %v1498_v7 = vld [vmem:[%s7152_s6 + $0x38] sm:$0xff] }
 0x102   :  { %1094 = vst [vmem:[#allocation2 + $0x78] sm:$0xff] %v849_v11  ;;  %v4665_v13 = vpack.c.bf16 %v1498_v7, %v1497_v4  ;;  %v1506_v4 = vld [vmem:[%s7152_s6 + $0x78] sm:$0xff] }
 0x106   :  { %v988_v23 = vpop.f32.mrb[8].mxu1  ;;  %v491_v7 = vpop.f32.mrb[2].mxu0 }
 0x107   :  { %v989_v24 = vadd.f32 %v988_v23, %v244_v19  ;;  %v990_v25 = vpop.f32.mrb[9].mxu1 }
 0x108   :  { %v991_v26 = vadd.f32 %v990_v25, %v248_v22  ;;  %v4669_v25 = vpack.c.bf16 %v1500_v17, %v1499_v16 }
 0x109   :  { %1100 = vst [vmem:[#allocation2 + $0x90] sm:$0xff] %v989_v24 }
 0x10a   :  { %1102 = vst [vmem:[#allocation2 + $0x98] sm:$0xff] %v991_v26 }
 0x126   :  { %v3975_v55 = vpop.f32.mrb[10].mxu1 }
 0x127   :  { %v1234_v29 = vadd.f32 %v3975_v55, %v6058_v27  ;;  %v1228_v30 = vpop.f32.mrb[11].mxu1  ;;  %v1501_v55 = vld [vmem:[%s7152_s6 + $0x50] sm:$0xff] }
 0x128   :  { %v1229_v59 = vadd.f32 %v6058_v27, %v1228_v30  ;;  %v6102_v30 = vsub.s32 4, %v5962_v54 }
 0x129   :  { %v1308_v34 = vmax.f32 %v1234_v29, 0.0  ;;  %v1502_v29 = vld [vmem:[%s7152_s6 + $0x58] sm:$0xff] }
 0x12a   :  { %v1307_v33 = vmax.f32 %v1229_v59, 0.0  ;;  %v3978_v20 = vpop.f32.mrb[12].mxu1  ;;  %v188_v54 = vrot.slane %v5970_v58, %v6102_v30 }
 0x12b   :  { %v1244_v35 = vadd.f32 %v3978_v20, %v6058_v27  ;;  %v1238_v36 = vpop.f32.mrb[13].mxu1 }
 0x12c   :  { %v1239_v38 = vadd.f32 %v6058_v27, %v1238_v36  ;;  %4029 = vmatprep.mubr.f32.mxu0 %v1307_v33 }
 0x12d   :  { %4030 = vmatmul.mubr.f32.vlgmr.msra.gmra.mrb[12].mxu0 %v1308_v34  ;;  %v1310_v47 = vmax.f32 %v1244_v35, 0.0  ;;  %v4673_v35 = vpack.c.bf16 %v1502_v29, %v1501_v55  ;;  %v220_v55 = vrot.slane %v6004_v28, %v6102_v30  ;;  %v224_v29 = vrot.slane %v6004_v28, %v6105_v32 }
 0x12e   :  { %v1309_v43 = vmax.f32 %v1239_v38, 0.0  ;;  %4656 = vmatpush3.bf16.msra.mxu0 %v5959_v50  ;;  %v3981_v46 = vpop.f32.mrb[14].mxu1  ;;  %v1504_v38 = vld [vmem:[%s7152_s6 + $0x68] sm:$0xff] }
 0x12f   :  { %v1254_v51 = vadd.f32 %v3981_v46, %v6058_v27  ;;  %v1248_v62 = vpop.f32.mrb[15].mxu1  ;;  %4658 = vmatprep.subr.bf16.mxu0 %v4657_v37 }
 0x130   :  { %v1249_v2 = vadd.f32 %v6058_v27, %v1248_v62  ;;  %4032 = vmatprep.mubr.f32.mxu0 %v1309_v43  ;;  %v192_v43 = vrot.slane %v5970_v58, %v6105_v32  ;;  %v492_v58 = vadd.f32 %v491_v7, %v188_v54 }
 0x131   :  { %4033 = vmatmul.mubr.f32.gmra.mrb[14].mxu0 %v1310_v47  ;;  %v1312_v9 = vmax.f32 %v1254_v51, 0.0 }
 0x132   :  { %v1311_v50 = vmax.f32 %v1249_v2, 0.0  ;;  %4660 = vmatpush3.bf16.msra.mxu0 %v4657_v37  ;;  %v3984_v8 = vpop.f32.mrb[16].mxu1  ;;  %v1503_v37 = vld [vmem:[%s7152_s6 + $0x60] sm:$0xff]  ;;  %v1505_v2 = vld [vmem:[%s7152_s6 + $0x70] sm:$0xff]  ;;  %1072 = vst [vmem:[#allocation2 + $0x20] sm:$0xff] %v492_v58 }
 0x133   :  { %v1264_v10 = vadd.f32 %v3984_v8, %v6058_v27  ;;  %v1258_v11 = vpop.f32.mrb[17].mxu1  ;;  %4662 = vmatprep.subr.bf16.mxu0 %v4661_v63  ;;  %v4677_v62 = vpack.c.bf16 %v1504_v38, %v1503_v37  ;;  %v4681_v16 = vpack.c.bf16 %v1506_v4, %v1505_v2  ;;  %v1854_v37 = vld [vmem:[%s7156_s9 + $0x10] sm:$0xff]  ;;  %v1855_v38 = vld [vmem:[%s7156_s9 + $0x18] sm:$0xff] }
 0x134   :  { %v1259_v15 = vadd.f32 %v6058_v27, %v1258_v11  ;;  %4035 = vmatprep.mubr.f32.mxu0 %v1311_v50  ;;  %v493_v50 = vpop.f32.mrb[3].mxu0 }
 0x135   :  { %4036 = vmatmul.mubr.f32.gmra.mrb[16].mxu0 %v1312_v9  ;;  %v1314_v22 = vmax.f32 %v1264_v10, 0.0  ;;  %v494_v10 = vadd.f32 %v493_v50, %v192_v43 }
 0x136   :  { %v1313_v18 = vmax.f32 %v1259_v15, 0.0  ;;  %4664 = vmatpush3.bf16.msra.mxu0 %v4661_v63  ;;  %v3987_v19 = vpop.f32.mrb[18].mxu1 }
 0x137   :  { %v1274_v23 = vadd.f32 %v3987_v19, %v6058_v27  ;;  %v1268_v24 = vpop.f32.mrb[19].mxu1  ;;  %4666 = vmatprep.subr.bf16.mxu0 %v4665_v13  ;;  %1074 = vst [vmem:[#allocation2 + $0x28] sm:$0xff] %v494_v10  ;;  %v1858_v10 = vld [vmem:[%s7156_s9 + $0x30] sm:$0xff] }
 0x138   :  { %v1269_v26 = vadd.f32 %v6058_v27, %v1268_v24  ;;  %4038 = vmatprep.mubr.f32.mxu0 %v1313_v18  ;;  %v204_v18 = vrot.slane %v6004_v28, %v6023_v40  ;;  %v633_v24 = vpop.f32.mrb[4].mxu0 }
 0x139   :  { %4039 = vmatmul.mubr.f32.gmra.mrb[18].mxu0 %v1314_v22  ;;  %v1316_v33 = vmax.f32 %v1274_v23, 0.0  ;;  %v208_v22 = vrot.slane %v6004_v28, %v6026_v41 }
 0x13a   :  { %v1315_v59 = vmax.f32 %v1269_v26, 0.0  ;;  %4668 = vmatpush3.bf16.msra.mxu0 %v4665_v13  ;;  %v3990_v31 = vpop.f32.mrb[20].mxu1  ;;  %v635_v26 = vpop.f32.mrb[5].mxu0 }
 0x13b   :  { %v1284_v20 = vadd.f32 %v3990_v31, %v6058_v27  ;;  %v1278_v34 = vpop.f32.mrb[21].mxu1  ;;  %4670 = vmatprep.subr.bf16.mxu0 %v4669_v25 }
 0x13c   :  { %v1279_v36 = vadd.f32 %v6058_v27, %v1278_v34  ;;  %4041 = vmatprep.mubr.f32.mxu0 %v1315_v59  ;;  %v775_v59 = vpop.f32.mrb[6].mxu0 }
 0x13d   :  { %4042 = vmatmul.mubr.f32.gmra.mrb[20].mxu0 %v1316_v33  ;;  %v1318_v46 = vmax.f32 %v1284_v20, 0.0  ;;  %v776_v31 = vadd.f32 %v775_v59, %v220_v55  ;;  %v777_v33 = vpop.f32.mrb[7].mxu0 }
 0x13e   :  { %v1317_v39 = vmax.f32 %v1279_v36, 0.0  ;;  %4672 = vmatpush3.bf16.msra.mxu0 %v4669_v25  ;;  %v3993_v42 = vpop.f32.mrb[22].mxu1  ;;  %v634_v25 = vadd.f32 %v633_v24, %v204_v18  ;;  %v1861_v24 = vld [vmem:[%s7156_s9 + $0x48] sm:$0xff] }
 0x13f   :  { %v1294_v47 = vadd.f32 %v3993_v42, %v6058_v27  ;;  %v1288_v51 = vpop.f32.mrb[23].mxu1  ;;  %4674 = vmatprep.subr.bf16.mxu0 %v4673_v35  ;;  %1088 = vst [vmem:[#allocation2 + $0x60] sm:$0xff] %v776_v31  ;;  %v917_v28 = vpop.f32.mrb[8].mxu0 }
 0x140   :  { %v1289_v63 = vadd.f32 %v6058_v27, %v1288_v51  ;;  %4044 = vmatprep.mubr.f32.mxu0 %v1317_v39  ;;  %1080 = vst [vmem:[#allocation2 + $0x40] sm:$0xff] %v634_v25  ;;  %v919_v20 = vpop.f32.mrb[9].mxu0 }
 0x141   :  { %4045 = vmatmul.mubr.f32.gmra.mrb[22].mxu0 %v1318_v46  ;;  %v1320_v11 = vmax.f32 %v1294_v47, 0.0  ;;  %v4721_v47 = vpack.c.bf16 %v1855_v38, %v1854_v37 }
 0x142   :  { %v1319_v8 = vmax.f32 %v1289_v63, 0.0  ;;  %4676 = vmatpush3.bf16.msra.mxu0 %v4673_v35  ;;  %v3996_v9 = vpop.f32.mrb[24].mxu1  ;;  %v1857_v63 = vld [vmem:[%s7156_s9 + $0x28] sm:$0xff] }
 0x143   :  { %v1304_v13 = vadd.f32 %v3996_v9, %v6058_v27  ;;  %v1298_v15 = vpop.f32.mrb[25].mxu1  ;;  %4678 = vmatprep.subr.bf16.mxu0 %v4677_v62 }
 0x144   :  { %v1299_v17 = vadd.f32 %v6058_v27, %v1298_v15  ;;  %4047 = vmatprep.mubr.f32.mxu0 %v1319_v8  ;;  %v636_v27 = vadd.f32 %v635_v26, %v208_v22 }
 0x145   :  { %4048 = vmatmul.mubr.f32.gmra.mrb[24].mxu0 %v1320_v11  ;;  %v1322_v23 = vmax.f32 %v1304_v13, 0.0  ;;  %v1859_v11 = vld [vmem:[%s7156_s9 + $0x38] sm:$0xff] }
 0x146   :  { %v1321_v19 = vmax.f32 %v1299_v17, 0.0  ;;  %4680 = vmatpush3.bf16.msra.mxu0 %v4677_v62  ;;  %1082 = vst [vmem:[#allocation2 + $0x48] sm:$0xff] %v636_v27  ;;  %v1856_v62 = vld [vmem:[%s7156_s9 + $0x20] sm:$0xff] }
 0x147   :  { %4682 = vmatprep.subr.bf16.mxu0 %v4681_v16  ;;  %v4725_v8 = vpack.c.bf16 %v1857_v63, %v1856_v62  ;;  %v2053_v62 = vld [vmem:[%s7158_s11 + $0x8] sm:$0xff]  ;;  %v2054_v63 = vld [vmem:[%s7158_s11 + $0x10] sm:$0xff] }
 0x148   :  { %4050 = vmatprep.mubr.f32.mxu0 %v1321_v19  ;;  %v1059_v34 = vpop.f32.mrb[10].mxu0  ;;  %v4729_v19 = vpack.c.bf16 %v1859_v11, %v1858_v10  ;;  %v2058_v11 = vld [vmem:[%s7158_s11 + $0x30] sm:$0xff] }
 0x149   :  { %4051 = vmatmul.mubr.f32.gmra.mrb[26].mxu0 %v1322_v23  ;;  %v1061_v35 = vpop.f32.mrb[11].mxu0  ;;  %v1860_v23 = vld [vmem:[%s7156_s9 + $0x40] sm:$0xff] }
 0x14a   :  { %4684 = vmatpush3.bf16.msra.mxu0 %v4681_v16  ;;  %4085 = vmatprep.mubr.f32.mxu0 %v5643_v21  ;;  %v778_v21 = vadd.f32 %v777_v33, %v224_v29  ;;  %v4733_v59 = vpack.c.bf16 %v1861_v24, %v1860_v23  ;;  %v1862_v33 = vld [vmem:[%s7156_s9 + $0x50] sm:$0xff]  ;;  %v2063_v24 = vld [vmem:[%s7158_s11 + $0x58] sm:$0xff] }
 0x14b   :  { %v2062_v23 = vld [vmem:[%s7158_s11 + $0x50] sm:$0xff] }
 0x14c   :  { %1090 = vst [vmem:[#allocation2 + $0x68] sm:$0xff] %v778_v21  ;;  %v1863_v21 = vld [vmem:[%s7156_s9 + $0x58] sm:$0xff] }
 0x14d   :  { %4086 = vmatmul.mubr.f32.vlgmr.msra.gmra.mrb[12].mxu0 %v5696_v44  ;;  %v236_v44 = vrot.slane %v6049_v12, %v6023_v40 }
 0x14e   :  { %4088 = vmatprep.mubr.f32.mxu0 %v5701_v45  ;;  %v240_v45 = vrot.slane %v6049_v12, %v6026_v41 }
 0x151   :  { %4089 = vmatmul.mubr.f32.gmra.mrb[14].mxu0 %v5708_v48  ;;  %v918_v48 = vadd.f32 %v917_v28, %v236_v44 }
 0x152   :  { %4091 = vmatprep.mubr.f32.mxu0 %v5713_v49  ;;  %v920_v49 = vadd.f32 %v919_v20, %v240_v45 }
 0x153   :  { %1096 = vst [vmem:[#allocation2 + $0x80] sm:$0xff] %v918_v48 }
 0x154   :  { %1098 = vst [vmem:[#allocation2 + $0x88] sm:$0xff] %v920_v49  ;;  %v4737_v49 = vpack.c.bf16 %v1863_v21, %v1862_v33 }
 0x155   :  { %4092 = vmatmul.mubr.f32.gmra.mrb[16].mxu0 %v5720_v52  ;;  %v252_v52 = vrot.slane %v6049_v12, %v6102_v30 }
 0x156   :  { %4094 = vmatprep.mubr.f32.mxu0 %v5725_v53  ;;  %v256_v53 = vrot.slane %v6049_v12, %v6105_v32 }
 0x159   :  { %4095 = vmatmul.mubr.f32.gmra.mrb[18].mxu0 %v5732_v56  ;;  %v1060_v56 = vadd.f32 %v1059_v34, %v252_v52  ;;  %v1865_v34 = vld [vmem:[%s7156_s9 + $0x68] sm:$0xff] }
 0x15a   :  { %4097 = vmatprep.mubr.f32.mxu0 %v5737_v57  ;;  %v1062_v57 = vadd.f32 %v1061_v35, %v256_v53  ;;  %v1864_v53 = vld [vmem:[%s7156_s9 + $0x60] sm:$0xff] }
 0x15b   :  { %1104 = vst [vmem:[#allocation2 + $0xa0] sm:$0xff] %v1060_v56 }
 0x15c   :  { %1106 = vst [vmem:[#allocation2 + $0xa8] sm:$0xff] %v1062_v57 }
 0x15d   :  { %4098 = vmatmul.mubr.f32.gmra.mrb[20].mxu0 %v5744_v60  ;;  %v1682_v60 = vld [vmem:[%s7154_s7 + $0x70] sm:$0xff] }
 0x15e   :  { %4100 = vmatprep.mubr.f32.mxu0 %v5749_v61  ;;  %v1683_v61 = vld [vmem:[%s7154_s7 + $0x78] sm:$0xff] }
 0x161   :  { %4101 = vmatmul.mubr.f32.gmra.mrb[22].mxu0 %v5756_v0  ;;  %v4713_v0 = vpack.c.bf16 %v1683_v61, %v1682_v60 }
 0x162   :  { %4103 = vmatprep.mubr.f32.mxu0 %v5761_v1  ;;  %v1852_v1 = vld [vmem:[%s7156_s9] sm:$0xff] }
 0x163   :  { %4714 = vmatprep.subr.bf16.mxu1 %v4713_v0 }
 0x164   :  { %4716 = vmatpush3.bf16.msra.mxu1 %v4713_v0  ;;  %v4741_v0 = vpack.c.bf16 %v1865_v34, %v1864_v53 }
 0x165   :  { %4104 = vmatmul.mubr.f32.gmra.mrb[24].mxu0 %v5768_v5  ;;  %v1853_v5 = vld [vmem:[%s7156_s9 + $0x8] sm:$0xff] }
 0x166   :  { %4106 = vmatprep.mubr.f32.mxu0 %v5773_v6  ;;  %v4717_v6 = vpack.c.bf16 %v1853_v5, %v1852_v1 }
 0x168   :  { %4718 = vmatprep.subr.bf16.mxu1 %v4717_v6 }
 0x169   :  { %4107 = vmatmul.mubr.f32.gmra.mrb[26].mxu0 %v5792_v14  ;;  %v6176_v14 = vld [vmem:[%s7157_s5] ss:$0 sm:$0xff] }
 0x220   :  { %v4087_v12 = vpop.f32.mrb[12].mxu0 }
 0x221   :  { %v6179_v30 = vadd.f32 %v4087_v12, %v6176_v14  ;;  %v1573_v32 = vpop.f32.mrb[13].mxu0 }
 0x222   :  { %v6182_v36 = vadd.f32 %v6176_v14, %v1573_v32 }
 0x223   :  { %v1653_v42 = vmax.f32 %v6179_v30, 0.0 }
 0x224   :  { %v1652_v54 = vmax.f32 %v6182_v36, 0.0  ;;  %v4090_v39 = vpop.f32.mrb[14].mxu0 }
 0x225   :  { %v6193_v43 = vadd.f32 %v4090_v39, %v6176_v14  ;;  %v1583_v46 = vpop.f32.mrb[15].mxu0 }
 0x226   :  { %v6196_v51 = vadd.f32 %v6176_v14, %v1583_v46  ;;  %4141 = vmatprep.mubr.f32.mxu1 %v1652_v54  ;;  %v1867_v46 = vld [vmem:[%s7156_s9 + $0x78] sm:$0xff] }
 0x227   :  { %4142 = vmatmul.mubr.f32.vlgmr.msra.gmra.mrb[26].mxu1 %v1653_v42  ;;  %v1655_v7 = vmax.f32 %v6193_v43, 0.0  ;;  %v1866_v42 = vld [vmem:[%s7156_s9 + $0x70] sm:$0xff] }
 0x228   :  { %v1654_v2 = vmax.f32 %v6196_v51, 0.0  ;;  %v4093_v4 = vpop.f32.mrb[16].mxu0  ;;  %4720 = vmatpush3.bf16.msra.mxu1 %v4717_v6 }
 0x229   :  { %v6207_v58 = vadd.f32 %v4093_v4, %v6176_v14  ;;  %v1593_v50 = vpop.f32.mrb[17].mxu0  ;;  %4722 = vmatprep.subr.bf16.mxu1 %v4721_v47  ;;  %v2055_v4 = vld [vmem:[%s7158_s11 + $0x18] sm:$0xff] }
 0x22a   :  { %v6210_v9 = vadd.f32 %v6176_v14, %v1593_v50  ;;  %4144 = vmatprep.mubr.f32.mxu1 %v1654_v2  ;;  %v2056_v50 = vld [vmem:[%s7158_s11 + $0x20] sm:$0xff] }
 0x22b   :  { %4145 = vmatmul.mubr.f32.gmra.mrb[28].mxu1 %v1655_v7  ;;  %v1657_v16 = vmax.f32 %v6207_v58, 0.0  ;;  %v4753_v7 = vpack.c.bf16 %v2055_v4, %v2054_v63 }
 0x22c   :  { %v1656_v13 = vmax.f32 %v6210_v9, 0.0  ;;  %v4096_v15 = vpop.f32.mrb[18].mxu0  ;;  %4724 = vmatpush3.bf16.msra.mxu1 %v4721_v47  ;;  %v4745_v47 = vpack.c.bf16 %v1867_v46, %v1866_v42 }
 0x22d   :  { %v6221_v17 = vadd.f32 %v4096_v15, %v6176_v14  ;;  %v1603_v18 = vpop.f32.mrb[19].mxu0  ;;  %4726 = vmatprep.subr.bf16.mxu1 %v4725_v8 }
 0x22e   :  { %v6224_v22 = vadd.f32 %v6176_v14, %v1603_v18  ;;  %4147 = vmatprep.mubr.f32.mxu1 %v1656_v13  ;;  %v2059_v13 = vld [vmem:[%s7158_s11 + $0x38] sm:$0xff]  ;;  %v2061_v18 = vld [vmem:[%s7158_s11 + $0x48] sm:$0xff] }
 0x22f   :  { %4148 = vmatmul.mubr.f32.gmra.mrb[30].mxu1 %v1657_v16  ;;  %v1659_v27 = vmax.f32 %v6221_v17, 0.0  ;;  %v4761_v15 = vpack.c.bf16 %v2059_v13, %v2058_v11  ;;  %v2060_v16 = vld [vmem:[%s7158_s11 + $0x40] sm:$0xff] }
 0x230   :  { %v1658_v25 = vmax.f32 %v6224_v22, 0.0  ;;  %v4099_v26 = vpop.f32.mrb[20].mxu0  ;;  %4728 = vmatpush3.bf16.msra.mxu1 %v4725_v8  ;;  %v2057_v8 = vld [vmem:[%s7158_s11 + $0x28] sm:$0xff] }
 0x231   :  { %v6235_v55 = vadd.f32 %v4099_v26, %v6176_v14  ;;  %v1613_v29 = vpop.f32.mrb[21].mxu0  ;;  %4730 = vmatprep.subr.bf16.mxu1 %v4729_v19  ;;  %v4757_v10 = vpack.c.bf16 %v2057_v8, %v2056_v50  ;;  %v3598_v26 = vld [vmem:[%s7159_s8] ss:$0 sm:$0xff] }
 0x232   :  { %v6238_v31 = vadd.f32 %v6176_v14, %v1613_v29  ;;  %4150 = vmatprep.mubr.f32.mxu1 %v1658_v25  ;;  %v4769_v25 = vpack.c.bf16 %v2063_v24, %v2062_v23 }
 0x233   :  { %4151 = vmatmul.mubr.f32.gmra.mrb[32].mxu1 %v1659_v27  ;;  %v1661_v28 = vmax.f32 %v6235_v55, 0.0 }
 0x234   :  { %v1660_v44 = vmax.f32 %v6238_v31, 0.0  ;;  %v4102_v45 = vpop.f32.mrb[22].mxu0  ;;  %4732 = vmatpush3.bf16.msra.mxu1 %v4729_v19  ;;  %v4765_v19 = vpack.c.bf16 %v2061_v18, %v2060_v16 }
 0x235   :  { %v6249_v48 = vadd.f32 %v4102_v45, %v6176_v14  ;;  %v1623_v20 = vpop.f32.mrb[23].mxu0  ;;  %4734 = vmatprep.subr.bf16.mxu1 %v4733_v59 }
 0x236   :  { %v6252_v52 = vadd.f32 %v6176_v14, %v1623_v20  ;;  %4153 = vmatprep.mubr.f32.mxu1 %v1660_v44 }
 0x237   :  { %4154 = vmatmul.mubr.f32.gmra.mrb[34].mxu1 %v1661_v28  ;;  %v1663_v57 = vmax.f32 %v6249_v48, 0.0 }
 0x238   :  { %v1662_v56 = vmax.f32 %v6252_v52, 0.0  ;;  %v4105_v35 = vpop.f32.mrb[24].mxu0  ;;  %4736 = vmatpush3.bf16.msra.mxu1 %v4733_v59 }
 0x239   :  { %v6263_v60 = vadd.f32 %v4105_v35, %v6176_v14  ;;  %v1633_v61 = vpop.f32.mrb[25].mxu0  ;;  %4738 = vmatprep.subr.bf16.mxu1 %v4737_v49 }
 0x23a   :  { %v6266_v1 = vadd.f32 %v6176_v14, %v1633_v61  ;;  %4156 = vmatprep.mubr.f32.mxu1 %v1662_v56 }
 0x23b   :  { %4157 = vmatmul.mubr.f32.gmra.mrb[36].mxu1 %v1663_v57  ;;  %v1665_v12 = vmax.f32 %v6263_v60, 0.0 }
 0x23c   :  { %v1664_v5 = vmax.f32 %v6266_v1, 0.0  ;;  %v4108_v6 = vpop.f32.mrb[26].mxu0  ;;  %4740 = vmatpush3.bf16.msra.mxu1 %v4737_v49 }
 0x23d   :  { %v6271_v32 = vadd.f32 %v4108_v6, %v6176_v14  ;;  %v1643_v37 = vpop.f32.mrb[27].mxu0  ;;  %4742 = vmatprep.subr.bf16.mxu1 %v4741_v0 }
 0x23e   :  { %v6274_v38 = vadd.f32 %v6176_v14, %v1643_v37  ;;  %4159 = vmatprep.mubr.f32.mxu1 %v1664_v5  ;;  %v2052_v14 = vld [vmem:[%s7158_s11] sm:$0xff] }
 0x23f   :  { %4160 = vmatmul.mubr.f32.gmra.mrb[38].mxu1 %v1665_v12  ;;  %v1667_v39 = vmax.f32 %v6271_v32, 0.0  ;;  %v4749_v2 = vpack.c.bf16 %v2053_v62, %v2052_v14 }
 0x240   :  { %v1666_v54 = vmax.f32 %v6274_v38, 0.0  ;;  %4744 = vmatpush3.bf16.msra.mxu1 %v4741_v0 }
 0x241   :  { %4746 = vmatprep.subr.bf16.mxu1 %v4745_v47  ;;  %4750 = vmatprep.subr.bf16.mxu0 %v4749_v2 }
 0x242   :  { %4162 = vmatprep.mubr.f32.mxu1 %v1666_v54  ;;  %4752 = vmatpush3.bf16.msra.mxu0 %v4749_v2 }
 0x243   :  { %4163 = vmatmul.mubr.f32.gmra.mrb[40].mxu1 %v1667_v39  ;;  %4754 = vmatprep.subr.bf16.mxu0 %v4753_v7 }
 0x244   :  { %4748 = vmatpush3.bf16.msra.mxu1 %v4745_v47 }
 0x246   :  { %4756 = vmatpush3.bf16.msra.mxu0 %v4753_v7 }
 0x247   :  { %4758 = vmatprep.subr.bf16.mxu0 %v4757_v10 }
 0x24a   :  { %4760 = vmatpush3.bf16.msra.mxu0 %v4757_v10 }
 0x24b   :  { %4762 = vmatprep.subr.bf16.mxu0 %v4761_v15 }
 0x24e   :  { %4764 = vmatpush3.bf16.msra.mxu0 %v4761_v15 }
 0x24f   :  { %4766 = vmatprep.subr.bf16.mxu0 %v4765_v19 }
 0x252   :  { %4768 = vmatpush3.bf16.msra.mxu0 %v4765_v19 }
 0x253   :  { %4770 = vmatprep.subr.bf16.mxu0 %v4769_v25 }
 0x256   :  { %4772 = vmatpush3.bf16.msra.mxu0 %v4769_v25 }
 0x2fa   :  { %v4143_v27 = vpop.f32.mrb[26].mxu1 }
 0x2fb   :  { %v1763_v29 = vadd.f32 %v4143_v27, %v3598_v26  ;;  %v1757_v59 = vpop.f32.mrb[27].mxu1 }
 0x2fc   :  { %v1758_v33 = vadd.f32 %v3598_v26, %v1757_v59 }
 0x2fd   :  { %v1837_v45 = vmax.f32 %v1763_v29, 0.0 }
 0x2fe   :  { %v1836_v21 = vmax.f32 %v1758_v33, 0.0  ;;  %v4146_v44 = vpop.f32.mrb[28].mxu1 }
 0x2ff   :  { %v1773_v28 = vadd.f32 %v4146_v44, %v3598_v26  ;;  %v1767_v20 = vpop.f32.mrb[29].mxu1  ;;  %v2065_v44 = vld [vmem:[%s7158_s11 + $0x68] sm:$0xff] }
 0x300   :  { %v1768_v49 = vadd.f32 %v3598_v26, %v1767_v20  ;;  %4197 = vmatprep.mubr.f32.mxu1 %v1836_v21  ;;  %v2064_v21 = vld [vmem:[%s7158_s11 + $0x60] sm:$0xff] }
 0x301   :  { %4198 = vmatmul.mubr.f32.vlgmr.msra.gmra.mrb[42].mxu1 %v1837_v45  ;;  %v1839_v56 = vmax.f32 %v1773_v28, 0.0  ;;  %v4773_v45 = vpack.c.bf16 %v2065_v44, %v2064_v21  ;;  %v2067_v28 = vld [vmem:[%s7158_s11 + $0x78] sm:$0xff] }
 0x302   :  { %v1838_v53 = vmax.f32 %v1768_v49, 0.0  ;;  %v4149_v34 = vpop.f32.mrb[30].mxu1  ;;  %v2236_v49 = vld [vmem:[%s7160_s13] sm:$0xff] }
 0x303   :  { %v1783_v35 = vadd.f32 %v4149_v34, %v3598_v26  ;;  %v1777_v57 = vpop.f32.mrb[31].mxu1  ;;  %4774 = vmatprep.subr.bf16.mxu0 %v4773_v45  ;;  %v2238_v34 = vld [vmem:[%s7160_s13 + $0x10] sm:$0xff] }
 0x304   :  { %v1778_v61 = vadd.f32 %v3598_v26, %v1777_v57  ;;  %4200 = vmatprep.mubr.f32.mxu1 %v1838_v53  ;;  %4776 = vmatpush3.bf16.msra.mxu0 %v4773_v45  ;;  %v2237_v53 = vld [vmem:[%s7160_s13 + $0x8] sm:$0xff] }
 0x305   :  { %4201 = vmatmul.mubr.f32.gmra.mrb[44].mxu1 %v1839_v56  ;;  %v1841_v6 = vmax.f32 %v1783_v35, 0.0  ;;  %v4781_v56 = vpack.c.bf16 %v2237_v53, %v2236_v49  ;;  %v2239_v35 = vld [vmem:[%s7160_s13 + $0x18] sm:$0xff] }
 0x306   :  { %v1840_v0 = vmax.f32 %v1778_v61, 0.0  ;;  %v4152_v5 = vpop.f32.mrb[32].mxu1  ;;  %v6347_v57 = vpack.c.bf16 %v2239_v35, %v2238_v34  ;;  %v2240_v61 = vld [vmem:[%s7160_s13 + $0x20] sm:$0xff] }
 0x307   :  { %v1793_v12 = vadd.f32 %v4152_v5, %v3598_v26  ;;  %v1787_v37 = vpop.f32.mrb[33].mxu1  ;;  %5005 = vmatprep.subr.bf16.mxu1 %v4781_v56 }
 0x308   :  { %v1788_v54 = vadd.f32 %v3598_v26, %v1787_v37  ;;  %4203 = vmatprep.mubr.f32.mxu1 %v1840_v0  ;;  %v2241_v0 = vld [vmem:[%s7160_s13 + $0x28] sm:$0xff]  ;;  %5013 = vmatpush3.bf16.msra.mxu1 %v4781_v56 }
 0x309   :  { %4204 = vmatmul.mubr.f32.gmra.mrb[46].mxu1 %v1841_v6  ;;  %v1843_v46 = vmax.f32 %v1793_v12, 0.0  ;;  %5006 = vmatprep.subr.bf16.mxu1 %v6347_v57  ;;  %v6356_v5 = vpack.c.bf16 %v2241_v0, %v2240_v61  ;;  %v2242_v6 = vld [vmem:[%s7160_s13 + $0x30] sm:$0xff]  ;;  %v2243_v12 = vld [vmem:[%s7160_s13 + $0x38] sm:$0xff] }
 0x30a   :  { %v1842_v39 = vmax.f32 %v1788_v54, 0.0  ;;  %v4155_v42 = vpop.f32.mrb[34].mxu1  ;;  %v6366_v37 = vpack.c.bf16 %v2243_v12, %v2242_v6  ;;  %v2244_v54 = vld [vmem:[%s7160_s13 + $0x40] sm:$0xff] }
 0x30b   :  { %v1803_v47 = vadd.f32 %v4155_v42, %v3598_v26  ;;  %v1797_v14 = vpop.f32.mrb[35].mxu1 }
 0x30c   :  { %v1798_v62 = vadd.f32 %v3598_v26, %v1797_v14  ;;  %4206 = vmatprep.mubr.f32.mxu1 %v1842_v39  ;;  %5014 = vmatpush3.bf16.msra.mxu1 %v6347_v57  ;;  %v2245_v39 = vld [vmem:[%s7160_s13 + $0x48] sm:$0xff] }
 0x30d   :  { %4207 = vmatmul.mubr.f32.gmra.mrb[48].mxu1 %v1843_v46  ;;  %v1845_v4 = vmax.f32 %v1803_v47, 0.0  ;;  %5007 = vmatprep.subr.bf16.mxu1 %v6356_v5  ;;  %v6376_v42 = vpack.c.bf16 %v2245_v39, %v2244_v54  ;;  %v2246_v46 = vld [vmem:[%s7160_s13 + $0x50] sm:$0xff]  ;;  %v2247_v47 = vld [vmem:[%s7160_s13 + $0x58] sm:$0xff] }
 0x30e   :  { %v1844_v63 = vmax.f32 %v1798_v62, 0.0  ;;  %v4158_v2 = vpop.f32.mrb[36].mxu1  ;;  %v6386_v14 = vpack.c.bf16 %v2247_v47, %v2246_v46  ;;  %v2248_v62 = vld [vmem:[%s7160_s13 + $0x60] sm:$0xff] }
 0x30f   :  { %v1813_v7 = vadd.f32 %v4158_v2, %v3598_v26  ;;  %v1807_v50 = vpop.f32.mrb[37].mxu1 }
 0x310   :  { %v1808_v8 = vadd.f32 %v3598_v26, %v1807_v50  ;;  %4209 = vmatprep.mubr.f32.mxu1 %v1844_v63  ;;  %5015 = vmatpush3.bf16.msra.mxu1 %v6356_v5  ;;  %v2249_v63 = vld [vmem:[%s7160_s13 + $0x68] sm:$0xff] }
 0x311   :  { %4210 = vmatmul.mubr.f32.gmra.mrb[50].mxu1 %v1845_v4  ;;  %v1847_v13 = vmax.f32 %v1813_v7, 0.0  ;;  %5008 = vmatprep.subr.bf16.mxu1 %v6366_v37  ;;  %v6396_v2 = vpack.c.bf16 %v2249_v63, %v2248_v62  ;;  %v6404_v4 = vld [vmem:[%s7161_s10] ss:$0 sm:$0xff] }
 0x312   :  { %v1846_v10 = vmax.f32 %v1808_v8, 0.0  ;;  %v4161_v11 = vpop.f32.mrb[38].mxu1 }
 0x313   :  { %v1823_v15 = vadd.f32 %v4161_v11, %v3598_v26  ;;  %v1817_v16 = vpop.f32.mrb[39].mxu1 }
 0x314   :  { %v1818_v18 = vadd.f32 %v3598_v26, %v1817_v16  ;;  %4212 = vmatprep.mubr.f32.mxu1 %v1846_v10  ;;  %5016 = vmatpush3.bf16.msra.mxu1 %v6366_v37 }
 0x315   :  { %4213 = vmatmul.mubr.f32.gmra.mrb[52].mxu1 %v1847_v13  ;;  %v1849_v24 = vmax.f32 %v1823_v15, 0.0  ;;  %5009 = vmatprep.subr.bf16.mxu1 %v6376_v42 }
 0x316   :  { %v1848_v19 = vmax.f32 %v1818_v18, 0.0  ;;  %v4164_v23 = vpop.f32.mrb[40].mxu1 }
 0x317   :  { %v1833_v25 = vadd.f32 %v4164_v23, %v3598_v26  ;;  %v1827_v27 = vpop.f32.mrb[41].mxu1 }
 0x318   :  { %v1828_v29 = vadd.f32 %v3598_v26, %v1827_v27  ;;  %4215 = vmatprep.mubr.f32.mxu1 %v1848_v19  ;;  %v2066_v26 = vld [vmem:[%s7158_s11 + $0x70] sm:$0xff]  ;;  %5017 = vmatpush3.bf16.msra.mxu1 %v6376_v42 }
 0x319   :  { %4216 = vmatmul.mubr.f32.gmra.mrb[54].mxu1 %v1849_v24  ;;  %v1851_v33 = vmax.f32 %v1833_v25, 0.0  ;;  %v4777_v20 = vpack.c.bf16 %v2067_v28, %v2066_v26  ;;  %5010 = vmatprep.subr.bf16.mxu1 %v6386_v14 }
 0x31a   :  { %v1850_v59 = vmax.f32 %v1828_v29, 0.0 }
 0x31b   :  { %4778 = vmatprep.subr.bf16.mxu0 %v4777_v20 }
 0x31c   :  { %4218 = vmatprep.mubr.f32.mxu1 %v1850_v59  ;;  %4780 = vmatpush3.bf16.msra.mxu0 %v4777_v20 }
 0x31d   :  { %4219 = vmatmul.mubr.f32.gmra.mrb[56].mxu1 %v1851_v33  ;;  %4782 = vmatprep.subr.bf16.mxu0 %v4781_v56 }
 0x31e   :  { %5018 = vmatpush3.bf16.msra.mxu1 %v6386_v14 }
 0x31f   :  { %5011 = vmatprep.subr.bf16.mxu1 %v6396_v2 }
 0x322   :  { %5019 = vmatpush3.bf16.msra.mxu1 %v6396_v2 }
 0x3d4   :  { %v4199_v7 = vpop.f32.mrb[42].mxu1 }
 0x3d5   :  { %v1947_v50 = vadd.f32 %v4199_v7, %v6404_v4  ;;  %v1941_v8 = vpop.f32.mrb[43].mxu1 }
 0x3d6   :  { %v1942_v10 = vadd.f32 %v6404_v4, %v1941_v8 }
 0x3d7   :  { %v6409_v11 = vadd.f32 %v6179_v30, %v1947_v50 }
 0x3d8   :  { %v6412_v13 = vadd.f32 %v6182_v36, %v1942_v10  ;;  %v4202_v15 = vpop.f32.mrb[44].mxu1 }
 0x3d9   :  { %v1957_v16 = vadd.f32 %v4202_v15, %v6404_v4  ;;  %v1951_v18 = vpop.f32.mrb[45].mxu1  ;;  %v2037_v24 = vmax.f32 %v6409_v11, 0.0 }
 0x3da   :  { %v1952_v19 = vadd.f32 %v6404_v4, %v1951_v18  ;;  %v2036_v23 = vmax.f32 %v6412_v13, 0.0 }
 0x3db   :  { %v6419_v25 = vadd.f32 %v6193_v43, %v1957_v16 }
 0x3dc   :  { %v6422_v27 = vadd.f32 %v6196_v51, %v1952_v19  ;;  %v4205_v30 = vpop.f32.mrb[46].mxu1  ;;  %4253 = vmatprep.mubr.f32.mxu0 %v2036_v23 }
 0x3dd   :  { %v1967_v36 = vadd.f32 %v4205_v30, %v6404_v4  ;;  %v1961_v29 = vpop.f32.mrb[47].mxu1  ;;  %4254 = vmatmul.mubr.f32.vlgmr.msra.gmra.mrb[28].mxu0 %v2037_v24  ;;  %v2039_v43 = vmax.f32 %v6419_v25, 0.0 }
 0x3de   :  { %v1962_v59 = vadd.f32 %v6404_v4, %v1961_v29  ;;  %v2038_v33 = vmax.f32 %v6422_v27, 0.0  ;;  %4784 = vmatpush3.bf16.msra.mxu0 %v4781_v56 }
 0x3df   :  { %v6428_v21 = vadd.f32 %v6207_v58, %v1967_v36  ;;  %4786 = vmatprep.subr.bf16.mxu0 %v6347_v57 }
 0x3e0   :  { %v6433_v51 = vadd.f32 %v6210_v9, %v1962_v59  ;;  %v4208_v44 = vpop.f32.mrb[48].mxu1  ;;  %4256 = vmatprep.mubr.f32.mxu0 %v2038_v33 }
 0x3e1   :  { %v1977_v45 = vadd.f32 %v4208_v44, %v6404_v4  ;;  %v1971_v26 = vpop.f32.mrb[49].mxu1  ;;  %4257 = vmatmul.mubr.f32.gmra.mrb[30].mxu0 %v2039_v43  ;;  %v2041_v49 = vmax.f32 %v6428_v21, 0.0 }
 0x3e2   :  { %v1972_v28 = vadd.f32 %v6404_v4, %v1971_v26  ;;  %v2040_v20 = vmax.f32 %v6433_v51, 0.0  ;;  %4788 = vmatpush3.bf16.msra.mxu0 %v6347_v57 }
 0x3e3   :  { %v6440_v58 = vadd.f32 %v6221_v17, %v1977_v45  ;;  %4790 = vmatprep.subr.bf16.mxu0 %v6356_v5 }
 0x3e4   :  { %v6445_v9 = vadd.f32 %v6224_v22, %v1972_v28  ;;  %v4211_v53 = vpop.f32.mrb[50].mxu1  ;;  %4259 = vmatprep.mubr.f32.mxu0 %v2040_v20 }
 0x3e5   :  { %v1987_v34 = vadd.f32 %v4211_v53, %v6404_v4  ;;  %v1981_v56 = vpop.f32.mrb[51].mxu1  ;;  %4260 = vmatmul.mubr.f32.gmra.mrb[32].mxu0 %v2041_v49  ;;  %v2043_v61 = vmax.f32 %v6440_v58, 0.0 }
 0x3e6   :  { %v1982_v35 = vadd.f32 %v6404_v4, %v1981_v56  ;;  %v2042_v57 = vmax.f32 %v6445_v9, 0.0  ;;  %4792 = vmatpush3.bf16.msra.mxu0 %v6356_v5 }
 0x3e7   :  { %v6452_v17 = vadd.f32 %v6235_v55, %v1987_v34  ;;  %4794 = vmatprep.subr.bf16.mxu0 %v6366_v37 }
 0x3e8   :  { %v6457_v22 = vadd.f32 %v6238_v31, %v1982_v35  ;;  %v4214_v0 = vpop.f32.mrb[52].mxu1  ;;  %4262 = vmatprep.mubr.f32.mxu0 %v2042_v57 }
 0x3e9   :  { %v1997_v6 = vadd.f32 %v4214_v0, %v6404_v4  ;;  %v1991_v12 = vpop.f32.mrb[53].mxu1  ;;  %4263 = vmatmul.mubr.f32.gmra.mrb[34].mxu0 %v2043_v61  ;;  %v2045_v39 = vmax.f32 %v6452_v17, 0.0 }
 0x3ea   :  { %v1992_v54 = vadd.f32 %v6404_v4, %v1991_v12  ;;  %v2044_v5 = vmax.f32 %v6457_v22, 0.0  ;;  %4796 = vmatpush3.bf16.msra.mxu0 %v6366_v37 }
 0x3eb   :  { %v6464_v55 = vadd.f32 %v6249_v48, %v1997_v6  ;;  %4798 = vmatprep.subr.bf16.mxu0 %v6376_v42 }
 0x3ec   :  { %v6469_v31 = vadd.f32 %v6252_v52, %v1992_v54  ;;  %v4217_v46 = vpop.f32.mrb[54].mxu1  ;;  %4265 = vmatprep.mubr.f32.mxu0 %v2044_v5 }
 0x3ed   :  { %v2007_v47 = vadd.f32 %v4217_v46, %v6404_v4  ;;  %v2001_v62 = vpop.f32.mrb[55].mxu1  ;;  %4266 = vmatmul.mubr.f32.gmra.mrb[36].mxu0 %v2045_v39  ;;  %v2047_v7 = vmax.f32 %v6464_v55, 0.0 }
 0x3ee   :  { %v2002_v63 = vadd.f32 %v6404_v4, %v2001_v62  ;;  %v2046_v37 = vmax.f32 %v6469_v31, 0.0  ;;  %4800 = vmatpush3.bf16.msra.mxu0 %v6376_v42 }
 0x3ef   :  { %v6476_v48 = vadd.f32 %v6263_v60, %v2007_v47  ;;  %4802 = vmatprep.subr.bf16.mxu0 %v6386_v14 }
 0x3f0   :  { %v6481_v52 = vadd.f32 %v6266_v1, %v2002_v63  ;;  %v4220_v50 = vpop.f32.mrb[56].mxu1  ;;  %4268 = vmatprep.mubr.f32.mxu0 %v2046_v37 }
 0x3f1   :  { %v2017_v8 = vadd.f32 %v4220_v50, %v6404_v4  ;;  %v2011_v10 = vpop.f32.mrb[57].mxu1  ;;  %4269 = vmatmul.mubr.f32.gmra.mrb[38].mxu0 %v2047_v7  ;;  %v2049_v16 = vmax.f32 %v6476_v48, 0.0 }
 0x3f2   :  { %v2012_v15 = vadd.f32 %v6404_v4, %v2011_v10  ;;  %v2048_v42 = vmax.f32 %v6481_v52, 0.0  ;;  %4804 = vmatpush3.bf16.msra.mxu0 %v6386_v14  ;;  %v2251_v14 = vld [vmem:[%s7160_s13 + $0x78] sm:$0xff] }
 0x3f3   :  { %v6488_v60 = vadd.f32 %v6271_v32, %v2017_v8  ;;  %4806 = vmatprep.subr.bf16.mxu0 %v6396_v2  ;;  %v2250_v32 = vld [vmem:[%s7160_s13 + $0x70] sm:$0xff] }
 0x3f4   :  { %v6493_v1 = vadd.f32 %v6274_v38, %v2012_v15  ;;  %4271 = vmatprep.mubr.f32.mxu0 %v2048_v42  ;;  %v4809_v38 = vpack.c.bf16 %v2251_v14, %v2250_v32 }
 0x3f5   :  { %4272 = vmatmul.mubr.f32.gmra.mrb[40].mxu0 %v2049_v16  ;;  %v2051_v4 = vmax.f32 %v6488_v60, 0.0 }
 0x3f6   :  { %v2050_v18 = vmax.f32 %v6493_v1, 0.0  ;;  %4808 = vmatpush3.bf16.msra.mxu0 %v6396_v2  ;;  %5012 = vmatprep.subr.bf16.mxu1 %v4809_v38  ;;  %v3600_v2 = vld [vmem:[%s7162_s12] ss:$0 sm:$0xff] }
 0x3f7   :  { %4810 = vmatprep.subr.bf16.mxu0 %v4809_v38  ;;  %5020 = vmatpush3.bf16.msra.mxu1 %v4809_v38 }
 0x3f8   :  { %4274 = vmatprep.mubr.f32.mxu0 %v2050_v18 }
 0x3f9   :  { %4275 = vmatmul.mubr.f32.gmra.mrb[42].mxu0 %v2051_v4 }
 0x3fa   :  { %4812 = vmatpush3.bf16.msra.mxu0 %v4809_v38 }
 0x4b0   :  { %v4255_v19 = vpop.f32.mrb[28].mxu0 }
 0x4b1   :  { %v2147_v23 = vadd.f32 %v4255_v19, %v3600_v2  ;;  %v2141_v24 = vpop.f32.mrb[29].mxu0 }
 0x4b2   :  { %v2142_v30 = vadd.f32 %v3600_v2, %v2141_v24 }
 0x4b3   :  { %v2221_v59 = vmax.f32 %v2147_v23, 0.0 }
 0x4b4   :  { %v2220_v36 = vmax.f32 %v2142_v30, 0.0  ;;  %v4258_v29 = vpop.f32.mrb[30].mxu0 }
 0x4b5   :  { %v2157_v33 = vadd.f32 %v4258_v29, %v3600_v2  ;;  %v2151_v43 = vpop.f32.mrb[31].mxu0 }
 0x4b6   :  { %v2152_v44 = vadd.f32 %v3600_v2, %v2151_v43  ;;  %4309 = vmatprep.mubr.f32.mxu0 %v2220_v36  ;;  %v3601_v36 = vld [vmem:[%s7163_s14] ss:$0 sm:$0xff]  ;;  %s6558_s14 = smov 0  }
 0x4b7   :  { %4310 = vmatmul.mubr.f32.vlgmr.msra.gmra.mrb[44].mxu0 %v2221_v59  ;;  %v2223_v28 = vmax.f32 %v2157_v33, 0.0 }
 0x4b8   :  { %v2222_v45 = vmax.f32 %v2152_v44, 0.0  ;;  %v4261_v26 = vpop.f32.mrb[32].mxu0 }
 0x4b9   :  { %v2167_v20 = vadd.f32 %v4261_v26, %v3600_v2  ;;  %v2161_v49 = vpop.f32.mrb[33].mxu0 }
 0x4ba   :  { %v2162_v53 = vadd.f32 %v3600_v2, %v2161_v49  ;;  %4312 = vmatprep.mubr.f32.mxu0 %v2222_v45 }
 0x4bb   :  { %4313 = vmatmul.mubr.f32.gmra.mrb[46].mxu0 %v2223_v28  ;;  %v2225_v35 = vmax.f32 %v2167_v20, 0.0 }
 0x4bc   :  { %v2224_v34 = vmax.f32 %v2162_v53, 0.0  ;;  %v4264_v56 = vpop.f32.mrb[34].mxu0 }
 0x4bd   :  { %v2177_v57 = vadd.f32 %v4264_v56, %v3600_v2  ;;  %v2171_v61 = vpop.f32.mrb[35].mxu0 }
 0x4be   :  { %v2172_v0 = vadd.f32 %v3600_v2, %v2171_v61  ;;  %4315 = vmatprep.mubr.f32.mxu0 %v2224_v34 }
 0x4bf   :  { %4316 = vmatmul.mubr.f32.gmra.mrb[48].mxu0 %v2225_v35  ;;  %v2227_v54 = vmax.f32 %v2177_v57, 0.0 }
 0x4c0   :  { %v2226_v6 = vmax.f32 %v2172_v0, 0.0  ;;  %v4267_v12 = vpop.f32.mrb[36].mxu0 }
 0x4c1   :  { %v2187_v5 = vadd.f32 %v4267_v12, %v3600_v2  ;;  %v2181_v39 = vpop.f32.mrb[37].mxu0 }
 0x4c2   :  { %v2182_v46 = vadd.f32 %v3600_v2, %v2181_v39  ;;  %4318 = vmatprep.mubr.f32.mxu1 %v2226_v6 }
 0x4c3   :  { %4319 = vmatmul.mubr.f32.vlgmr.msra.gmra.mrb[58].mxu1 %v2227_v54  ;;  %v2229_v63 = vmax.f32 %v2187_v5, 0.0 }
 0x4c4   :  { %v2228_v47 = vmax.f32 %v2182_v46, 0.0  ;;  %v4270_v62 = vpop.f32.mrb[38].mxu0 }
 0x4c5   :  { %v2197_v37 = vadd.f32 %v4270_v62, %v3600_v2  ;;  %v2191_v7 = vpop.f32.mrb[39].mxu0 }
 0x4c6   :  { %v2192_v50 = vadd.f32 %v3600_v2, %v2191_v7  ;;  %4321 = vmatprep.mubr.f32.mxu1 %v2228_v47 }
 0x4c7   :  { %4322 = vmatmul.mubr.f32.gmra.mrb[60].mxu1 %v2229_v63  ;;  %v2231_v15 = vmax.f32 %v2197_v37, 0.0 }
 0x4c8   :  { %v2230_v8 = vmax.f32 %v2192_v50, 0.0  ;;  %v4273_v10 = vpop.f32.mrb[40].mxu0 }
 0x4c9   :  { %v2207_v42 = vadd.f32 %v4273_v10, %v3600_v2  ;;  %v2201_v16 = vpop.f32.mrb[41].mxu0 }
 0x4ca   :  { %v2202_v18 = vadd.f32 %v3600_v2, %v2201_v16  ;;  %4324 = vmatprep.mubr.f32.mxu1 %v2230_v8 }
 0x4cb   :  { %4325 = vmatmul.mubr.f32.gmra.mrb[62].mxu1 %v2231_v15  ;;  %v2233_v14 = vmax.f32 %v2207_v42, 0.0 }
 0x4cc   :  { %v2232_v4 = vmax.f32 %v2202_v18, 0.0  ;;  %v4276_v32 = vpop.f32.mrb[42].mxu0 }
 0x4cd   :  { %v2217_v38 = vadd.f32 %v4276_v32, %v3600_v2  ;;  %v2211_v19 = vpop.f32.mrb[43].mxu0 }
 0x4ce   :  { %v2212_v23 = vadd.f32 %v3600_v2, %v2211_v19  ;;  %4327 = vmatprep.mubr.f32.mxu1 %v2232_v4 }
 0x4cf   :  { %4328 = vmatmul.mubr.f32.gmra.mrb[64].mxu1 %v2233_v14  ;;  %v2235_v30 = vmax.f32 %v2217_v38, 0.0 }
 0x4d0   :  { %v2234_v24 = vmax.f32 %v2212_v23, 0.0 }
 0x4d2   :  { %4330 = vmatprep.mubr.f32.mxu1 %v2234_v24 }
 0x4d3   :  { %4331 = vmatmul.mubr.f32.gmra.mrb[66].mxu1 %v2235_v30 }
 0x58a   :  { %v4311_v29 = vpop.f32.mrb[44].mxu0 }
 0x58b   :  { %v2331_v59 = vadd.f32 %v4311_v29, %v3601_v36  ;;  %v2325_v33 = vpop.f32.mrb[45].mxu0 }
 0x58c   :  { %v2326_v43 = vadd.f32 %v3601_v36, %v2325_v33 }
 0x58d   :  { %v2405_v44 = vadd.f32 %v2331_v59, %v6409_v11  }
 0x58e   :  { %v2404_v45 = vadd.f32 %v2326_v43, %v6412_v13   ;;  %v4314_v26 = vpop.f32.mrb[46].mxu0 }
 0x58f   :  { %v2341_v2 = vadd.f32 %v4314_v26, %v3601_v36  ;;  %v2335_v28 = vpop.f32.mrb[47].mxu0 }
 0x590   :  { %v2336_v20 = vadd.f32 %v3601_v36, %v2335_v28 }
 0x591   :  { %v2407_v49 = vadd.f32 %v2341_v2, %v6419_v25  }
 0x592   :  { %v2406_v53 = vadd.f32 %v2336_v20, %v6422_v27   ;;  %v4317_v34 = vpop.f32.mrb[48].mxu0 }
 0x593   :  { %v2351_v56 = vadd.f32 %v4317_v34, %v3601_v36  ;;  %v2345_v35 = vpop.f32.mrb[49].mxu0 }
 0x594   :  { %v2346_v57 = vadd.f32 %v3601_v36, %v2345_v35 }
 0x595   :  { %v2409_v61 = vadd.f32 %v2351_v56, %v6428_v21  }
 0x596   :  { %v2408_v0 = vadd.f32 %v2346_v57, %v6433_v51   ;;  %v4320_v6 = vpop.f32.mrb[58].mxu1 }
 0x597   :  { %v2361_v11 = vadd.f32 %v4320_v6, %v3601_v36  ;;  %v2355_v12 = vpop.f32.mrb[59].mxu1 }
 0x598   :  { %v2356_v13 = vadd.f32 %v3601_v36, %v2355_v12 }
 0x599   :  { %v2411_v54 = vadd.f32 %v2361_v11, %v6440_v58  }
 0x59a   :  { %v2410_v5 = vadd.f32 %v2356_v13, %v6445_v9   ;;  %v4323_v39 = vpop.f32.mrb[60].mxu1 }
 0x59b   :  { %v2371_v25 = vadd.f32 %v4323_v39, %v3601_v36  ;;  %v2365_v46 = vpop.f32.mrb[61].mxu1 }
 0x59c   :  { %v2366_v27 = vadd.f32 %v3601_v36, %v2365_v46 }
 0x59d   :  { %v2413_v47 = vadd.f32 %v2371_v25, %v6452_v17  }
 0x59e   :  { %v2412_v62 = vadd.f32 %v2366_v27, %v6457_v22   ;;  %v4326_v63 = vpop.f32.mrb[62].mxu1 }
 0x59f   :  { %v2381_v21 = vadd.f32 %v4326_v63, %v3601_v36  ;;  %v2375_v37 = vpop.f32.mrb[63].mxu1 }
 0x5a0   :  { %v2376_v51 = vadd.f32 %v3601_v36, %v2375_v37 }
 0x5a1   :  { %v2415_v7 = vadd.f32 %v2381_v21, %v6464_v55  }
 0x5a2   :  { %v2414_v50 = vadd.f32 %v2376_v51, %v6469_v31   ;;  %v4329_v8 = vpop.f32.mrb[64].mxu1 }
 0x5a3   :  { %v2391_v58 = vadd.f32 %v4329_v8, %v3601_v36  ;;  %v2385_v10 = vpop.f32.mrb[65].mxu1 }
 0x5a4   :  { %v2386_v9 = vadd.f32 %v3601_v36, %v2385_v10 }
 0x5a5   :  { %v2417_v15 = vadd.f32 %v2391_v58, %v6476_v48  }
 0x5a6   :  { %v2416_v42 = vadd.f32 %v2386_v9, %v6481_v52   ;;  %v4332_v16 = vpop.f32.mrb[66].mxu1 }
 0x5a7   :  { %v2401_v17 = vadd.f32 %v4332_v16, %v3601_v36  ;;  %v2395_v18 = vpop.f32.mrb[67].mxu1 }
 0x5a8   :  { %v2396_v22 = vadd.f32 %v3601_v36, %v2395_v18 }
 0x5a9   :  { %v2419_v4 = vadd.f32 %v2401_v17, %v6488_v60  }
 0x5aa   :  { %v2418_v32 = vadd.f32 %v2396_v22, %v6493_v1  }
 0x5ab LB: > { %v2450_v55 = vmul.f32 %v5329_v45, %v5329_v45  ;;  %v2451_v31 = vmul.f32 %v5325_v44, %v5325_v44  ;;  %v2452_v48 = vmul.f32 %v5321_v53, %v5321_v53  ;;  %v4815_v52 = vpack.c.bf16 %v5325_v44, %v5329_v45  ;;  %s3607_s11 = sshll.u32 %s5333_s14, 7  ;;  %s7176_s24 = sld [smem:[#allocation4_spill]]  ;;  %s5333_s14 = sphi %s6558_s14, %s2425_s14   ;;  %v5329_v45 = vphi %v2404_v45, %v7212_v45   ;;  %v5325_v44 = vphi %v2405_v44, %v7211_v44   ;;  %v5321_v53 = vphi %v2406_v53, %v7210_v53   ;;  %v5317_v49 = vphi %v2407_v49, %v7209_v49   ;;  %v5313_v0 = vphi %v2408_v0, %v7208_v0   ;;  %v5309_v61 = vphi %v2409_v61, %v7207_v61   ;;  %v5305_v5 = vphi %v2410_v5, %v7206_v5   ;;  %v5301_v54 = vphi %v2411_v54, %v7205_v54   ;;  %v5297_v62 = vphi %v2412_v62, %v7204_v62   ;;  %v5293_v47 = vphi %v2413_v47, %v7203_v47   ;;  %v5289_v50 = vphi %v2414_v50, %v7202_v50   ;;  %v5285_v7 = vphi %v2415_v7, %v7201_v7   ;;  %v5281_v42 = vphi %v2416_v42, %v7200_v42   ;;  %v5277_v15 = vphi %v2417_v15, %v7199_v15   ;;  %v5273_v32 = vphi %v2418_v32, %v7198_v32   ;;  %v5269_v4 = vphi %v2419_v4, %v7197_v4  }
 0x5ac   : > { %v2453_v60 = vmul.f32 %v5317_v49, %v5317_v49  ;;  %v2454_v38 = vmul.f32 %v5313_v0, %v5313_v0  ;;  %v2455_v19 = vmul.f32 %v5309_v61, %v5309_v61  ;;  %v4819_v23 = vpack.c.bf16 %v5317_v49, %v5321_v53  ;;  %s3617_s25 = sshll.u32 %s5333_s14, 5  ;;  %s7177_s17 = sld [smem:[#allocation5_spill]] }
 0x5ad   : > { %v4813_v1 = vpack.c.bf16 %v2451_v31, %v2450_v55  ;;  %v2456_v30 = vmul.f32 %v5305_v5, %v5305_v5  ;;  %v2457_v36 = vmul.f32 %v5301_v54, %v5301_v54  ;;  %v4823_v29 = vpack.c.bf16 %v5309_v61, %v5313_v0  ;;  %s6685_s7 = scalar_lea.vmem [#allocation2], %s3617_s25  ;;  %s7178_s26 = sld [smem:[#allocation6_spill]] }
 0x5ae   : > { %v4817_v14 = vpack.c.bf16 %v2453_v60, %v2452_v48  ;;  %v4821_v24 = vpack.c.bf16 %v2455_v19, %v2454_v38  ;;  %v2458_v33 = vmul.f32 %v5297_v62, %v5297_v62  ;;  %v2459_v43 = vmul.f32 %v5293_v47, %v5293_v47  ;;  %s7179_s4 = sld [smem:[#allocation7_spill]] }
 0x5af   : > { %4814 = vmatprep.subr.bf16.mxu0 %v4813_v1  ;;  %v4825_v59 = vpack.c.bf16 %v2457_v36, %v2456_v30  ;;  %v4827_v26 = vpack.c.bf16 %v5301_v54, %v5305_v5  ;;  %v2460_v28 = vmul.f32 %v5289_v50, %v5289_v50  ;;  %v2461_v20 = vmul.f32 %v5285_v7, %v5285_v7 }
 0x5b0   : > { %4816 = vmatpush1.bf16.msra.mxu0 %v4815_v52  ;;  %v4829_v2 = vpack.c.bf16 %v2459_v43, %v2458_v33  ;;  %v5336_v34 = vmov 0.0   ;;  %v4831_v56 = vpack.c.bf16 %v5293_v47, %v5297_v62  ;;  %v2462_v57 = vmul.f32 %v5281_v42, %v5281_v42 }
 0x5b1   : > { %4818 = vmatprep.subr.bf16.mxu0 %v4817_v14  ;;  %2530 = vmatprep.mubr.f32.mxu0 %v5336_v34  ;;  %v4833_v35 = vpack.c.bf16 %v2461_v20, %v2460_v28  ;;  %v2463_v6 = vmul.f32 %v5277_v15, %v5277_v15  ;;  %v4835_v11 = vpack.c.bf16 %v5285_v7, %v5289_v50  ;;  %v5337_v63 = vmov 1.0   ;;  %s6666_s30 = scalar_lea.vmem %s7176_s24, %s3607_s11 }
 0x5b2   : > { %v2464_v13 = vmul.f32 %v5273_v32, %v5273_v32  ;;  %v2465_v39 = vmul.f32 %v5269_v4, %v5269_v4  ;;  %v4839_v25 = vpack.c.bf16 %v5277_v15, %v5281_v42  ;;  %v4843_v27 = vpack.c.bf16 %v5269_v4, %v5273_v32  ;;  %v2621_v21 = vld [vmem:[%s6666_s30] sm:$0xff]  ;;  %v2622_v37 = vld [vmem:[%s6666_s30 + $0x8] sm:$0xff]  ;;  %v2623_v8 = vld [vmem:[%s6666_s30 + $0x10] sm:$0xff]  ;;  %s2637_s5 = scalar_lea.vmem %s7177_s17, %s5333_s14 }
 0x5b3   : > { %v4837_v12 = vpack.c.bf16 %v2463_v6, %v2462_v57  ;;  %v4845_v51 = vpack.c.bf16 %v2622_v37, %v2621_v21  ;;  %v2624_v58 = vld [vmem:[%s6666_s30 + $0x18] sm:$0xff]  ;;  %v2625_v9 = vld [vmem:[%s6666_s30 + $0x20] sm:$0xff]  ;;  %v2626_v16 = vld [vmem:[%s6666_s30 + $0x28] sm:$0xff]  ;;  %s6819_s18 = scalar_lea.vmem %s7178_s26, %s3607_s11 }
 0x5b4   : > { %4820 = vmatpush1.bf16.msra.mxu0 %v4819_v23  ;;  %v4841_v46 = vpack.c.bf16 %v2465_v39, %v2464_v13  ;;  %v4849_v10 = vpack.c.bf16 %v2624_v58, %v2623_v8  ;;  %v4853_v17 = vpack.c.bf16 %v2626_v16, %v2625_v9  ;;  %v2627_v18 = vld [vmem:[%s6666_s30 + $0x30] sm:$0xff]  ;;  %v2628_v22 = vld [vmem:[%s6666_s30 + $0x38] sm:$0xff]  ;;  %v2629_v31 = vld [vmem:[%s6666_s30 + $0x40] sm:$0xff]  ;;  %s2984_s3 = scalar_lea.vmem %s7179_s4, %s5333_s14  ;;  %s2425_s14 = sadd.s32 1, %s5333_s14  }
 0x5b5   : > { %4822 = vmatprep.subr.bf16.mxu0 %v4821_v24  ;;  %4846 = vmatprep.subr.bf16.mxu1 %v4845_v51  ;;  %v4857_v55 = vpack.c.bf16 %v2628_v22, %v2627_v18  ;;  %v2630_v48 = vld [vmem:[%s6666_s30 + $0x48] sm:$0xff]  ;;  %v2631_v60 = vld [vmem:[%s6666_s30 + $0x50] sm:$0xff]  ;;  %v2632_v1 = vld [vmem:[%s6666_s30 + $0x58] sm:$0xff]  ;;  %p6914_p0 = scmp.ge.s32.totalorder %s2425_s14, 5  }
 0x5b6   : > { %4848 = vmatpush3.bf16.msra.mxu1 %v4845_v51  ;;  %v4861_v52 = vpack.c.bf16 %v2630_v48, %v2629_v31  ;;  %v4865_v14 = vpack.c.bf16 %v2632_v1, %v2631_v60  ;;  %v2633_v38 = vld [vmem:[%s6666_s30 + $0x60] sm:$0xff]  ;;  %v2634_v19 = vld [vmem:[%s6666_s30 + $0x68] sm:$0xff]  ;;  %v2635_v24 = vld [vmem:[%s6666_s30 + $0x70] sm:$0xff]  ;;  %s7213_s10 = sld [smem:[#allocation8_spill]] (%p6914_p0)  ;;  %s7214_s2 = sld [smem:[#allocation9_spill]] (%p6914_p0) }
 0x5b7   : > { %4850 = vmatprep.subr.bf16.mxu1 %v4849_v10  ;;  %v4869_v23 = vpack.c.bf16 %v2634_v19, %v2633_v38  ;;  %v2636_v30 = vld [vmem:[%s6666_s30 + $0x78] sm:$0xff]  ;;  %s7215_s19 = sld [smem:[#allocation10_spill]] (%p6914_p0) }
 0x5b8   : > { %4824 = vmatpush1.bf16.msra.mxu0 %v4823_v29  ;;  %v4873_v36 = vpack.c.bf16 %v2636_v30, %v2635_v24 }
 0x5b9   : > { %4826 = vmatprep.subr.bf16.mxu0 %v4825_v59 }
 0x5ba   : > { %4852 = vmatpush3.bf16.msra.mxu1 %v4849_v10 }
 0x5bb   : > { %4854 = vmatprep.subr.bf16.mxu1 %v4853_v17 }
 0x5bc   : > { %4828 = vmatpush1.bf16.msra.mxu0 %v4827_v26 }
 0x5bd   : > { %4830 = vmatprep.subr.bf16.mxu0 %v4829_v2 }
 0x5be   : > { %4856 = vmatpush3.bf16.msra.mxu1 %v4853_v17 }
 0x5bf   : > { %4858 = vmatprep.subr.bf16.mxu1 %v4857_v55 }
 0x5c0   : > { %4832 = vmatpush1.bf16.msra.mxu0 %v4831_v56  ;;  %v2445_v56 = vld [vmem:[%s6685_s7] sm:$0xff] }
 0x5c1   : > { %4834 = vmatprep.subr.bf16.mxu0 %v4833_v35 }
 0x5c2   : > { %4860 = vmatpush3.bf16.msra.mxu1 %v4857_v55 }
 0x5c3   : > { %4862 = vmatprep.subr.bf16.mxu1 %v4861_v52 }
 0x5c4   : > { %4836 = vmatpush1.bf16.msra.mxu0 %v4835_v11  ;;  %v3606_v11 = vld [vmem:[%s6685_s7 + $0x8] sm:$0xff] }
 0x5c5   : > { %4838 = vmatprep.subr.bf16.mxu0 %v4837_v12 }
 0x5c6   : > { %4864 = vmatpush3.bf16.msra.mxu1 %v4861_v52 }
 0x5c7   : > { %4866 = vmatprep.subr.bf16.mxu1 %v4865_v14 }
 0x5c8   : > { %4840 = vmatpush1.bf16.msra.mxu0 %v4839_v25 }
 0x5c9   : > { %4842 = vmatprep.subr.bf16.mxu0 %v4841_v46 }
 0x5ca   : > { %4868 = vmatpush3.bf16.msra.mxu1 %v4865_v14 }
 0x5cb   : > { %4870 = vmatprep.subr.bf16.mxu1 %v4869_v23 }
 0x5cc   : > { %4844 = vmatpush1.bf16.msra.mxu0 %v4843_v27 }
 0x5ce   : > { %4872 = vmatpush3.bf16.msra.mxu1 %v4869_v23 }
 0x5cf   : > { %2531 = vmatmul.mubr.f32.vlgmr.msra.gmra.mrb[0].mxu0 %v5337_v63  ;;  %4874 = vmatprep.subr.bf16.mxu1 %v4873_v36 }
 0x5d0   : > { %2878 = vmatprep.mubr.f32.mxu0 %v5336_v34 }
 0x5d2   : > { %4876 = vmatpush3.bf16.msra.mxu1 %v4873_v36 }
 0x6a2   : > { %v2532_v29 = vpop.f32.mrb[0].mxu0 }
 0x6a3   : > { %v2537_v59 = vmul.f32 0.0078125, %v2532_v29  ;;  %v2534_v33 = vpop.f32.mrb[1].mxu0 }
 0x6a4   : > { %v2538_v43 = vmul.f32 0.0078125, %v2534_v33 }
 0x6a5   : > { %v2539_v26 = vmul.f32 %v2537_v59, %v2537_v59  ;;  %v2552_v57 = vrot.slane %v2537_v59, %v6023_v40 }
 0x6a7   : > { %v2540_v2 = vsub.f32 %v2538_v43, %v2539_v26 }
 0x6a9   : > { %v2541_v28 = vmax.f32 %v2540_v2, 0.0 }
 0x6ab   : > { %v2542_v20 = vadd.f32 1e-05, %v2541_v28 }
 0x6ad   : > { %5193 = vrsqrt.f32 %v2542_v20 }
 0x6b7   : > { %v5194_v34 = vpop.eup %5193 }
 0x6b8   : > { %v2547_v35 = vrot.slane %v5194_v34, %v6023_v40 }
 0x6ba   : > { %v2548_v6 = vmul.f32 %v2547_v35, %v2445_v56 }
 0x6bc   : > { %v2553_v12 = vmul.f32 %v2552_v57, %v2548_v6  ;;  %v2558_v13 = vrot.slane %v2548_v6, %v6023_v40  ;;  %v2582_v39 = vrot.slane %v2548_v6, %v6026_v41 }
 0x6be   : > { %v2554_v25 = vsub.f32 %v3606_v11, %v2553_v12  ;;  %v2559_v46 = vmul.f32 %v5329_v45, %v2558_v13  ;;  %v2560_v27 = vmul.f32 %v5325_v44, %v2558_v13  ;;  %v2561_v21 = vmul.f32 %v5321_v53, %v2558_v13 }
 0x6bf   : > { %v2562_v37 = vmul.f32 %v5317_v49, %v2558_v13  ;;  %v2563_v8 = vmul.f32 %v5313_v0, %v2558_v13  ;;  %v2564_v58 = vmul.f32 %v5309_v61, %v2558_v13  ;;  %v2565_v10 = vmul.f32 %v5305_v5, %v2558_v13 }
 0x6c0   : > { %v2570_v51 = vrot.slane %v2554_v25, %v6023_v40  ;;  %v2594_v9 = vrot.slane %v2554_v25, %v6026_v41  ;;  %v2566_v16 = vmul.f32 %v5301_v54, %v2558_v13  ;;  %v2583_v17 = vmul.f32 %v5297_v62, %v2582_v39 }
 0x6c1   : > { %v2584_v18 = vmul.f32 %v5293_v47, %v2582_v39  ;;  %v2585_v23 = vmul.f32 %v5289_v50, %v2582_v39  ;;  %v2586_v24 = vmul.f32 %v5285_v7, %v2582_v39  ;;  %v2587_v36 = vmul.f32 %v5281_v42, %v2582_v39 }
 0x6c2   : > { %v2571_v22 = vadd.f32 %v2570_v51, %v2559_v46  ;;  %v2572_v55 = vadd.f32 %v2570_v51, %v2560_v27  ;;  %v2573_v31 = vadd.f32 %v2570_v51, %v2561_v21  ;;  %v2574_v48 = vadd.f32 %v2570_v51, %v2562_v37 }
 0x6c3   : > { %v2575_v52 = vadd.f32 %v2570_v51, %v2563_v8  ;;  %v2576_v60 = vadd.f32 %v2570_v51, %v2564_v58  ;;  %v2577_v1 = vadd.f32 %v2570_v51, %v2565_v10  ;;  %v2578_v14 = vadd.f32 %v2570_v51, %v2566_v16  ;;  %v6715_v58 = vld [vmem:[%s2637_s5] ss:$0 sm:$0xff] }
 0x6c4   : > { %v2603_v38 = vmax.f32 %v2571_v22, 0.0  ;;  %v2604_v19 = vmax.f32 %v2572_v55, 0.0  ;;  %v2605_v30 = vmax.f32 %v2573_v31, 0.0  ;;  %v2595_v29 = vadd.f32 %v2594_v9, %v2583_v17 }
 0x6c5   : > { %v2596_v59 = vadd.f32 %v2594_v9, %v2584_v18  ;;  %v2597_v33 = vadd.f32 %v2594_v9, %v2585_v23  ;;  %v2598_v43 = vadd.f32 %v2594_v9, %v2586_v24  ;;  %v2599_v26 = vadd.f32 %v2594_v9, %v2587_v36 }
 0x6c6   : > { %4365 = vmatprep.mubr.f32.mxu1 %v2603_v38  ;;  %v2588_v2 = vmul.f32 %v5277_v15, %v2582_v39  ;;  %v2589_v28 = vmul.f32 %v5273_v32, %v2582_v39  ;;  %v2590_v20 = vmul.f32 %v5269_v4, %v2582_v39  ;;  %v2606_v34 = vmax.f32 %v2574_v48, 0.0 }
 0x6c7   : > { %4366 = vmatmul.mubr.f32.vlgmr.msra.gmra.mrb[0].mxu1 %v2604_v19  ;;  %v2607_v6 = vmax.f32 %v2575_v52, 0.0  ;;  %v2608_v11 = vmax.f32 %v2576_v60, 0.0  ;;  %v2609_v12 = vmax.f32 %v2577_v1, 0.0  ;;  %v2610_v13 = vmax.f32 %v2578_v14, 0.0 }
 0x6c8   : > { %4368 = vmatprep.mubr.f32.mxu1 %v2605_v30  ;;  %v2600_v56 = vadd.f32 %v2594_v9, %v2588_v2  ;;  %v2601_v35 = vadd.f32 %v2594_v9, %v2589_v28  ;;  %v2602_v57 = vadd.f32 %v2594_v9, %v2590_v20  ;;  %v2611_v25 = vmax.f32 %v2595_v29, 0.0 }
 0x6c9   : > { %v2612_v46 = vmax.f32 %v2596_v59, 0.0  ;;  %v2613_v27 = vmax.f32 %v2597_v33, 0.0  ;;  %v2614_v39 = vmax.f32 %v2598_v43, 0.0  ;;  %v2615_v21 = vmax.f32 %v2599_v26, 0.0 }
 0x6ca   : > { %v2616_v37 = vmax.f32 %v2600_v56, 0.0  ;;  %v2617_v51 = vmax.f32 %v2601_v35, 0.0  ;;  %v2618_v8 = vmax.f32 %v2602_v57, 0.0 }
 0x6cb   : > { %4369 = vmatmul.mubr.f32.gmra.mrb[2].mxu1 %v2606_v34 }
 0x6cc   : > { %4371 = vmatprep.mubr.f32.mxu1 %v2607_v6 }
 0x6cf   : > { %4372 = vmatmul.mubr.f32.gmra.mrb[4].mxu1 %v2608_v11 }
 0x6d0   : > { %4374 = vmatprep.mubr.f32.mxu1 %v2609_v12 }
 0x6d3   : > { %4375 = vmatmul.mubr.f32.gmra.mrb[6].mxu1 %v2610_v13 }
 0x6d4   : > { %4377 = vmatprep.mubr.f32.mxu1 %v2611_v25 }
 0x6d7   : > { %4378 = vmatmul.mubr.f32.gmra.mrb[8].mxu1 %v2612_v46 }
 0x6d8   : > { %4380 = vmatprep.mubr.f32.mxu1 %v2613_v27 }
 0x6db   : > { %4381 = vmatmul.mubr.f32.gmra.mrb[10].mxu1 %v2614_v39 }
 0x6dc   : > { %4383 = vmatprep.mubr.f32.mxu1 %v2615_v21 }
 0x6df   : > { %4384 = vmatmul.mubr.f32.gmra.mrb[12].mxu1 %v2616_v37 }
 0x6e0   : > { %4386 = vmatprep.mubr.f32.mxu1 %v2617_v51 }
 0x6e3   : > { %4387 = vmatmul.mubr.f32.gmra.mrb[14].mxu1 %v2618_v8 }
 0x79a   : > { %v4367_v10 = vpop.f32.mrb[0].mxu1 }
 0x79b   : > { %v6718_v9 = vadd.f32 %v4367_v10, %v6715_v58  ;;  %v2711_v16 = vpop.f32.mrb[1].mxu1 }
 0x79c   : > { %v6721_v17 = vadd.f32 %v6715_v58, %v2711_v16 }
 0x79d   : > { %v2799_v18 = vmul.f32 %v6718_v9, %v6718_v9 }
 0x79e   : > { %v2798_v22 = vmul.f32 %v6721_v17, %v6721_v17  ;;  %v4370_v55 = vpop.f32.mrb[2].mxu1  ;;  %v4879_v1 = vpack.c.bf16 %v6718_v9, %v6721_v17 }
 0x79f   : > { %v6728_v31 = vadd.f32 %v4370_v55, %v6715_v58  ;;  %v2721_v48 = vpop.f32.mrb[3].mxu1 }
 0x7a0   : > { %v6731_v52 = vadd.f32 %v6715_v58, %v2721_v48  ;;  %v4877_v60 = vpack.c.bf16 %v2799_v18, %v2798_v22 }
 0x7a1   : > { %v2801_v14 = vmul.f32 %v6728_v31, %v6728_v31 }
 0x7a2   : > { %v2800_v38 = vmul.f32 %v6731_v52, %v6731_v52  ;;  %v4373_v19 = vpop.f32.mrb[4].mxu1  ;;  %4878 = vmatprep.subr.bf16.mxu0 %v4877_v60  ;;  %v4883_v29 = vpack.c.bf16 %v6728_v31, %v6731_v52 }
 0x7a3   : > { %v6740_v23 = vadd.f32 %v4373_v19, %v6715_v58  ;;  %v2731_v24 = vpop.f32.mrb[5].mxu1  ;;  %4880 = vmatpush1.bf16.msra.mxu0 %v4879_v1 }
 0x7a4   : > { %v6743_v30 = vadd.f32 %v6715_v58, %v2731_v24  ;;  %v4881_v36 = vpack.c.bf16 %v2801_v14, %v2800_v38 }
 0x7a5   : > { %v2803_v59 = vmul.f32 %v6740_v23, %v6740_v23 }
 0x7a6   : > { %v2802_v33 = vmul.f32 %v6743_v30, %v6743_v30  ;;  %v4376_v43 = vpop.f32.mrb[6].mxu1  ;;  %4882 = vmatprep.subr.bf16.mxu0 %v4881_v36  ;;  %v4887_v34 = vpack.c.bf16 %v6740_v23, %v6743_v30 }
 0x7a7   : > { %v6752_v26 = vadd.f32 %v4376_v43, %v6715_v58  ;;  %v2741_v2 = vpop.f32.mrb[7].mxu1  ;;  %4884 = vmatpush1.bf16.msra.mxu0 %v4883_v29 }
 0x7a8   : > { %v6755_v28 = vadd.f32 %v6715_v58, %v2741_v2  ;;  %v4885_v20 = vpack.c.bf16 %v2803_v59, %v2802_v33 }
 0x7a9   : > { %v2805_v56 = vmul.f32 %v6752_v26, %v6752_v26 }
 0x7aa   : > { %v2804_v35 = vmul.f32 %v6755_v28, %v6755_v28  ;;  %v4379_v57 = vpop.f32.mrb[8].mxu1  ;;  %4886 = vmatprep.subr.bf16.mxu0 %v4885_v20  ;;  %v4891_v25 = vpack.c.bf16 %v6752_v26, %v6755_v28 }
 0x7ab   : > { %v6764_v6 = vadd.f32 %v4379_v57, %v6715_v58  ;;  %v2751_v11 = vpop.f32.mrb[9].mxu1  ;;  %4888 = vmatpush1.bf16.msra.mxu0 %v4887_v34 }
 0x7ac   : > { %v6767_v12 = vadd.f32 %v6715_v58, %v2751_v11  ;;  %v4889_v13 = vpack.c.bf16 %v2805_v56, %v2804_v35  ;;  %v2969_v35 = vld [vmem:[%s6819_s18 + $0x8] sm:$0xff]  ;;  %v2971_v11 = vld [vmem:[%s6819_s18 + $0x18] sm:$0xff] }
 0x7ad   : > { %v2807_v46 = vmul.f32 %v6764_v6, %v6764_v6 }
 0x7ae   : > { %v2806_v27 = vmul.f32 %v6767_v12, %v6767_v12  ;;  %v4382_v39 = vpop.f32.mrb[10].mxu1  ;;  %4890 = vmatprep.subr.bf16.mxu0 %v4889_v13  ;;  %v4895_v10 = vpack.c.bf16 %v6764_v6, %v6767_v12 }
 0x7af   : > { %v6776_v21 = vadd.f32 %v4382_v39, %v6715_v58  ;;  %v2761_v37 = vpop.f32.mrb[11].mxu1  ;;  %4892 = vmatpush1.bf16.msra.mxu0 %v4891_v25  ;;  %v2972_v25 = vld [vmem:[%s6819_s18 + $0x20] sm:$0xff]  ;;  %v2974_v39 = vld [vmem:[%s6819_s18 + $0x30] sm:$0xff] }
 0x7b0   : > { %v6779_v51 = vadd.f32 %v6715_v58, %v2761_v37  ;;  %v4893_v8 = vpack.c.bf16 %v2807_v46, %v2806_v27  ;;  %v2973_v46 = vld [vmem:[%s6819_s18 + $0x28] sm:$0xff]  ;;  %v2975_v37 = vld [vmem:[%s6819_s18 + $0x38] sm:$0xff] }
 0x7b1   : > { %v2809_v16 = vmul.f32 %v6776_v21, %v6776_v21  ;;  %v4917_v27 = vpack.c.bf16 %v2973_v46, %v2972_v25 }
 0x7b2   : > { %v2808_v18 = vmul.f32 %v6779_v51, %v6779_v51  ;;  %v4385_v22 = vpop.f32.mrb[12].mxu1  ;;  %4894 = vmatprep.subr.bf16.mxu0 %v4893_v8  ;;  %v4899_v14 = vpack.c.bf16 %v6776_v21, %v6779_v51  ;;  %v4921_v8 = vpack.c.bf16 %v2975_v37, %v2974_v39 }
 0x7b3   : > { %v6788_v55 = vadd.f32 %v4385_v22, %v6715_v58  ;;  %v2771_v48 = vpop.f32.mrb[13].mxu1  ;;  %4896 = vmatpush1.bf16.msra.mxu0 %v4895_v10  ;;  %v2976_v10 = vld [vmem:[%s6819_s18 + $0x40] sm:$0xff]  ;;  %v2978_v22 = vld [vmem:[%s6819_s18 + $0x50] sm:$0xff] }
 0x7b4   : > { %v6791_v60 = vadd.f32 %v6715_v58, %v2771_v48  ;;  %v4897_v1 = vpack.c.bf16 %v2809_v16, %v2808_v18  ;;  %v2977_v16 = vld [vmem:[%s6819_s18 + $0x48] sm:$0xff]  ;;  %v2979_v48 = vld [vmem:[%s6819_s18 + $0x58] sm:$0xff] }
 0x7b5   : > { %v2811_v38 = vmul.f32 %v6788_v55, %v6788_v55  ;;  %v4925_v18 = vpack.c.bf16 %v2977_v16, %v2976_v10 }
 0x7b6   : > { %v2810_v19 = vmul.f32 %v6791_v60, %v6791_v60  ;;  %v4388_v24 = vpop.f32.mrb[14].mxu1  ;;  %4898 = vmatprep.subr.bf16.mxu0 %v4897_v1  ;;  %v4903_v43 = vpack.c.bf16 %v6788_v55, %v6791_v60  ;;  %v2980_v1 = vld [vmem:[%s6819_s18 + $0x60] sm:$0xff] }
 0x7b7   : > { %v6800_v36 = vadd.f32 %v4388_v24, %v6715_v58  ;;  %v2781_v29 = vpop.f32.mrb[15].mxu1  ;;  %4900 = vmatpush1.bf16.msra.mxu0 %v4899_v14  ;;  %v4929_v14 = vpack.c.bf16 %v2979_v48, %v2978_v22  ;;  %v2982_v24 = vld [vmem:[%s6819_s18 + $0x70] sm:$0xff] }
 0x7b8   : > { %v6803_v59 = vadd.f32 %v6715_v58, %v2781_v29  ;;  %v4901_v33 = vpack.c.bf16 %v2811_v38, %v2810_v19  ;;  %v2968_v58 = vld [vmem:[%s6819_s18] sm:$0xff]  ;;  %v2981_v38 = vld [vmem:[%s6819_s18 + $0x68] sm:$0xff]  ;;  %v2983_v29 = vld [vmem:[%s6819_s18 + $0x78] sm:$0xff] }
 0x7b9   : > { %v2813_v2 = vmul.f32 %v6800_v36, %v6800_v36  ;;  %v4909_v57 = vpack.c.bf16 %v2969_v35, %v2968_v58  ;;  %v4933_v19 = vpack.c.bf16 %v2981_v38, %v2980_v1 }
 0x7ba   : > { %v2812_v20 = vmul.f32 %v6803_v59, %v6803_v59  ;;  %4902 = vmatprep.subr.bf16.mxu0 %v4901_v33  ;;  %v4907_v56 = vpack.c.bf16 %v6800_v36, %v6803_v59  ;;  %v4937_v33 = vpack.c.bf16 %v2983_v29, %v2982_v24 }
 0x7bb   : > { %4904 = vmatpush1.bf16.msra.mxu0 %v4903_v43  ;;  %4910 = vmatprep.subr.bf16.mxu1 %v4909_v57 }
 0x7bc   : > { %v4905_v34 = vpack.c.bf16 %v2813_v2, %v2812_v20  ;;  %4912 = vmatpush3.bf16.msra.mxu1 %v4909_v57 }
 0x7be   : > { %4906 = vmatprep.subr.bf16.mxu0 %v4905_v34 }
 0x7bf   : > { %4908 = vmatpush1.bf16.msra.mxu0 %v4907_v56 }
 0x7c2   : > { %2879 = vmatmul.mubr.f32.vlgmr.msra.gmra.mrb[2].mxu0 %v5337_v63  ;;  %v2970_v63 = vld [vmem:[%s6819_s18 + $0x10] sm:$0xff] }
 0x7c3   : > { %v4913_v13 = vpack.c.bf16 %v2971_v11, %v2970_v63  ;;  %v3611_v11 = vld [vmem:[%s6685_s7 + $0x10] sm:$0xff]  ;;  %3235 = vmatprep.mubr.f32.mxu0 (%p6914_p0), %v5335_v3 }
 0x7c5   : > { %4914 = vmatprep.subr.bf16.mxu1 %v4913_v13 }
 0x7c6   : > { %4916 = vmatpush3.bf16.msra.mxu1 %v4913_v13 }
 0x7c7   : > { %4918 = vmatprep.subr.bf16.mxu1 %v4917_v27 }
 0x7ca   : > { %4920 = vmatpush3.bf16.msra.mxu1 %v4917_v27  ;;  %v3614_v27 = vld [vmem:[%s6685_s7 + $0x18] sm:$0xff] }
 0x7cb   : > { %4922 = vmatprep.subr.bf16.mxu1 %v4921_v8 }
 0x7ce   : > { %4924 = vmatpush3.bf16.msra.mxu1 %v4921_v8 }
 0x7cf   : > { %4926 = vmatprep.subr.bf16.mxu1 %v4925_v18 }
 0x7d2   : > { %4928 = vmatpush3.bf16.msra.mxu1 %v4925_v18 }
 0x7d3   : > { %4930 = vmatprep.subr.bf16.mxu1 %v4929_v14 }
 0x7d6   : > { %4932 = vmatpush3.bf16.msra.mxu1 %v4929_v14 }
 0x7d7   : > { %4934 = vmatprep.subr.bf16.mxu1 %v4933_v19 }
 0x7da   : > { %4936 = vmatpush3.bf16.msra.mxu1 %v4933_v19 }
 0x7db   : > { %4938 = vmatprep.subr.bf16.mxu1 %v4937_v33 }
 0x7de   : > { %4940 = vmatpush3.bf16.msra.mxu1 %v4937_v33 }
 0x895   : > { %v2880_v43 = vpop.f32.mrb[2].mxu0 }
 0x896   : > { %v2885_v2 = vmul.f32 0.0078125, %v2880_v43  ;;  %v2882_v20 = vpop.f32.mrb[3].mxu0 }
 0x897   : > { %v2886_v34 = vmul.f32 0.0078125, %v2882_v20 }
 0x898   : > { %v2887_v56 = vmul.f32 %v2885_v2, %v2885_v2  ;;  %v2900_v25 = vrot.slane %v2885_v2, %v6023_v40 }
 0x89a   : > { %v2888_v58 = vsub.f32 %v2886_v34, %v2887_v56 }
 0x89c   : > { %v2889_v35 = vmax.f32 %v2888_v58, 0.0 }
 0x89e   : > { %v2890_v57 = vadd.f32 1e-05, %v2889_v35 }
 0x8a0   : > { %5195 = vrsqrt.f32 %v2890_v57 }
 0x8aa   : > { %v5196_v63 = vpop.eup %5195 }
 0x8ab   : > { %v2895_v13 = vrot.slane %v5196_v63, %v6023_v40 }
 0x8ad   : > { %v2896_v46 = vmul.f32 %v3611_v11, %v2895_v13 }
 0x8af   : > { %v2901_v39 = vmul.f32 %v2900_v25, %v2896_v46  ;;  %v2906_v37 = vrot.slane %v2896_v46, %v6023_v40  ;;  %v2930_v8 = vrot.slane %v2896_v46, %v6026_v41 }
 0x8b1   : > { %v2902_v10 = vsub.f32 %v3614_v27, %v2901_v39  ;;  %v2907_v16 = vmul.f32 %v2906_v37, %v6721_v17  ;;  %v2908_v18 = vmul.f32 %v2906_v37, %v6718_v9  ;;  %v2909_v22 = vmul.f32 %v2906_v37, %v6731_v52 }
 0x8b2   : > { %v2910_v48 = vmul.f32 %v2906_v37, %v6728_v31  ;;  %v2911_v14 = vmul.f32 %v2906_v37, %v6743_v30  ;;  %v2912_v38 = vmul.f32 %v2906_v37, %v6740_v23  ;;  %v2913_v19 = vmul.f32 %v2906_v37, %v6755_v28 }
 0x8b3   : > { %v2918_v1 = vrot.slane %v2902_v10, %v6023_v40  ;;  %v2942_v24 = vrot.slane %v2902_v10, %v6026_v41  ;;  %v2914_v29 = vmul.f32 %v2906_v37, %v6752_v26  ;;  %v2931_v17 = vmul.f32 %v2930_v8, %v6767_v12 }
 0x8b4   : > { %v2932_v9 = vmul.f32 %v2930_v8, %v6764_v6  ;;  %v2933_v28 = vmul.f32 %v2930_v8, %v6779_v51  ;;  %v2934_v58 = vmul.f32 %v2930_v8, %v6776_v21  ;;  %v2935_v26 = vmul.f32 %v2930_v8, %v6791_v60 }
 0x8b5   : > { %v2919_v33 = vadd.f32 %v2918_v1, %v2907_v16  ;;  %v2920_v52 = vadd.f32 %v2918_v1, %v2908_v18  ;;  %v2921_v43 = vadd.f32 %v2918_v1, %v2909_v22  ;;  %v2922_v31 = vadd.f32 %v2918_v1, %v2910_v48 }
 0x8b6   : > { %v2923_v2 = vadd.f32 %v2918_v1, %v2911_v14  ;;  %v2924_v20 = vadd.f32 %v2918_v1, %v2912_v38  ;;  %v2925_v34 = vadd.f32 %v2918_v1, %v2913_v19  ;;  %v2926_v30 = vadd.f32 %v2918_v1, %v2914_v29  ;;  %v3615_v14 = vld [vmem:[%s2984_s3] ss:$0 sm:$0xff] }
 0x8b7   : > { %v2951_v56 = vmax.f32 %v2919_v33, 0.0  ;;  %v2952_v23 = vmax.f32 %v2920_v52, 0.0  ;;  %v2953_v35 = vmax.f32 %v2921_v43, 0.0  ;;  %v2943_v12 = vadd.f32 %v2942_v24, %v2931_v17 }
 0x8b8   : > { %v2944_v6 = vadd.f32 %v2942_v24, %v2932_v9  ;;  %v2945_v57 = vadd.f32 %v2942_v24, %v2933_v28  ;;  %v2946_v63 = vadd.f32 %v2942_v24, %v2934_v58  ;;  %v2947_v11 = vadd.f32 %v2942_v24, %v2935_v26 }
 0x8b9   : > { %4421 = vmatprep.mubr.f32.mxu1 %v2951_v56  ;;  %v2936_v13 = vmul.f32 %v2930_v8, %v6788_v55  ;;  %v2937_v25 = vmul.f32 %v2930_v8, %v6803_v59  ;;  %v2938_v46 = vmul.f32 %v2930_v8, %v6800_v36  ;;  %v2954_v51 = vmax.f32 %v2922_v31, 0.0 }
 0x8ba   : > { %4422 = vmatmul.mubr.f32.vlgmr.msra.gmra.mrb[16].mxu1 %v2952_v23  ;;  %v2955_v37 = vmax.f32 %v2923_v2, 0.0  ;;  %v2956_v60 = vmax.f32 %v2924_v20, 0.0  ;;  %v2957_v10 = vmax.f32 %v2925_v34, 0.0  ;;  %v2958_v16 = vmax.f32 %v2926_v30, 0.0 }
 0x8bb   : > { %4424 = vmatprep.mubr.f32.mxu1 %v2953_v35  ;;  %v2948_v27 = vadd.f32 %v2942_v24, %v2936_v13  ;;  %v2949_v21 = vadd.f32 %v2942_v24, %v2937_v25  ;;  %v2950_v39 = vadd.f32 %v2942_v24, %v2938_v46  ;;  %v2959_v18 = vmax.f32 %v2943_v12, 0.0 }
 0x8bc   : > { %v2960_v55 = vmax.f32 %v2944_v6, 0.0  ;;  %v2961_v59 = vmax.f32 %v2945_v57, 0.0  ;;  %v2962_v36 = vmax.f32 %v2946_v63, 0.0  ;;  %v2963_v8 = vmax.f32 %v2947_v11, 0.0 }
 0x8bd   : > { %v2964_v22 = vmax.f32 %v2948_v27, 0.0  ;;  %v2965_v48 = vmax.f32 %v2949_v21, 0.0  ;;  %v2966_v1 = vmax.f32 %v2950_v39, 0.0 }
 0x8be   : > { %4425 = vmatmul.mubr.f32.gmra.mrb[18].mxu1 %v2954_v51 }
 0x8bf   : > { %4427 = vmatprep.mubr.f32.mxu1 %v2955_v37 }
 0x8c2   : > { %4428 = vmatmul.mubr.f32.gmra.mrb[20].mxu1 %v2956_v60 }
 0x8c3   : > { %4430 = vmatprep.mubr.f32.mxu1 %v2957_v10 }
 0x8c6   : > { %4431 = vmatmul.mubr.f32.gmra.mrb[22].mxu1 %v2958_v16 }
 0x8c7   : > { %4433 = vmatprep.mubr.f32.mxu1 %v2959_v18 }
 0x8ca   : > { %4434 = vmatmul.mubr.f32.gmra.mrb[24].mxu1 %v2960_v55 }
 0x8cb   : > { %4436 = vmatprep.mubr.f32.mxu1 %v2961_v59 }
 0x8ce   : > { %4437 = vmatmul.mubr.f32.gmra.mrb[26].mxu1 %v2962_v36 }
 0x8cf   : > { %4439 = vmatprep.mubr.f32.mxu1 %v2963_v8 }
 0x8d2   : > { %4440 = vmatmul.mubr.f32.gmra.mrb[28].mxu1 %v2964_v22 }
 0x8d3   : > { %4442 = vmatprep.mubr.f32.mxu1 %v2965_v48 }
 0x8d6   : > { %4443 = vmatmul.mubr.f32.gmra.mrb[30].mxu1 %v2966_v1 }
 0x98d   : > { %v4423_v38 = vpop.f32.mrb[16].mxu1 }
 0x98e   : > { %v3064_v19 = vadd.f32 %v4423_v38, %v3615_v14  ;;  %v3058_v24 = vpop.f32.mrb[17].mxu1 }
 0x98f   : > { %v3059_v29 = vadd.f32 %v3615_v14, %v3058_v24 }
 0x990   : > { %v6866_v44 = vadd.f32 %v5325_v44, %v3064_v19  }
 0x991   : > { %v6869_v45 = vadd.f32 %v5329_v45, %v3059_v29   ;;  %v4426_v33 = vpop.f32.mrb[18].mxu1 }
 0x992   : > { %v7180_v17 = vmov %v6866_v44  ;;  %v3074_v52 = vadd.f32 %v4426_v33, %v3615_v14  ;;  %v3068_v43 = vpop.f32.mrb[19].mxu1 }
 0x993   : > { %v7181_v9 = vmov %v6869_v45  ;;  %v3069_v31 = vadd.f32 %v3615_v14, %v3068_v43  ;;  %v3156_v36 = vmul.f32 (%p6914_p0), %v7180_v17, %v7180_v17 }
 0x994   : > { %v6872_v49 = vadd.f32 %v5317_v49, %v3074_v52   ;;  %v3155_v59 = vmul.f32 (%p6914_p0), %v7181_v9, %v7181_v9  ;;  %v4943_v22 = vpack.c.bf16 (%p6914_p0), %v7180_v17, %v7181_v9 }
 0x995   : > { %v6875_v53 = vadd.f32 %v5321_v53, %v3069_v31   ;;  %v4429_v34 = vpop.f32.mrb[20].mxu1 }
 0x996   : > { %v7182_v2 = vmov %v6872_v49  ;;  %v3084_v30 = vadd.f32 %v4429_v34, %v3615_v14  ;;  %v3078_v56 = vpop.f32.mrb[21].mxu1  ;;  %v4941_v1 = vpack.c.bf16 (%p6914_p0), %v3156_v36, %v3155_v59  ;;  %v3333_v59 = vld [vmem:[%s7213_s10 + $0x48] sm:$0xff] (%p6914_p0) }
 0x997   : > { %v7183_v20 = vmov %v6875_v53  ;;  %v3079_v23 = vadd.f32 %v3615_v14, %v3078_v56  ;;  %v3158_v48 = vmul.f32 (%p6914_p0), %v7182_v2, %v7182_v2 }
 0x998   : > { %v6878_v61 = vadd.f32 %v5309_v61, %v3084_v30   ;;  %v3157_v8 = vmul.f32 (%p6914_p0), %v7183_v20, %v7183_v20  ;;  %4942 = vmatprep.subr.bf16.mxu0 (%p6914_p0), %v4941_v1  ;;  %v3336_v1 = vld [vmem:[%s7213_s10 + $0x60] sm:$0xff] (%p6914_p0) }
 0x999   : > { %v6881_v0 = vadd.f32 %v5313_v0, %v3079_v23   ;;  %v4432_v44 = vpop.f32.mrb[22].mxu1  ;;  %4944 = vmatpush1.bf16.msra.mxu0 (%p6914_p0), %v4943_v22  ;;  %v3335_v22 = vld [vmem:[%s7213_s10 + $0x58] sm:$0xff] (%p6914_p0) }
 0x99a   : > { %v7184_v28 = vmov %v6878_v61  ;;  %v3094_v45 = vadd.f32 %v4432_v44, %v3615_v14  ;;  %v3088_v35 = vpop.f32.mrb[23].mxu1  ;;  %v7211_v44 = vmov %v7180_v17 }
 0x99b   : > { %v7185_v58 = vmov %v6881_v0  ;;  %v3089_v26 = vadd.f32 %v3615_v14, %v3088_v35 }
 0x99c   : > { %v6884_v54 = vadd.f32 %v5301_v54, %v3094_v45   ;;  %v7212_v45 = vmov %v7181_v9 }
 0x99d   : > { %v6887_v5 = vadd.f32 %v5305_v5, %v3089_v26   ;;  %v4435_v49 = vpop.f32.mrb[24].mxu1 }
 0x99e   : > { %v7186_v12 = vmov %v6884_v54  ;;  %v3104_v53 = vadd.f32 %v4435_v49, %v3615_v14  ;;  %v3098_v57 = vpop.f32.mrb[25].mxu1  ;;  %v7209_v49 = vmov %v7182_v2 }
 0x99f   : > { %v7187_v6 = vmov %v6887_v5  ;;  %v3099_v63 = vadd.f32 %v3615_v14, %v3098_v57  ;;  %v5338_v57 = vmov (%p6914_p0), 1.0  }
 0x9a0   : > { %v6890_v47 = vadd.f32 %v5293_v47, %v3104_v53   ;;  %v7210_v53 = vmov %v7183_v20  ;;  %v4955_v29 = vpack.c.bf16 (%p6914_p0), %v7186_v12, %v7187_v6 }
 0x9a1   : > { %v6893_v62 = vadd.f32 %v5297_v62, %v3099_v63   ;;  %v4438_v61 = vpop.f32.mrb[26].mxu1  ;;  %v3324_v63 = vld [vmem:[%s7213_s10] sm:$0xff] (%p6914_p0) }
 0x9a2   : > { %v7188_v11 = vmov %v6890_v47  ;;  %v3114_v0 = vadd.f32 %v4438_v61, %v3615_v14  ;;  %v3108_v25 = vpop.f32.mrb[27].mxu1  ;;  %v7207_v61 = vmov %v7184_v28 }
 0x9a3   : > { %v7189_v13 = vmov %v6893_v62  ;;  %v3109_v46 = vadd.f32 %v3615_v14, %v3108_v25  ;;  %v3164_v24 = vmul.f32 (%p6914_p0), %v7188_v11, %v7188_v11  ;;  %v3325_v61 = vld [vmem:[%s7213_s10 + $0x8] sm:$0xff] (%p6914_p0)  ;;  %v3326_v25 = vld [vmem:[%s7213_s10 + $0x10] sm:$0xff] (%p6914_p0) }
 0x9a4   : > { %v6896_v7 = vadd.f32 %v5285_v7, %v3114_v0   ;;  %v7208_v0 = vmov %v7185_v58  ;;  %v3163_v19 = vmul.f32 (%p6914_p0), %v7189_v13, %v7189_v13  ;;  %v4959_v31 = vpack.c.bf16 (%p6914_p0), %v7188_v11, %v7189_v13 }
 0x9a5   : > { %v6899_v50 = vadd.f32 %v5289_v50, %v3109_v46   ;;  %v4441_v54 = vpop.f32.mrb[28].mxu1  ;;  %v4973_v0 = vpack.c.bf16 (%p6914_p0), %v3325_v61, %v3324_v63  ;;  %v3327_v46 = vld [vmem:[%s7213_s10 + $0x18] sm:$0xff] (%p6914_p0) }
 0x9a6   : > { %v7190_v51 = vmov %v6896_v7  ;;  %v3124_v5 = vadd.f32 %v4441_v54, %v3615_v14  ;;  %v3118_v21 = vpop.f32.mrb[29].mxu1  ;;  %v7205_v54 = vmov %v7186_v12  ;;  %v4957_v33 = vpack.c.bf16 (%p6914_p0), %v3164_v24, %v3163_v19 }
 0x9a7   : > { %v7191_v27 = vmov %v6899_v50  ;;  %v3119_v39 = vadd.f32 %v3615_v14, %v3118_v21  ;;  %v7201_v7 = vmov %v7190_v51  ;;  %v3166_v43 = vmul.f32 (%p6914_p0), %v7190_v51, %v7190_v51  ;;  %4974 = vmatprep.subr.bf16.mxu1 (%p6914_p0), %v4973_v0  ;;  %v3329_v21 = vld [vmem:[%s7213_s10 + $0x28] sm:$0xff] (%p6914_p0) }
 0x9a8   : > { %v6902_v15 = vadd.f32 %v5277_v15, %v3124_v5   ;;  %v7202_v50 = vmov %v7191_v27  ;;  %v7206_v5 = vmov %v7187_v6  ;;  %v3159_v7 = vmul.f32 (%p6914_p0), %v7185_v58, %v7185_v58  ;;  %4976 = vmatpush3.bf16.msra.mxu1 (%p6914_p0), %v4973_v0 }
 0x9a9   : > { %v6905_v42 = vadd.f32 %v5281_v42, %v3119_v39   ;;  %v4444_v47 = vpop.f32.mrb[30].mxu1  ;;  %v3160_v50 = vmul.f32 (%p6914_p0), %v7184_v28, %v7184_v28  ;;  %v3165_v52 = vmul.f32 (%p6914_p0), %v7191_v27, %v7191_v27  ;;  %v4963_v23 = vpack.c.bf16 (%p6914_p0), %v7190_v51, %v7191_v27  ;;  %v3328_v5 = vld [vmem:[%s7213_s10 + $0x20] sm:$0xff] (%p6914_p0) }
 0x9aa   : > { %v7192_v37 = vmov %v6902_v15  ;;  %v3134_v62 = vadd.f32 %v4444_v47, %v3615_v14  ;;  %v3128_v10 = vpop.f32.mrb[31].mxu1  ;;  %v7203_v47 = vmov %v7188_v11  ;;  %2424 = sbr.rel (!%p6914_p0) target bundleno = 1451 (0x5ab), region = 148  ;;  %v4977_v54 = vpack.c.bf16 (%p6914_p0), %v3327_v46, %v3326_v25 }
 0x9ab   : > { %v7193_v60 = vmov %v6905_v42  ;;  %v3129_v16 = vadd.f32 %v3615_v14, %v3128_v10  ;;  %v7199_v15 = vmov %v7192_v37  ;;  %v4949_v3 = vpack.c.bf16 (%p6914_p0), %v3160_v50, %v3159_v7  ;;  %v3330_v47 = vld [vmem:[%s7213_s10 + $0x30] sm:$0xff] (%p6914_p0)  ;;  %v3337_v7 = vld [vmem:[%s7213_s10 + $0x68] sm:$0xff] (%p6914_p0) }
 0x9ac   : > { %v6908_v4 = vadd.f32 %v5269_v4, %v3134_v62   ;;  %v7200_v42 = vmov %v7193_v60  ;;  %v7204_v62 = vmov %v7189_v13  ;;  %v4945_v15 = vpack.c.bf16 (%p6914_p0), %v3158_v48, %v3157_v8  ;;  %4978 = vmatprep.subr.bf16.mxu1 (%p6914_p0), %v4977_v54  ;;  %v3334_v8 = vld [vmem:[%s7213_s10 + $0x50] sm:$0xff] (%p6914_p0) }
 0x9ad   : > { %v6911_v32 = vadd.f32 %v5273_v32, %v3129_v16   ;;  %v4947_v42 = vpack.c.bf16 (%p6914_p0), %v7182_v2, %v7183_v20  ;;  %v4951_v14 = vpack.c.bf16 (%p6914_p0), %v7184_v28, %v7185_v58  ;;  %v4961_v34 = vpack.c.bf16 (%p6914_p0), %v3166_v43, %v3165_v52  ;;  %4980 = vmatpush3.bf16.msra.mxu1 (%p6914_p0), %v4977_v54  ;;  %v3331_v62 = vld [vmem:[%s7213_s10 + $0x38] sm:$0xff] (%p6914_p0)  ;;  %v3332_v16 = vld [vmem:[%s7213_s10 + $0x40] sm:$0xff] (%p6914_p0) }
 0x9ae   : > { %v7194_v18 = vmov %v6908_v4  ;;  %4946 = vmatprep.subr.bf16.mxu0 (%p6914_p0), %v4945_v15  ;;  %v3167_v30 = vmul.f32 (%p6914_p0), %v7193_v60, %v7193_v60  ;;  %v3168_v56 = vmul.f32 (%p6914_p0), %v7192_v37, %v7192_v37  ;;  %v4967_v26 = vpack.c.bf16 (%p6914_p0), %v7192_v37, %v7193_v60  ;;  %v3338_v15 = vld [vmem:[%s7213_s10 + $0x70] sm:$0xff] (%p6914_p0)  ;;  %v3153_v43 = vld [vmem:[#allocation2 + $0xa0] sm:$0xff] (%p6914_p0) }
 0x9af   : > { %v7195_v55 = vmov %v6911_v32  ;;  %v7197_v4 = vmov %v7194_v18  ;;  %4948 = vmatpush1.bf16.msra.mxu0 (%p6914_p0), %v4947_v42  ;;  %v3170_v35 = vmul.f32 (%p6914_p0), %v7194_v18, %v7194_v18  ;;  %v4981_v39 = vpack.c.bf16 (%p6914_p0), %v3329_v21, %v3328_v5  ;;  %v3339_v42 = vld [vmem:[%s7213_s10 + $0x78] sm:$0xff] (%p6914_p0) }
 0x9b0   : > { %v7198_v32 = vmov %v7195_v55  ;;  %v3161_v4 = vmul.f32 (%p6914_p0), %v7187_v6, %v7187_v6  ;;  %4950 = vmatprep.subr.bf16.mxu0 (%p6914_p0), %v4949_v3  ;;  %v4965_v44 = vpack.c.bf16 (%p6914_p0), %v3168_v56, %v3167_v30  ;;  %v3169_v45 = vmul.f32 (%p6914_p0), %v7195_v55, %v7195_v55  ;;  %v3154_v56 = vld [vmem:[#allocation2 + $0xa8] sm:$0xff] (%p6914_p0) }
 0x9b1   :  { %v3162_v32 = vmul.f32 %v7186_v12, %v7186_v12  ;;  %v4971_v53 = vpack.c.bf16 %v7194_v18, %v7195_v55  ;;  %4982 = vmatprep.subr.bf16.mxu1 %v4981_v39  ;;  %v4985_v10 = vpack.c.bf16 %v3331_v62, %v3330_v47  ;;  %v4989_v36 = vpack.c.bf16 %v3333_v59, %v3332_v16 }
 0x9b2   :  { %v4969_v49 = vpack.c.bf16 %v3170_v35, %v3169_v45  ;;  %4984 = vmatpush3.bf16.msra.mxu1 %v4981_v39  ;;  %v4993_v48 = vpack.c.bf16 %v3335_v22, %v3334_v8  ;;  %v4997_v50 = vpack.c.bf16 %v3337_v7, %v3336_v1  ;;  %v5001_v3 = vpack.c.bf16 %v3339_v42, %v3338_v15 }
 0x9b3   :  { %v4953_v38 = vpack.c.bf16 %v3162_v32, %v3161_v4  ;;  %4952 = vmatpush1.bf16.msra.mxu0 %v4951_v14  ;;  %4986 = vmatprep.subr.bf16.mxu1 %v4985_v10 }
 0x9b5   :  { %4954 = vmatprep.subr.bf16.mxu0 %v4953_v38 }
 0x9b6   :  { %4988 = vmatpush3.bf16.msra.mxu1 %v4985_v10 }
 0x9b7   :  { %4956 = vmatpush1.bf16.msra.mxu0 %v4955_v29  ;;  %4990 = vmatprep.subr.bf16.mxu1 %v4989_v36 }
 0x9b8   :  { %4958 = vmatprep.subr.bf16.mxu0 %v4957_v33 }
 0x9ba   :  { %4992 = vmatpush3.bf16.msra.mxu1 %v4989_v36 }
 0x9bb   :  { %4960 = vmatpush1.bf16.msra.mxu0 %v4959_v31  ;;  %4994 = vmatprep.subr.bf16.mxu1 %v4993_v48 }
 0x9bc   :  { %4962 = vmatprep.subr.bf16.mxu0 %v4961_v34 }
 0x9be   :  { %4996 = vmatpush3.bf16.msra.mxu1 %v4993_v48 }
 0x9bf   :  { %4964 = vmatpush1.bf16.msra.mxu0 %v4963_v23  ;;  %4998 = vmatprep.subr.bf16.mxu1 %v4997_v50 }
 0x9c0   :  { %4966 = vmatprep.subr.bf16.mxu0 %v4965_v44 }
 0x9c2   :  { %5000 = vmatpush3.bf16.msra.mxu1 %v4997_v50 }
 0x9c3   :  { %4968 = vmatpush1.bf16.msra.mxu0 %v4967_v26  ;;  %5002 = vmatprep.subr.bf16.mxu1 %v5001_v3 }
 0x9c4   :  { %4970 = vmatprep.subr.bf16.mxu0 %v4969_v49 }
 0x9c6   :  { %5004 = vmatpush3.bf16.msra.mxu1 %v5001_v3 }
 0x9c7   :  { %4972 = vmatpush1.bf16.msra.mxu0 %v4971_v53 }
 0x9ca   :  { %3236 = vmatmul.mubr.f32.vlgmr.msra.gmra.mrb[0].mxu0 %v5338_v57 }
 0xa9d   :  { %v3237_v4 = vpop.f32.mrb[0].mxu0 }
 0xa9e   :  { %v3242_v32 = vmul.f32 0.0078125, %v3237_v4  ;;  %v3239_v14 = vpop.f32.mrb[1].mxu0 }
 0xa9f   :  { %v3243_v38 = vmul.f32 0.0078125, %v3239_v14 }
 0xaa0   :  { %v3244_v19 = vmul.f32 %v3242_v32, %v3242_v32  ;;  %v3257_v34 = vrot.slane %v3242_v32, %v6023_v40 }
 0xaa2   :  { %v3245_v24 = vsub.f32 %v3243_v38, %v3244_v19  ;;  %v3616_v19 = vld [vmem:[%s7214_s2] ss:$0 sm:$0xff] }
 0xaa4   :  { %v3246_v29 = vmax.f32 %v3245_v24, 0.0 }
 0xaa6   :  { %v3247_v33 = vadd.f32 1e-05, %v3246_v29 }
 0xaa8   :  { %5197 = vrsqrt.f32 %v3247_v33 }
 0xab2   :  { %v5198_v52 = vpop.eup %5197 }
 0xab3   :  { %v3252_v31 = vrot.slane %v5198_v52, %v6023_v40 }
 0xab5   :  { %v3253_v30 = vmul.f32 %v3252_v31, %v3153_v43 }
 0xab7   :  { %v3258_v23 = vmul.f32 %v3257_v34, %v3253_v30  ;;  %v3263_v44 = vrot.slane %v3253_v30, %v6023_v40  ;;  %v3287_v45 = vrot.slane %v3253_v30, %v6026_v41 }
 0xab9   :  { %v3259_v35 = vsub.f32 %v3154_v56, %v3258_v23  ;;  %v3264_v26 = vmul.f32 %v3263_v44, %v7181_v9  ;;  %v3265_v49 = vmul.f32 %v3263_v44, %v7180_v17  ;;  %v3266_v53 = vmul.f32 %v3263_v44, %v7183_v20 }
 0xaba   :  { %v3267_v57 = vmul.f32 %v3263_v44, %v7182_v2  ;;  %v3268_v61 = vmul.f32 %v3263_v44, %v7185_v58  ;;  %v3269_v0 = vmul.f32 %v3263_v44, %v7184_v28  ;;  %v3270_v25 = vmul.f32 %v3263_v44, %v7187_v6 }
 0xabb   :  { %v3275_v63 = vrot.slane %v3259_v35, %v6023_v40  ;;  %v3299_v46 = vrot.slane %v3259_v35, %v6026_v41  ;;  %v3271_v54 = vmul.f32 %v3263_v44, %v7186_v12  ;;  %v3288_v9 = vmul.f32 %v3287_v45, %v7189_v13 }
 0xabc   :  { %v3289_v17 = vmul.f32 %v3287_v45, %v7188_v11  ;;  %v3290_v6 = vmul.f32 %v3287_v45, %v7191_v27  ;;  %v3291_v41 = vmul.f32 %v3287_v45, %v7190_v51  ;;  %v3292_v12 = vmul.f32 %v3287_v45, %v7193_v60 }
 0xabd   :  { %v3276_v5 = vadd.f32 %v3275_v63, %v3264_v26  ;;  %v3277_v20 = vadd.f32 %v3275_v63, %v3265_v49  ;;  %v3278_v21 = vadd.f32 %v3275_v63, %v3266_v53  ;;  %v3279_v2 = vadd.f32 %v3275_v63, %v3267_v57 }
 0xabe   :  { %v3280_v39 = vadd.f32 %v3275_v63, %v3268_v61  ;;  %v3281_v40 = vadd.f32 %v3275_v63, %v3269_v0  ;;  %v3282_v47 = vadd.f32 %v3275_v63, %v3270_v25  ;;  %v3283_v58 = vadd.f32 %v3275_v63, %v3271_v54 }
 0xabf   :  { %v3308_v62 = vmax.f32 %v3276_v5, 0.0  ;;  %v3309_v28 = vmax.f32 %v3277_v20, 0.0  ;;  %v3310_v10 = vmax.f32 %v3278_v21, 0.0  ;;  %v3300_v13 = vadd.f32 %v3299_v46, %v3288_v9 }
 0xac0   :  { %v3301_v11 = vadd.f32 %v3299_v46, %v3289_v17  ;;  %v3302_v16 = vadd.f32 %v3299_v46, %v3290_v6  ;;  %v3303_v59 = vadd.f32 %v3299_v46, %v3291_v41  ;;  %v3304_v36 = vadd.f32 %v3299_v46, %v3292_v12 }
 0xac1   :  { %4477 = vmatprep.mubr.f32.mxu1 %v3308_v62  ;;  %v3293_v8 = vmul.f32 %v3287_v45, %v7192_v37  ;;  %v3294_v22 = vmul.f32 %v3287_v45, %v7195_v55  ;;  %v3295_v48 = vmul.f32 %v3287_v45, %v7194_v18  ;;  %v3311_v27 = vmax.f32 %v3279_v2, 0.0 }
 0xac2   :  { %4478 = vmatmul.mubr.f32.vlgmr.msra.gmra.mrb[0].mxu1 %v3309_v28  ;;  %v3312_v50 = vmax.f32 %v3280_v39, 0.0  ;;  %v3313_v60 = vmax.f32 %v3281_v40, 0.0  ;;  %v3314_v15 = vmax.f32 %v3282_v47, 0.0  ;;  %v3315_v42 = vmax.f32 %v3283_v58, 0.0 }
 0xac3   :  { %4480 = vmatprep.mubr.f32.mxu1 %v3310_v10  ;;  %v3305_v1 = vadd.f32 %v3299_v46, %v3293_v8  ;;  %v3306_v51 = vadd.f32 %v3299_v46, %v3294_v22  ;;  %v3307_v7 = vadd.f32 %v3299_v46, %v3295_v48  ;;  %v3316_v3 = vmax.f32 %v3300_v13, 0.0 }
 0xac4   :  { %v3317_v37 = vmax.f32 %v3301_v11, 0.0  ;;  %v3318_v55 = vmax.f32 %v3302_v16, 0.0  ;;  %v3319_v18 = vmax.f32 %v3303_v59, 0.0  ;;  %v3320_v4 = vmax.f32 %v3304_v36, 0.0 }
 0xac5   :  { %v3321_v32 = vmax.f32 %v3305_v1, 0.0  ;;  %v3322_v14 = vmax.f32 %v3306_v51, 0.0  ;;  %v3323_v38 = vmax.f32 %v3307_v7, 0.0 }
 0xac6   :  { %4481 = vmatmul.mubr.f32.gmra.mrb[2].mxu1 %v3311_v27 }
 0xac7   :  { %4483 = vmatprep.mubr.f32.mxu1 %v3312_v50 }
 0xaca   :  { %4484 = vmatmul.mubr.f32.gmra.mrb[4].mxu1 %v3313_v60 }
 0xacb   :  { %4486 = vmatprep.mubr.f32.mxu1 %v3314_v15 }
 0xace   :  { %4487 = vmatmul.mubr.f32.gmra.mrb[6].mxu1 %v3315_v42 }
 0xacf   :  { %4489 = vmatprep.mubr.f32.mxu1 %v3316_v3 }
 0xad2   :  { %4490 = vmatmul.mubr.f32.gmra.mrb[8].mxu1 %v3317_v37 }
 0xad3   :  { %4492 = vmatprep.mubr.f32.mxu1 %v3318_v55 }
 0xad6   :  { %4493 = vmatmul.mubr.f32.gmra.mrb[10].mxu1 %v3319_v18 }
 0xad7   :  { %4495 = vmatprep.mubr.f32.mxu1 %v3320_v4 }
 0xada   :  { %4496 = vmatmul.mubr.f32.gmra.mrb[12].mxu1 %v3321_v32 }
 0xadb   :  { %4498 = vmatprep.mubr.f32.mxu1 %v3322_v14 }
 0xade   :  { %4499 = vmatmul.mubr.f32.gmra.mrb[14].mxu1 %v3323_v38 }
 0xb95   :  { %v4479_v24 = vpop.f32.mrb[0].mxu1 }
 0xb96   :  { %v3419_v29 = vadd.f32 %v4479_v24, %v3616_v19  ;;  %v3413_v33 = vpop.f32.mrb[1].mxu1 }
 0xb97   :  { %v3414_v52 = vadd.f32 %v3616_v19, %v3413_v33 }
 0xb98   :  { %3493 = vst [vmem:[%s7215_s19 + $0x8] sm:$0xff] %v3419_v29 }
 0xb99   :  { %3492 = vst [vmem:[%s7215_s19] sm:$0xff] %v3414_v52  ;;  %v4482_v43 = vpop.f32.mrb[2].mxu1 }
 0xb9a   :  { %v3429_v31 = vadd.f32 %v4482_v43, %v3616_v19  ;;  %v3423_v34 = vpop.f32.mrb[3].mxu1 }
 0xb9b   :  { %v3424_v30 = vadd.f32 %v3616_v19, %v3423_v34 }
 0xb9c   :  { %3495 = vst [vmem:[%s7215_s19 + $0x18] sm:$0xff] %v3429_v31 }
 0xb9d   :  { %3494 = vst [vmem:[%s7215_s19 + $0x10] sm:$0xff] %v3424_v30  ;;  %v4485_v56 = vpop.f32.mrb[4].mxu1 }
 0xb9e   :  { %v3439_v23 = vadd.f32 %v4485_v56, %v3616_v19  ;;  %v3433_v44 = vpop.f32.mrb[5].mxu1 }
 0xb9f   :  { %v3434_v45 = vadd.f32 %v3616_v19, %v3433_v44 }
 0xba0   :  { %3497 = vst [vmem:[%s7215_s19 + $0x28] sm:$0xff] %v3439_v23 }
 0xba1   :  { %3496 = vst [vmem:[%s7215_s19 + $0x20] sm:$0xff] %v3434_v45  ;;  %v4488_v35 = vpop.f32.mrb[6].mxu1 }
 0xba2   :  { %v3449_v26 = vadd.f32 %v4488_v35, %v3616_v19  ;;  %v3443_v49 = vpop.f32.mrb[7].mxu1 }
 0xba3   :  { %v3444_v53 = vadd.f32 %v3616_v19, %v3443_v49 }
 0xba4   :  { %3499 = vst [vmem:[%s7215_s19 + $0x38] sm:$0xff] %v3449_v26 }
 0xba5   :  { %3498 = vst [vmem:[%s7215_s19 + $0x30] sm:$0xff] %v3444_v53  ;;  %v4491_v57 = vpop.f32.mrb[8].mxu1 }
 0xba6   :  { %v3459_v63 = vadd.f32 %v4491_v57, %v3616_v19  ;;  %v3453_v61 = vpop.f32.mrb[9].mxu1 }
 0xba7   :  { %v3454_v0 = vadd.f32 %v3616_v19, %v3453_v61 }
 0xba8   :  { %3501 = vst [vmem:[%s7215_s19 + $0x48] sm:$0xff] %v3459_v63 }
 0xba9   :  { %3500 = vst [vmem:[%s7215_s19 + $0x40] sm:$0xff] %v3454_v0  ;;  %v4494_v25 = vpop.f32.mrb[10].mxu1 }
 0xbaa   :  { %v3469_v46 = vadd.f32 %v4494_v25, %v3616_v19  ;;  %v3463_v54 = vpop.f32.mrb[11].mxu1 }
 0xbab   :  { %v3464_v9 = vadd.f32 %v3616_v19, %v3463_v54 }
 0xbac   :  { %3503 = vst [vmem:[%s7215_s19 + $0x58] sm:$0xff] %v3469_v46 }
 0xbad   :  { %3502 = vst [vmem:[%s7215_s19 + $0x50] sm:$0xff] %v3464_v9  ;;  %v4497_v17 = vpop.f32.mrb[12].mxu1 }
 0xbae   :  { %v3479_v5 = vadd.f32 %v4497_v17, %v3616_v19  ;;  %v3473_v20 = vpop.f32.mrb[13].mxu1 }
 0xbaf   :  { %v3474_v21 = vadd.f32 %v3616_v19, %v3473_v20 }
 0xbb0   :  { %3505 = vst [vmem:[%s7215_s19 + $0x68] sm:$0xff] %v3479_v5 }
 0xbb1   :  { %3504 = vst [vmem:[%s7215_s19 + $0x60] sm:$0xff] %v3474_v21  ;;  %v4500_v2 = vpop.f32.mrb[14].mxu1 }
 0xbb2   :  { %v3489_v39 = vadd.f32 %v4500_v2, %v3616_v19  ;;  %v3483_v40 = vpop.f32.mrb[15].mxu1 }
 0xbb3   :  { %v3484_v47 = vadd.f32 %v3616_v19, %v3483_v40 }
 0xbb4   :  { %3507 = vst [vmem:[%s7215_s19 + $0x78] sm:$0xff] %v3489_v39 }
 0xbb5   :  { %3506 = vst [vmem:[%s7215_s19 + $0x70] sm:$0xff] %v3484_v47 }

</bundles_post_ra>
